<compile_context>
chip_gen: v7x
topology: tpu7x:2x2x1
jax: 0.10.0
libtpu: 0.0.40
codegen_flags: <defaults>
</compile_context>

<pallas_src>
import functools

import jax
import jax.numpy as jnp
from jax.experimental import pallas as pl
from jax.experimental.pallas import tpu as pltpu

LANE = 128
SUBLANE = 8


def _round_up(n, m):
    return ((n + m - 1) // m) * m


def _pick_time_tiles(seq, batch_p, chw, bytes_per_elem=2, budget=4 << 20):
    """Largest divisor of seq whose x block (t_tile*batch_p, chw) fits the budget."""
    for t_tile in range(seq, 0, -1):
        if seq % t_tile == 0 and t_tile * batch_p * chw * bytes_per_elem <= budget:
            return t_tile
    # TODO(synk): if a single timestep block is still too big, also tile over chw.
    return 1


def _vmem_limit(needed_bytes):
    try:
        cap = pltpu.get_tpu_info().vmem_capacity_bytes
    except Exception:
        cap = 64 << 20
    hi = max(cap - (4 << 20), 32 << 20)
    return int(min(max(needed_bytes + (16 << 20), 32 << 20), hi))


# ---------------------------------------------------------------------------
# Fused kernel: (per grid step) feature projection tile; (last step) LSTM + FC head
# ---------------------------------------------------------------------------
def _fused_kernel(seq, batch_p, rows_per_tile, h_pad, num_layers, *refs):
    x_ref, wf_ref, bf_ref = refs[0], refs[1], refs[2]
    lstm_refs = refs[3:3 + 3 * num_layers]
    fc0 = 3 + 3 * num_layers
    w1_ref, b1_ref, w2_ref, b2_ref, w3_ref, b3_ref = refs[fc0:fc0 + 6]
    o_ref = refs[fc0 + 6]
    feat_scr, seq_scr, gates_scr = refs[fc0 + 7:fc0 + 10]

    # ---- Phase 1 (every grid step): project this time tile (bf16 MXU, f32 acc). ----
    i = pl.program_id(0)
    r0 = pl.multiple_of(i * rows_per_tile, rows_per_tile)
    proj = (jnp.dot(x_ref[...], wf_ref[...], preferred_element_type=jnp.float32)
            + bf_ref[...])
    feat_scr[pl.ds(r0, rows_per_tile), :] = proj

    # ---- Phase 2 (last grid step only): multi-layer LSTM + FC head. ----
    @pl.when(i == pl.num_programs(0) - 1)
    def _():
        def sigmoid(v):  # one tanh EUP op instead of exp+recip
            return 0.5 * jnp.tanh(0.5 * v) + 0.5

        unroll = True if seq <= 16 else 4

        h_last = jnp.zeros((batch_p, h_pad), jnp.float32)
        for layer in range(num_layers):
            wih_ref = lstm_refs[3 * layer]
            whh_ref = lstm_refs[3 * layer + 1]
            b_ref = lstm_refs[3 * layer + 2]
            in_ref = feat_scr if layer == 0 else seq_scr
            write_seq = layer != num_layers - 1  # final layer: only last h is consumed

            # Hoisted input-to-hidden matmul + bias for ALL timesteps at once.
            # (in_ref is fully consumed here, so overwriting seq_scr below is safe.)
            gates_scr[...] = (
                jnp.dot(in_ref[...].astype(jnp.bfloat16), wih_ref[...],
                        preferred_element_type=jnp.float32)
                + b_ref[...]
            )

            def step(t, carry, whh_ref=whh_ref, write_seq=write_seq):
                h_prev, c_prev = carry
                rr = pl.multiple_of(t * batch_p, batch_p)     # sublane-aligned slice
                gates = gates_scr[pl.ds(rr, batch_p), :] + jnp.dot(
                    h_prev.astype(jnp.bfloat16), whh_ref[...],
                    preferred_element_type=jnp.float32)
                i_g = sigmoid(gates[:, 0 * h_pad:1 * h_pad])
                f_g = sigmoid(gates[:, 1 * h_pad:2 * h_pad])
                g_g = jnp.tanh(gates[:, 2 * h_pad:3 * h_pad])
                o_g = sigmoid(gates[:, 3 * h_pad:4 * h_pad])
                c_new = f_g * c_prev + i_g * g_g
                h_new = o_g * jnp.tanh(c_new)
                if write_seq:
                    seq_scr[pl.ds(rr, batch_p), :] = h_new
                return h_new, c_new

            init = (jnp.zeros((batch_p, h_pad), jnp.float32),
                    jnp.zeros((batch_p, h_pad), jnp.float32))
            h_last, _ = jax.lax.fori_loop(0, seq, step, init, unroll=unroll)

        # torch.cat([x1, x2], dim=2)[:, -1, :] -> FC head
        # (BatchNorm folded into FC1 at init; Dropout = identity in eval mode)
        r_last = (seq - 1) * batch_p
        x1_last = feat_scr[pl.ds(r_last, batch_p), :].astype(jnp.bfloat16)
        cat = jnp.concatenate([x1_last, h_last.astype(jnp.bfloat16)], axis=-1)

        h1 = jnp.maximum(
            jnp.dot(cat, w1_ref[...], preferred_element_type=jnp.float32) + b1_ref[...],
            0.0)
        h2 = jnp.maximum(
            jnp.dot(h1.astype(jnp.bfloat16), w2_ref[...],
                    preferred_element_type=jnp.float32) + b2_ref[...],
            0.0)
        o_ref[...] = (
            jnp.dot(h2.astype(jnp.bfloat16), w3_ref[...],
                    preferred_element_type=jnp.float32) + b3_ref[...]
        )


# ---------------------------------------------------------------------------
# Forward wrapper (one pallas_call; time grid for the projection stage)
# ---------------------------------------------------------------------------
@functools.partial(jax.jit, static_argnames=("num_classes",))
def lstm_group_forward(x, params, *, num_classes):
    batch, seq, c, hh, ww = x.shape
    chw = c * hh * ww

    in_pad = params["w_feat"].shape[1]
    lstm = params["lstm"]
    num_layers = len(lstm)
    h_pad = lstm[0][1].shape[0]          # whh is (h_pad, 4*h_pad)
    nc_pad = params["w3"].shape[1]
    batch_p = _round_up(batch, SUBLANE)

    # Time-major frames with batch padded to a full sublane group; row t*batch_p + b
    # holds frame (b, t), so every per-step (batch_p, feat) slice is aligned.
    x_tm = jnp.transpose(x, (1, 0, 2, 3, 4)).reshape(seq, batch, chw)
    x_tm = jnp.pad(x_tm, ((0, 0), (0, batch_p - batch), (0, 0)))
    x_flat = x_tm.reshape(seq * batch_p, chw).astype(jnp.bfloat16)

    # Time tiling for the memory-bound projection stage (degenerates to grid=(1,) when
    # the whole x fits comfortably, as in the small test below).
    t_tile = _pick_time_tiles(seq, batch_p, chw)
    nt = seq // t_tile
    rows_per_tile = t_tile * batch_p

    operands = [x_flat, params["w_feat"], params["b_feat"]]
    in_specs = [
        pl.BlockSpec((rows_per_tile, chw), lambda i: (i, 0)),
        pl.BlockSpec(params["w_feat"].shape, lambda i: (0, 0)),
        pl.BlockSpec(params["b_feat"].shape, lambda i: (0, 0)),
    ]
    for wih, whh, b in lstm:
        operands += [wih, whh, b]
        in_specs += [pl.BlockSpec(wih.shape, lambda i: (0, 0)),
                     pl.BlockSpec(whh.shape, lambda i: (0, 0)),
                     pl.BlockSpec(b.shape, lambda i: (0, 0))]
    for name in ("w1", "b1", "w2", "b2", "w3", "b3"):
        operands.append(params[name])
        in_specs.append(pl.BlockSpec(params[name].shape, lambda i: (0, 0)))

    kernel = functools.partial(_fused_kernel, seq, batch_p, rows_per_tile, h_pad,
                               num_layers)

    # Residency-derived scoped-VMEM limit (defaults are 16/32 MiB, not physical VMEM).
    def nbytes(a):
        return a.size * a.dtype.itemsize
    resident = (2 * rows_per_tile * chw * 2                 # x block, double-buffered bf16
                + 2 * sum(nbytes(a) for a in operands[1:])  # weights / biases
                + 2 * batch_p * nc_pad * 4)                 # output block
    scratch_bytes = (seq * batch_p * in_pad * 4
                     + seq * batch_p * h_pad * 4
                     + seq * batch_p * 4 * h_pad * 4)
    vmem_limit = _vmem_limit(resident + scratch_bytes)

    out_pad = pl.pallas_call(
        kernel,
        out_shape=jax.ShapeDtypeStruct((batch_p, nc_pad), jnp.float32),
        grid_spec=pltpu.PrefetchScalarGridSpec(
            num_scalar_prefetch=0,
            grid=(nt,),
            in_specs=in_specs,
            out_specs=pl.BlockSpec((batch_p, nc_pad), lambda i: (0, 0)),
            scratch_shapes=[
                pltpu.VMEM((seq * batch_p, in_pad), jnp.float32),      # feat sequence
                pltpu.VMEM((seq * batch_p, h_pad), jnp.float32),       # hidden sequence
                pltpu.VMEM((seq * batch_p, 4 * h_pad), jnp.float32),   # hoisted gates_x
            ],
        ),
        compiler_params=pltpu.CompilerParams(
            dimension_semantics=("arbitrary",),
            vmem_limit_bytes=vmem_limit,
        ),
    )(*operands)

    return out_pad[:batch, :num_classes]


# ---------------------------------------------------------------------------
# Parameters: raw (PyTorch-layout) weights + packing into lane-dense kernel layout
# ---------------------------------------------------------------------------
def init_raw_params(key, c, h, w, input_size, hidden_size, num_layers, num_classes):
    chw = c * h * w
    s = 0.05
    n_keys = 2 + 4 * num_layers + 8
    nk = iter(jax.random.split(key, n_keys))

    raw = {}
    raw["w_feat"] = s * jax.random.normal(next(nk), (chw, input_size), jnp.float32)
    raw["b_feat"] = s * jax.random.normal(next(nk), (input_size,), jnp.float32)

    lstm = []
    for l in range(num_layers):
        in_dim = input_size if l == 0 else hidden_size
        w_ih = s * jax.random.normal(next(nk), (4 * hidden_size, in_dim), jnp.float32)
        w_hh = s * jax.random.normal(next(nk), (4 * hidden_size, hidden_size), jnp.float32)
        b_ih = s * jax.random.normal(next(nk), (4 * hidden_size,), jnp.float32)
        b_hh = s * jax.random.normal(next(nk), (4 * hidden_size,), jnp.float32)
        lstm.append((w_ih, w_hh, b_ih, b_hh))
    raw["lstm"] = lstm

    fc_in = input_size + hidden_size
    raw["w1"] = s * jax.random.normal(next(nk), (fc_in, 512), jnp.float32)
    raw["b1"] = s * jax.random.normal(next(nk), (512,), jnp.float32)
    raw["gamma"] = 1.0 + 0.1 * jax.random.normal(next(nk), (512,), jnp.float32)
    raw["beta"] = 0.05 * jax.random.normal(next(nk), (512,), jnp.float32)
    raw["w2"] = s * jax.random.normal(next(nk), (512, 128), jnp.float32)
    raw["b2"] = s * jax.random.normal(next(nk), (128,), jnp.float32)
    raw["w3"] = s * jax.random.normal(next(nk), (128, num_classes), jnp.float32)
    raw["b3"] = s * jax.random.normal(next(nk), (num_classes,), jnp.float32)
    return raw


def pack_params(raw):
    """Zero-pad & repack raw weights into the lane-dense kernel layout (bf16 weights).

    Padding is mathematically exact: padded weight rows/cols and biases are zero, so
    every padded lane of every intermediate stays identically zero.
    """
    input_size = raw["w_feat"].shape[1]
    hidden = raw["lstm"][0][1].shape[1]
    num_classes = raw["w3"].shape[1]
    chw = raw["w_feat"].shape[0]

    in_pad = _round_up(max(input_size, LANE), LANE)
    h_pad = _round_up(max(hidden, LANE), LANE)
    nc_pad = _round_up(max(num_classes, LANE), LANE)

    params = {}
    wf = (jnp.zeros((chw, in_pad), jnp.float32).at[:, :input_size].set(raw["w_feat"]))
    params["w_feat"] = wf.astype(jnp.bfloat16)
    params["b_feat"] = (jnp.zeros((1, in_pad), jnp.float32)
                        .at[0, :input_size].set(raw["b_feat"]))

    lstm = []
    for l, (w_ih, w_hh, b_ih, b_hh) in enumerate(raw["lstm"]):
        in_dim = w_ih.shape[1]
        in_dim_pad = in_pad if l == 0 else h_pad
        wih_t = w_ih.T            # (in_dim, 4*hidden), gate order [i, f, g, o]
        whh_t = w_hh.T            # (hidden, 4*hidden)
        bias = b_ih + b_hh
        wih_p = jnp.zeros((in_dim_pad, 4 * h_pad), jnp.float32)
        whh_p = jnp.zeros((h_pad, 4 * h_pad), jnp.float32)
        bp = jnp.zeros((1, 4 * h_pad), jnp.float32)
        for g in range(4):
            src = slice(g * hidden, (g + 1) * hidden)
            dst = slice(g * h_pad, g * h_pad + hidden)
            wih_p = wih_p.at[:in_dim, dst].set(wih_t[:, src])
            whh_p = whh_p.at[:hidden, dst].set(whh_t[:, src])
            bp = bp.at[0, dst].set(bias[src])
        lstm.append((wih_p.astype(jnp.bfloat16), whh_p.astype(jnp.bfloat16), bp))
    params["lstm"] = lstm

    # FC1 with BatchNorm1d (eval mode: running_mean=0, running_var=1) folded in.
    eps = 1e-5
    scale = raw["gamma"] / jnp.sqrt(1.0 + eps)
    w1 = raw["w1"] * scale[None, :]
    b1 = raw["b1"] * scale + raw["beta"]
    w1p = jnp.zeros((in_pad + h_pad, 512), jnp.float32)
    w1p = w1p.at[:input_size, :].set(w1[:input_size, :])
    w1p = w1p.at[in_pad:in_pad + hidden, :].set(w1[input_size:, :])
    params["w1"] = w1p.astype(jnp.bfloat16)
    params["b1"] = b1[None, :]

    params["w2"] = raw["w2"].astype(jnp.bfloat16)
    params["b2"] = raw["b2"][None, :]

    w3p = (jnp.zeros((raw["w3"].shape[0], nc_pad), jnp.float32)
           .at[:, :num_classes].set(raw["w3"]))
    params["w3"] = w3p.astype(jnp.bfloat16)
    params["b3"] = (jnp.zeros((1, nc_pad), jnp.float32)
                    .at[0, :num_classes].set(raw["b3"]))
    return params


# ---------------------------------------------------------------------------
# Pure-JAX reference (unpadded, f32) for correctness checking
# ---------------------------------------------------------------------------
def reference_forward(x, raw):
    batch, seq, c, h, w = x.shape
    input_size = raw["w_feat"].shape[1]
    feats = x.reshape(batch * seq, -1) @ raw["w_feat"] + raw["b_feat"]
    x1 = feats.reshape(batch, seq, input_size)

    layer_in = x1
    for (w_ih, w_hh, b_ih, b_hh) in raw["lstm"]:
        H = w_hh.shape[1]
        hs = jnp.zeros((batch, H), jnp.float32)
        cs = jnp.zeros((batch, H), jnp.float32)
        outs = []
        for t in range(seq):
            gates = layer_in[:, t, :] @ w_ih.T + hs @ w_hh.T + b_ih + b_hh
            i_g = jax.nn.sigmoid(gates[:, 0 * H:1 * H])
            f_g = jax.nn.sigmoid(gates[:, 1 * H:2 * H])
            g_g = jnp.tanh(gates[:, 2 * H:3 * H])
            o_g = jax.nn.sigmoid(gates[:, 3 * H:4 * H])
            cs = f_g * cs + i_g * g_g
            hs = o_g * jnp.tanh(cs)
            outs.append(hs)
        layer_in = jnp.stack(outs, axis=1)

    cat = jnp.concatenate([x1[:, -1, :], layer_in[:, -1, :]], axis=-1)
    eps = 1e-5
    h1 = cat @ raw["w1"] + raw["b1"]
    h1 = h1 / jnp.sqrt(1.0 + eps) * raw["gamma"] + raw["beta"]   # BN eval, mean=0 var=1
    h1 = jnp.maximum(h1, 0.0)
    h2 = jnp.maximum(h1 @ raw["w2"] + raw["b2"], 0.0)
    return h2 @ raw["w3"] + raw["b3"]


if __name__ == "__main__":
    batch, seq, c, h, w = 2, 8, 4, 16, 16
    input_size, hidden_size, num_layers, num_classes = 64, 32, 2, 10

    key = jax.random.PRNGKey(0)
    kx, kp = jax.random.split(key)
    x = jax.random.normal(kx, (batch, seq, c, h, w), jnp.float32)

    raw = init_raw_params(kp, c, h, w, input_size, hidden_size, num_layers, num_classes)
    params = pack_params(raw)

    out = lstm_group_forward(x, params, num_classes=num_classes)
    out = jax.block_until_ready(out)
    assert out.shape == (batch, num_classes), out.shape
    assert bool(jnp.all(jnp.isfinite(out)))

    with jax.default_matmul_precision("highest"):
        ref = reference_forward(x, raw)
    # bf16 matmul operands in the kernel vs f32 reference -> relaxed tolerance.
    assert bool(jnp.allclose(out, ref, rtol=5e-2, atol=5e-2)), (
        float(jnp.max(jnp.abs(out - ref))))

    print("KERNEL_OK")
</pallas_src>

<mosaic_0001>
module attributes {stable_mosaic.version = 11 : i64} {
  func.func @_fused_kernel(%arg0: i32, %arg1: memref<64x1024xbf16, #tpu.memory_space<vmem>>, %arg2: memref<1024x128xbf16, #tpu.memory_space<vmem>>, %arg3: memref<1x128xf32, #tpu.memory_space<vmem>>, %arg4: memref<128x512xbf16, #tpu.memory_space<vmem>>, %arg5: memref<128x512xbf16, #tpu.memory_space<vmem>>, %arg6: memref<1x512xf32, #tpu.memory_space<vmem>>, %arg7: memref<128x512xbf16, #tpu.memory_space<vmem>>, %arg8: memref<128x512xbf16, #tpu.memory_space<vmem>>, %arg9: memref<1x512xf32, #tpu.memory_space<vmem>>, %arg10: memref<256x512xbf16, #tpu.memory_space<vmem>>, %arg11: memref<1x512xf32, #tpu.memory_space<vmem>>, %arg12: memref<512x128xbf16, #tpu.memory_space<vmem>>, %arg13: memref<1x128xf32, #tpu.memory_space<vmem>>, %arg14: memref<128x128xbf16, #tpu.memory_space<vmem>>, %arg15: memref<1x128xf32, #tpu.memory_space<vmem>>, %arg16: memref<8x128xf32, #tpu.memory_space<vmem>>, %arg17: memref<64x128xf32, #tpu.memory_space<vmem>>, %arg18: memref<64x128xf32, #tpu.memory_space<vmem>>, %arg19: memref<64x512xf32, #tpu.memory_space<vmem>>) attributes {dimension_semantics = [#tpu.dimension_semantics<arbitrary>], iteration_bounds = array<i64: 1>, scalar_prefetch = 0 : i64, scratch_operands = 3 : i64, tpu.core_type = #tpu.core_type<tc>, window_params = [{transform_indices = @transform_0, window_bounds = array<i64: 64, 1024>}, {pipeline_mode = #tpu.pipeline_mode<synchronous>, transform_indices = @transform_1, window_bounds = array<i64: 1024, 128>}, {pipeline_mode = #tpu.pipeline_mode<synchronous>, transform_indices = @transform_2, window_bounds = array<i64: 1, 128>}, {pipeline_mode = #tpu.pipeline_mode<synchronous>, transform_indices = @transform_3, window_bounds = array<i64: 128, 512>}, {pipeline_mode = #tpu.pipeline_mode<synchronous>, transform_indices = @transform_4, window_bounds = array<i64: 128, 512>}, {pipeline_mode = #tpu.pipeline_mode<synchronous>, transform_indices = @transform_5, window_bounds = array<i64: 1, 512>}, {pipeline_mode = #tpu.pipeline_mode<synchronous>, transform_indices = @transform_6, window_bounds = array<i64: 128, 512>}, {pipeline_mode = #tpu.pipeline_mode<synchronous>, transform_indices = @transform_7, window_bounds = array<i64: 128, 512>}, {pipeline_mode = #tpu.pipeline_mode<synchronous>, transform_indices = @transform_8, window_bounds = array<i64: 1, 512>}, {pipeline_mode = #tpu.pipeline_mode<synchronous>, transform_indices = @transform_9, window_bounds = array<i64: 256, 512>}, {pipeline_mode = #tpu.pipeline_mode<synchronous>, transform_indices = @transform_10, window_bounds = array<i64: 1, 512>}, {pipeline_mode = #tpu.pipeline_mode<synchronous>, transform_indices = @transform_11, window_bounds = array<i64: 512, 128>}, {pipeline_mode = #tpu.pipeline_mode<synchronous>, transform_indices = @transform_12, window_bounds = array<i64: 1, 128>}, {pipeline_mode = #tpu.pipeline_mode<synchronous>, transform_indices = @transform_13, window_bounds = array<i64: 128, 128>}, {pipeline_mode = #tpu.pipeline_mode<synchronous>, transform_indices = @transform_14, window_bounds = array<i64: 1, 128>}, {pipeline_mode = #tpu.pipeline_mode<synchronous>, transform_indices = @transform_15, window_bounds = array<i64: 8, 128>}]} {
    %c64_i32 = arith.constant 64 : i32
    %0 = arith.muli %arg0, %c64_i32 : i32
    %1 = tpu.assume_multiple %0, 64 : i32
    %c0 = arith.constant 0 : index
    %c0_0 = arith.constant 0 : index
    %2 = vector.load %arg1[%c0, %c0_0] : memref<64x1024xbf16, #tpu.memory_space<vmem>>, vector<64x1024xbf16>
    %c0_1 = arith.constant 0 : index
    %c0_2 = arith.constant 0 : index
    %3 = vector.load %arg2[%c0_1, %c0_2] : memref<1024x128xbf16, #tpu.memory_space<vmem>>, vector<1024x128xbf16>
    %cst = arith.constant dense<0.000000e+00> : vector<64x128xf32>
    %4 = tpu.matmul %2, %3, %cst {dimension_numbers = #tpu.dot_dimension_numbers<[1], [0], [0], [1], [0, 0, 1, 1], [], []>} : vector<64x1024xbf16>, vector<1024x128xbf16>, vector<64x128xf32> -> vector<64x128xf32>
    %c0_3 = arith.constant 0 : index
    %c0_4 = arith.constant 0 : index
    %5 = vector.load %arg3[%c0_3, %c0_4] : memref<1x128xf32, #tpu.memory_space<vmem>>, vector<1x128xf32>
    %6 = vector.broadcast %5 : vector<1x128xf32> to vector<64x128xf32>
    %7 = arith.addf %4, %6 : vector<64x128xf32>
    %8 = arith.index_cast %1 : i32 to index
    %c0_5 = arith.constant 0 : index
    %9 = vector.load %arg17[%8, %c0_5] : memref<64x128xf32, #tpu.memory_space<vmem>>, vector<64x128xf32>
    tpu.vector_store %arg17[%8, %c0_5], %7 {strides = array<i32>} : memref<64x128xf32, #tpu.memory_space<vmem>>, vector<64x128xf32>,
    %c0_i32 = arith.constant 0 : i32
    %10 = arith.cmpi eq, %arg0, %c0_i32 : i32
    %11 = arith.extui %10 : i1 to i32
    %c0_i32_6 = arith.constant 0 : i32
    %12 = arith.cmpi ne, %11, %c0_i32_6 : i32
    scf.if %12 {
      %c0_7 = arith.constant 0 : index
      %c0_8 = arith.constant 0 : index
      %13 = vector.load %arg17[%c0_7, %c0_8] : memref<64x128xf32, #tpu.memory_space<vmem>>, vector<64x128xf32>
      %14 = arith.truncf %13 : vector<64x128xf32> to vector<64x128xbf16>
      %c0_9 = arith.constant 0 : index
      %c0_10 = arith.constant 0 : index
      %15 = vector.load %arg4[%c0_9, %c0_10] : memref<128x512xbf16, #tpu.memory_space<vmem>>, vector<128x512xbf16>
      %cst_11 = arith.constant dense<0.000000e+00> : vector<64x512xf32>
      %16 = tpu.matmul %14, %15, %cst_11 {dimension_numbers = #tpu.dot_dimension_numbers<[1], [0], [0], [1], [0, 0, 1, 1], [], []>} : vector<64x128xbf16>, vector<128x512xbf16>, vector<64x512xf32> -> vector<64x512xf32>
      %c0_12 = arith.constant 0 : index
      %c0_13 = arith.constant 0 : index
      %17 = vector.load %arg6[%c0_12, %c0_13] : memref<1x512xf32, #tpu.memory_space<vmem>>, vector<1x512xf32>
      %18 = vector.broadcast %17 : vector<1x512xf32> to vector<64x512xf32>
      %19 = arith.addf %16, %18 : vector<64x512xf32>
      %c0_14 = arith.constant 0 : index
      %c0_15 = arith.constant 0 : index
      %20 = vector.load %arg19[%c0_14, %c0_15] : memref<64x512xf32, #tpu.memory_space<vmem>>, vector<64x512xf32>
      tpu.vector_store %arg19[%c0_14, %c0_15], %19 {strides = array<i32>} : memref<64x512xf32, #tpu.memory_space<vmem>>, vector<64x512xf32>,
      %cst_16 = arith.constant 0.000000e+00 : f32
      %21 = vector.broadcast %cst_16 : f32 to vector<8x128xf32>
      %cst_17 = arith.constant 0.000000e+00 : f32
      %22 = vector.broadcast %cst_17 : f32 to vector<8x128xf32>
      %c0_i32_18 = arith.constant 0 : i32
      %c8_i32 = arith.constant 8 : i32
      %23 = arith.muli %c0_i32_18, %c8_i32 : i32
      %24 = tpu.assume_multiple %23, 8 : i32
      %25 = arith.index_cast %24 : i32 to index
      %c0_19 = arith.constant 0 : index
      %26 = vector.load %arg19[%25, %c0_19] : memref<64x512xf32, #tpu.memory_space<vmem>>, vector<8x512xf32>
      %27 = arith.truncf %21 : vector<8x128xf32> to vector<8x128xbf16>
      %c0_20 = arith.constant 0 : index
      %c0_21 = arith.constant 0 : index
      %28 = vector.load %arg5[%c0_20, %c0_21] : memref<128x512xbf16, #tpu.memory_space<vmem>>, vector<128x512xbf16>
      %cst_22 = arith.constant dense<0.000000e+00> : vector<8x512xf32>
      %29 = tpu.matmul %27, %28, %cst_22 {dimension_numbers = #tpu.dot_dimension_numbers<[1], [0], [0], [1], [0, 0, 1, 1], [], []>} : vector<8x128xbf16>, vector<128x512xbf16>, vector<8x512xf32> -> vector<8x512xf32>
      %30 = arith.addf %26, %29 : vector<8x512xf32>
      %31 = vector.extract_strided_slice %30 {offsets = [0, 0], sizes = [8, 128], strides = [1, 1]} : vector<8x512xf32> to vector<8x128xf32>
      %cst_23 = arith.constant 5.000000e-01 : f32
      %32 = vector.broadcast %cst_23 : f32 to vector<8x128xf32>
      %33 = arith.mulf %32, %31 : vector<8x128xf32>
      %34 = math.tanh %33 : vector<8x128xf32>
      %cst_24 = arith.constant 5.000000e-01 : f32
      %35 = vector.broadcast %cst_24 : f32 to vector<8x128xf32>
      %36 = arith.mulf %35, %34 : vector<8x128xf32>
      %cst_25 = arith.constant 5.000000e-01 : f32
      %37 = vector.broadcast %cst_25 : f32 to vector<8x128xf32>
      %38 = arith.addf %36, %37 : vector<8x128xf32>
      %39 = vector.extract_strided_slice %30 {offsets = [0, 128], sizes = [8, 128], strides = [1, 1]} : vector<8x512xf32> to vector<8x128xf32>
      %cst_26 = arith.constant 5.000000e-01 : f32
      %40 = vector.broadcast %cst_26 : f32 to vector<8x128xf32>
      %41 = arith.mulf %40, %39 : vector<8x128xf32>
      %42 = math.tanh %41 : vector<8x128xf32>
      %cst_27 = arith.constant 5.000000e-01 : f32
      %43 = vector.broadcast %cst_27 : f32 to vector<8x128xf32>
      %44 = arith.mulf %43, %42 : vector<8x128xf32>
      %cst_28 = arith.constant 5.000000e-01 : f32
      %45 = vector.broadcast %cst_28 : f32 to vector<8x128xf32>
      %46 = arith.addf %44, %45 : vector<8x128xf32>
      %47 = vector.extract_strided_slice %30 {offsets = [0, 256], sizes = [8, 128], strides = [1, 1]} : vector<8x512xf32> to vector<8x128xf32>
      %48 = math.tanh %47 : vector<8x128xf32>
      %49 = vector.extract_strided_slice %30 {offsets = [0, 384], sizes = [8, 128], strides = [1, 1]} : vector<8x512xf32> to vector<8x128xf32>
      %cst_29 = arith.constant 5.000000e-01 : f32
      %50 = vector.broadcast %cst_29 : f32 to vector<8x128xf32>
      %51 = arith.mulf %50, %49 : vector<8x128xf32>
      %52 = math.tanh %51 : vector<8x128xf32>
      %cst_30 = arith.constant 5.000000e-01 : f32
      %53 = vector.broadcast %cst_30 : f32 to vector<8x128xf32>
      %54 = arith.mulf %53, %52 : vector<8x128xf32>
      %cst_31 = arith.constant 5.000000e-01 : f32
      %55 = vector.broadcast %cst_31 : f32 to vector<8x128xf32>
      %56 = arith.addf %54, %55 : vector<8x128xf32>
      %57 = arith.mulf %46, %22 : vector<8x128xf32>
      %58 = arith.mulf %38, %48 : vector<8x128xf32>
      %59 = arith.addf %57, %58 : vector<8x128xf32>
      %60 = math.tanh %59 : vector<8x128xf32>
      %61 = arith.mulf %56, %60 : vector<8x128xf32>
      %62 = arith.index_cast %24 : i32 to index
      %c0_32 = arith.constant 0 : index
      %63 = vector.load %arg18[%62, %c0_32] : memref<64x128xf32, #tpu.memory_space<vmem>>, vector<8x128xf32>
      tpu.vector_store %arg18[%62, %c0_32], %61 {strides = array<i32>} : memref<64x128xf32, #tpu.memory_space<vmem>>, vector<8x128xf32>,
      %c1_i32 = arith.constant 1 : i32
      %c8_i32_33 = arith.constant 8 : i32
      %64 = arith.muli %c1_i32, %c8_i32_33 : i32
      %65 = tpu.assume_multiple %64, 8 : i32
      %66 = arith.index_cast %65 : i32 to index
      %c0_34 = arith.constant 0 : index
      %67 = vector.load %arg19[%66, %c0_34] : memref<64x512xf32, #tpu.memory_space<vmem>>, vector<8x512xf32>
      %68 = arith.truncf %61 : vector<8x128xf32> to vector<8x128xbf16>
      %c0_35 = arith.constant 0 : index
      %c0_36 = arith.constant 0 : index
      %69 = vector.load %arg5[%c0_35, %c0_36] : memref<128x512xbf16, #tpu.memory_space<vmem>>, vector<128x512xbf16>
      %cst_37 = arith.constant dense<0.000000e+00> : vector<8x512xf32>
      %70 = tpu.matmul %68, %69, %cst_37 {dimension_numbers = #tpu.dot_dimension_numbers<[1], [0], [0], [1], [0, 0, 1, 1], [], []>} : vector<8x128xbf16>, vector<128x512xbf16>, vector<8x512xf32> -> vector<8x512xf32>
      %71 = arith.addf %67, %70 : vector<8x512xf32>
      %72 = vector.extract_strided_slice %71 {offsets = [0, 0], sizes = [8, 128], strides = [1, 1]} : vector<8x512xf32> to vector<8x128xf32>
      %cst_38 = arith.constant 5.000000e-01 : f32
      %73 = vector.broadcast %cst_38 : f32 to vector<8x128xf32>
      %74 = arith.mulf %73, %72 : vector<8x128xf32>
      %75 = math.tanh %74 : vector<8x128xf32>
      %cst_39 = arith.constant 5.000000e-01 : f32
      %76 = vector.broadcast %cst_39 : f32 to vector<8x128xf32>
      %77 = arith.mulf %76, %75 : vector<8x128xf32>
      %cst_40 = arith.constant 5.000000e-01 : f32
      %78 = vector.broadcast %cst_40 : f32 to vector<8x128xf32>
      %79 = arith.addf %77, %78 : vector<8x128xf32>
      %80 = vector.extract_strided_slice %71 {offsets = [0, 128], sizes = [8, 128], strides = [1, 1]} : vector<8x512xf32> to vector<8x128xf32>
      %cst_41 = arith.constant 5.000000e-01 : f32
      %81 = vector.broadcast %cst_41 : f32 to vector<8x128xf32>
      %82 = arith.mulf %81, %80 : vector<8x128xf32>
      %83 = math.tanh %82 : vector<8x128xf32>
      %cst_42 = arith.constant 5.000000e-01 : f32
      %84 = vector.broadcast %cst_42 : f32 to vector<8x128xf32>
      %85 = arith.mulf %84, %83 : vector<8x128xf32>
      %cst_43 = arith.constant 5.000000e-01 : f32
      %86 = vector.broadcast %cst_43 : f32 to vector<8x128xf32>
      %87 = arith.addf %85, %86 : vector<8x128xf32>
      %88 = vector.extract_strided_slice %71 {offsets = [0, 256], sizes = [8, 128], strides = [1, 1]} : vector<8x512xf32> to vector<8x128xf32>
      %89 = math.tanh %88 : vector<8x128xf32>
      %90 = vector.extract_strided_slice %71 {offsets = [0, 384], sizes = [8, 128], strides = [1, 1]} : vector<8x512xf32> to vector<8x128xf32>
      %cst_44 = arith.constant 5.000000e-01 : f32
      %91 = vector.broadcast %cst_44 : f32 to vector<8x128xf32>
      %92 = arith.mulf %91, %90 : vector<8x128xf32>
      %93 = math.tanh %92 : vector<8x128xf32>
      %cst_45 = arith.constant 5.000000e-01 : f32
      %94 = vector.broadcast %cst_45 : f32 to vector<8x128xf32>
      %95 = arith.mulf %94, %93 : vector<8x128xf32>
      %cst_46 = arith.constant 5.000000e-01 : f32
      %96 = vector.broadcast %cst_46 : f32 to vector<8x128xf32>
      %97 = arith.addf %95, %96 : vector<8x128xf32>
      %98 = arith.mulf %87, %59 : vector<8x128xf32>
      %99 = arith.mulf %79, %89 : vector<8x128xf32>
      %100 = arith.addf %98, %99 : vector<8x128xf32>
      %101 = math.tanh %100 : vector<8x128xf32>
      %102 = arith.mulf %97, %101 : vector<8x128xf32>
      %103 = arith.index_cast %65 : i32 to index
      %c0_47 = arith.constant 0 : index
      %104 = vector.load %arg18[%103, %c0_47] : memref<64x128xf32, #tpu.memory_space<vmem>>, vector<8x128xf32>
      tpu.vector_store %arg18[%103, %c0_47], %102 {strides = array<i32>} : memref<64x128xf32, #tpu.memory_space<vmem>>, vector<8x128xf32>,
      %c2_i32 = arith.constant 2 : i32
      %c8_i32_48 = arith.constant 8 : i32
      %105 = arith.muli %c2_i32, %c8_i32_48 : i32
      %106 = tpu.assume_multiple %105, 8 : i32
      %107 = arith.index_cast %106 : i32 to index
      %c0_49 = arith.constant 0 : index
      %108 = vector.load %arg19[%107, %c0_49] : memref<64x512xf32, #tpu.memory_space<vmem>>, vector<8x512xf32>
      %109 = arith.truncf %102 : vector<8x128xf32> to vector<8x128xbf16>
      %c0_50 = arith.constant 0 : index
      %c0_51 = arith.constant 0 : index
      %110 = vector.load %arg5[%c0_50, %c0_51] : memref<128x512xbf16, #tpu.memory_space<vmem>>, vector<128x512xbf16>
      %cst_52 = arith.constant dense<0.000000e+00> : vector<8x512xf32>
      %111 = tpu.matmul %109, %110, %cst_52 {dimension_numbers = #tpu.dot_dimension_numbers<[1], [0], [0], [1], [0, 0, 1, 1], [], []>} : vector<8x128xbf16>, vector<128x512xbf16>, vector<8x512xf32> -> vector<8x512xf32>
      %112 = arith.addf %108, %111 : vector<8x512xf32>
      %113 = vector.extract_strided_slice %112 {offsets = [0, 0], sizes = [8, 128], strides = [1, 1]} : vector<8x512xf32> to vector<8x128xf32>
      %cst_53 = arith.constant 5.000000e-01 : f32
      %114 = vector.broadcast %cst_53 : f32 to vector<8x128xf32>
      %115 = arith.mulf %114, %113 : vector<8x128xf32>
      %116 = math.tanh %115 : vector<8x128xf32>
      %cst_54 = arith.constant 5.000000e-01 : f32
      %117 = vector.broadcast %cst_54 : f32 to vector<8x128xf32>
      %118 = arith.mulf %117, %116 : vector<8x128xf32>
      %cst_55 = arith.constant 5.000000e-01 : f32
      %119 = vector.broadcast %cst_55 : f32 to vector<8x128xf32>
      %120 = arith.addf %118, %119 : vector<8x128xf32>
      %121 = vector.extract_strided_slice %112 {offsets = [0, 128], sizes = [8, 128], strides = [1, 1]} : vector<8x512xf32> to vector<8x128xf32>
      %cst_56 = arith.constant 5.000000e-01 : f32
      %122 = vector.broadcast %cst_56 : f32 to vector<8x128xf32>
      %123 = arith.mulf %122, %121 : vector<8x128xf32>
      %124 = math.tanh %123 : vector<8x128xf32>
      %cst_57 = arith.constant 5.000000e-01 : f32
      %125 = vector.broadcast %cst_57 : f32 to vector<8x128xf32>
      %126 = arith.mulf %125, %124 : vector<8x128xf32>
      %cst_58 = arith.constant 5.000000e-01 : f32
      %127 = vector.broadcast %cst_58 : f32 to vector<8x128xf32>
      %128 = arith.addf %126, %127 : vector<8x128xf32>
      %129 = vector.extract_strided_slice %112 {offsets = [0, 256], sizes = [8, 128], strides = [1, 1]} : vector<8x512xf32> to vector<8x128xf32>
      %130 = math.tanh %129 : vector<8x128xf32>
      %131 = vector.extract_strided_slice %112 {offsets = [0, 384], sizes = [8, 128], strides = [1, 1]} : vector<8x512xf32> to vector<8x128xf32>
      %cst_59 = arith.constant 5.000000e-01 : f32
      %132 = vector.broadcast %cst_59 : f32 to vector<8x128xf32>
      %133 = arith.mulf %132, %131 : vector<8x128xf32>
      %134 = math.tanh %133 : vector<8x128xf32>
      %cst_60 = arith.constant 5.000000e-01 : f32
      %135 = vector.broadcast %cst_60 : f32 to vector<8x128xf32>
      %136 = arith.mulf %135, %134 : vector<8x128xf32>
      %cst_61 = arith.constant 5.000000e-01 : f32
      %137 = vector.broadcast %cst_61 : f32 to vector<8x128xf32>
      %138 = arith.addf %136, %137 : vector<8x128xf32>
      %139 = arith.mulf %128, %100 : vector<8x128xf32>
      %140 = arith.mulf %120, %130 : vector<8x128xf32>
      %141 = arith.addf %139, %140 : vector<8x128xf32>
      %142 = math.tanh %141 : vector<8x128xf32>
      %143 = arith.mulf %138, %142 : vector<8x128xf32>
      %144 = arith.index_cast %106 : i32 to index
      %c0_62 = arith.constant 0 : index
      %145 = vector.load %arg18[%144, %c0_62] : memref<64x128xf32, #tpu.memory_space<vmem>>, vector<8x128xf32>
      tpu.vector_store %arg18[%144, %c0_62], %143 {strides = array<i32>} : memref<64x128xf32, #tpu.memory_space<vmem>>, vector<8x128xf32>,
      %c3_i32 = arith.constant 3 : i32
      %c8_i32_63 = arith.constant 8 : i32
      %146 = arith.muli %c3_i32, %c8_i32_63 : i32
      %147 = tpu.assume_multiple %146, 8 : i32
      %148 = arith.index_cast %147 : i32 to index
      %c0_64 = arith.constant 0 : index
      %149 = vector.load %arg19[%148, %c0_64] : memref<64x512xf32, #tpu.memory_space<vmem>>, vector<8x512xf32>
      %150 = arith.truncf %143 : vector<8x128xf32> to vector<8x128xbf16>
      %c0_65 = arith.constant 0 : index
      %c0_66 = arith.constant 0 : index
      %151 = vector.load %arg5[%c0_65, %c0_66] : memref<128x512xbf16, #tpu.memory_space<vmem>>, vector<128x512xbf16>
      %cst_67 = arith.constant dense<0.000000e+00> : vector<8x512xf32>
      %152 = tpu.matmul %150, %151, %cst_67 {dimension_numbers = #tpu.dot_dimension_numbers<[1], [0], [0], [1], [0, 0, 1, 1], [], []>} : vector<8x128xbf16>, vector<128x512xbf16>, vector<8x512xf32> -> vector<8x512xf32>
      %153 = arith.addf %149, %152 : vector<8x512xf32>
      %154 = vector.extract_strided_slice %153 {offsets = [0, 0], sizes = [8, 128], strides = [1, 1]} : vector<8x512xf32> to vector<8x128xf32>
      %cst_68 = arith.constant 5.000000e-01 : f32
      %155 = vector.broadcast %cst_68 : f32 to vector<8x128xf32>
      %156 = arith.mulf %155, %154 : vector<8x128xf32>
      %157 = math.tanh %156 : vector<8x128xf32>
      %cst_69 = arith.constant 5.000000e-01 : f32
      %158 = vector.broadcast %cst_69 : f32 to vector<8x128xf32>
      %159 = arith.mulf %158, %157 : vector<8x128xf32>
      %cst_70 = arith.constant 5.000000e-01 : f32
      %160 = vector.broadcast %cst_70 : f32 to vector<8x128xf32>
      %161 = arith.addf %159, %160 : vector<8x128xf32>
      %162 = vector.extract_strided_slice %153 {offsets = [0, 128], sizes = [8, 128], strides = [1, 1]} : vector<8x512xf32> to vector<8x128xf32>
      %cst_71 = arith.constant 5.000000e-01 : f32
      %163 = vector.broadcast %cst_71 : f32 to vector<8x128xf32>
      %164 = arith.mulf %163, %162 : vector<8x128xf32>
      %165 = math.tanh %164 : vector<8x128xf32>
      %cst_72 = arith.constant 5.000000e-01 : f32
      %166 = vector.broadcast %cst_72 : f32 to vector<8x128xf32>
      %167 = arith.mulf %166, %165 : vector<8x128xf32>
      %cst_73 = arith.constant 5.000000e-01 : f32
      %168 = vector.broadcast %cst_73 : f32 to vector<8x128xf32>
      %169 = arith.addf %167, %168 : vector<8x128xf32>
      %170 = vector.extract_strided_slice %153 {offsets = [0, 256], sizes = [8, 128], strides = [1, 1]} : vector<8x512xf32> to vector<8x128xf32>
      %171 = math.tanh %170 : vector<8x128xf32>
      %172 = vector.extract_strided_slice %153 {offsets = [0, 384], sizes = [8, 128], strides = [1, 1]} : vector<8x512xf32> to vector<8x128xf32>
      %cst_74 = arith.constant 5.000000e-01 : f32
      %173 = vector.broadcast %cst_74 : f32 to vector<8x128xf32>
      %174 = arith.mulf %173, %172 : vector<8x128xf32>
      %175 = math.tanh %174 : vector<8x128xf32>
      %cst_75 = arith.constant 5.000000e-01 : f32
      %176 = vector.broadcast %cst_75 : f32 to vector<8x128xf32>
      %177 = arith.mulf %176, %175 : vector<8x128xf32>
      %cst_76 = arith.constant 5.000000e-01 : f32
      %178 = vector.broadcast %cst_76 : f32 to vector<8x128xf32>
      %179 = arith.addf %177, %178 : vector<8x128xf32>
      %180 = arith.mulf %169, %141 : vector<8x128xf32>
      %181 = arith.mulf %161, %171 : vector<8x128xf32>
      %182 = arith.addf %180, %181 : vector<8x128xf32>
      %183 = math.tanh %182 : vector<8x128xf32>
      %184 = arith.mulf %179, %183 : vector<8x128xf32>
      %185 = arith.index_cast %147 : i32 to index
      %c0_77 = arith.constant 0 : index
      %186 = vector.load %arg18[%185, %c0_77] : memref<64x128xf32, #tpu.memory_space<vmem>>, vector<8x128xf32>
      tpu.vector_store %arg18[%185, %c0_77], %184 {strides = array<i32>} : memref<64x128xf32, #tpu.memory_space<vmem>>, vector<8x128xf32>,
      %c4_i32 = arith.constant 4 : i32
      %c8_i32_78 = arith.constant 8 : i32
      %187 = arith.muli %c4_i32, %c8_i32_78 : i32
      %188 = tpu.assume_multiple %187, 8 : i32
      %189 = arith.index_cast %188 : i32 to index
      %c0_79 = arith.constant 0 : index
      %190 = vector.load %arg19[%189, %c0_79] : memref<64x512xf32, #tpu.memory_space<vmem>>, vector<8x512xf32>
      %191 = arith.truncf %184 : vector<8x128xf32> to vector<8x128xbf16>
      %c0_80 = arith.constant 0 : index
      %c0_81 = arith.constant 0 : index
      %192 = vector.load %arg5[%c0_80, %c0_81] : memref<128x512xbf16, #tpu.memory_space<vmem>>, vector<128x512xbf16>
      %cst_82 = arith.constant dense<0.000000e+00> : vector<8x512xf32>
      %193 = tpu.matmul %191, %192, %cst_82 {dimension_numbers = #tpu.dot_dimension_numbers<[1], [0], [0], [1], [0, 0, 1, 1], [], []>} : vector<8x128xbf16>, vector<128x512xbf16>, vector<8x512xf32> -> vector<8x512xf32>
      %194 = arith.addf %190, %193 : vector<8x512xf32>
      %195 = vector.extract_strided_slice %194 {offsets = [0, 0], sizes = [8, 128], strides = [1, 1]} : vector<8x512xf32> to vector<8x128xf32>
      %cst_83 = arith.constant 5.000000e-01 : f32
      %196 = vector.broadcast %cst_83 : f32 to vector<8x128xf32>
      %197 = arith.mulf %196, %195 : vector<8x128xf32>
      %198 = math.tanh %197 : vector<8x128xf32>
      %cst_84 = arith.constant 5.000000e-01 : f32
      %199 = vector.broadcast %cst_84 : f32 to vector<8x128xf32>
      %200 = arith.mulf %199, %198 : vector<8x128xf32>
      %cst_85 = arith.constant 5.000000e-01 : f32
      %201 = vector.broadcast %cst_85 : f32 to vector<8x128xf32>
      %202 = arith.addf %200, %201 : vector<8x128xf32>
      %203 = vector.extract_strided_slice %194 {offsets = [0, 128], sizes = [8, 128], strides = [1, 1]} : vector<8x512xf32> to vector<8x128xf32>
      %cst_86 = arith.constant 5.000000e-01 : f32
      %204 = vector.broadcast %cst_86 : f32 to vector<8x128xf32>
      %205 = arith.mulf %204, %203 : vector<8x128xf32>
      %206 = math.tanh %205 : vector<8x128xf32>
      %cst_87 = arith.constant 5.000000e-01 : f32
      %207 = vector.broadcast %cst_87 : f32 to vector<8x128xf32>
      %208 = arith.mulf %207, %206 : vector<8x128xf32>
      %cst_88 = arith.constant 5.000000e-01 : f32
      %209 = vector.broadcast %cst_88 : f32 to vector<8x128xf32>
      %210 = arith.addf %208, %209 : vector<8x128xf32>
      %211 = vector.extract_strided_slice %194 {offsets = [0, 256], sizes = [8, 128], strides = [1, 1]} : vector<8x512xf32> to vector<8x128xf32>
      %212 = math.tanh %211 : vector<8x128xf32>
      %213 = vector.extract_strided_slice %194 {offsets = [0, 384], sizes = [8, 128], strides = [1, 1]} : vector<8x512xf32> to vector<8x128xf32>
      %cst_89 = arith.constant 5.000000e-01 : f32
      %214 = vector.broadcast %cst_89 : f32 to vector<8x128xf32>
      %215 = arith.mulf %214, %213 : vector<8x128xf32>
      %216 = math.tanh %215 : vector<8x128xf32>
      %cst_90 = arith.constant 5.000000e-01 : f32
      %217 = vector.broadcast %cst_90 : f32 to vector<8x128xf32>
      %218 = arith.mulf %217, %216 : vector<8x128xf32>
      %cst_91 = arith.constant 5.000000e-01 : f32
      %219 = vector.broadcast %cst_91 : f32 to vector<8x128xf32>
      %220 = arith.addf %218, %219 : vector<8x128xf32>
      %221 = arith.mulf %210, %182 : vector<8x128xf32>
      %222 = arith.mulf %202, %212 : vector<8x128xf32>
      %223 = arith.addf %221, %222 : vector<8x128xf32>
      %224 = math.tanh %223 : vector<8x128xf32>
      %225 = arith.mulf %220, %224 : vector<8x128xf32>
      %226 = arith.index_cast %188 : i32 to index
      %c0_92 = arith.constant 0 : index
      %227 = vector.load %arg18[%226, %c0_92] : memref<64x128xf32, #tpu.memory_space<vmem>>, vector<8x128xf32>
      tpu.vector_store %arg18[%226, %c0_92], %225 {strides = array<i32>} : memref<64x128xf32, #tpu.memory_space<vmem>>, vector<8x128xf32>,
      %c5_i32 = arith.constant 5 : i32
      %c8_i32_93 = arith.constant 8 : i32
      %228 = arith.muli %c5_i32, %c8_i32_93 : i32
      %229 = tpu.assume_multiple %228, 8 : i32
      %230 = arith.index_cast %229 : i32 to index
      %c0_94 = arith.constant 0 : index
      %231 = vector.load %arg19[%230, %c0_94] : memref<64x512xf32, #tpu.memory_space<vmem>>, vector<8x512xf32>
      %232 = arith.truncf %225 : vector<8x128xf32> to vector<8x128xbf16>
      %c0_95 = arith.constant 0 : index
      %c0_96 = arith.constant 0 : index
      %233 = vector.load %arg5[%c0_95, %c0_96] : memref<128x512xbf16, #tpu.memory_space<vmem>>, vector<128x512xbf16>
      %cst_97 = arith.constant dense<0.000000e+00> : vector<8x512xf32>
      %234 = tpu.matmul %232, %233, %cst_97 {dimension_numbers = #tpu.dot_dimension_numbers<[1], [0], [0], [1], [0, 0, 1, 1], [], []>} : vector<8x128xbf16>, vector<128x512xbf16>, vector<8x512xf32> -> vector<8x512xf32>
      %235 = arith.addf %231, %234 : vector<8x512xf32>
      %236 = vector.extract_strided_slice %235 {offsets = [0, 0], sizes = [8, 128], strides = [1, 1]} : vector<8x512xf32> to vector<8x128xf32>
      %cst_98 = arith.constant 5.000000e-01 : f32
      %237 = vector.broadcast %cst_98 : f32 to vector<8x128xf32>
      %238 = arith.mulf %237, %236 : vector<8x128xf32>
      %239 = math.tanh %238 : vector<8x128xf32>
      %cst_99 = arith.constant 5.000000e-01 : f32
      %240 = vector.broadcast %cst_99 : f32 to vector<8x128xf32>
      %241 = arith.mulf %240, %239 : vector<8x128xf32>
      %cst_100 = arith.constant 5.000000e-01 : f32
      %242 = vector.broadcast %cst_100 : f32 to vector<8x128xf32>
      %243 = arith.addf %241, %242 : vector<8x128xf32>
      %244 = vector.extract_strided_slice %235 {offsets = [0, 128], sizes = [8, 128], strides = [1, 1]} : vector<8x512xf32> to vector<8x128xf32>
      %cst_101 = arith.constant 5.000000e-01 : f32
      %245 = vector.broadcast %cst_101 : f32 to vector<8x128xf32>
      %246 = arith.mulf %245, %244 : vector<8x128xf32>
      %247 = math.tanh %246 : vector<8x128xf32>
      %cst_102 = arith.constant 5.000000e-01 : f32
      %248 = vector.broadcast %cst_102 : f32 to vector<8x128xf32>
      %249 = arith.mulf %248, %247 : vector<8x128xf32>
      %cst_103 = arith.constant 5.000000e-01 : f32
      %250 = vector.broadcast %cst_103 : f32 to vector<8x128xf32>
      %251 = arith.addf %249, %250 : vector<8x128xf32>
      %252 = vector.extract_strided_slice %235 {offsets = [0, 256], sizes = [8, 128], strides = [1, 1]} : vector<8x512xf32> to vector<8x128xf32>
      %253 = math.tanh %252 : vector<8x128xf32>
      %254 = vector.extract_strided_slice %235 {offsets = [0, 384], sizes = [8, 128], strides = [1, 1]} : vector<8x512xf32> to vector<8x128xf32>
      %cst_104 = arith.constant 5.000000e-01 : f32
      %255 = vector.broadcast %cst_104 : f32 to vector<8x128xf32>
      %256 = arith.mulf %255, %254 : vector<8x128xf32>
      %257 = math.tanh %256 : vector<8x128xf32>
      %cst_105 = arith.constant 5.000000e-01 : f32
      %258 = vector.broadcast %cst_105 : f32 to vector<8x128xf32>
      %259 = arith.mulf %258, %257 : vector<8x128xf32>
      %cst_106 = arith.constant 5.000000e-01 : f32
      %260 = vector.broadcast %cst_106 : f32 to vector<8x128xf32>
      %261 = arith.addf %259, %260 : vector<8x128xf32>
      %262 = arith.mulf %251, %223 : vector<8x128xf32>
      %263 = arith.mulf %243, %253 : vector<8x128xf32>
      %264 = arith.addf %262, %263 : vector<8x128xf32>
      %265 = math.tanh %264 : vector<8x128xf32>
      %266 = arith.mulf %261, %265 : vector<8x128xf32>
      %267 = arith.index_cast %229 : i32 to index
      %c0_107 = arith.constant 0 : index
      %268 = vector.load %arg18[%267, %c0_107] : memref<64x128xf32, #tpu.memory_space<vmem>>, vector<8x128xf32>
      tpu.vector_store %arg18[%267, %c0_107], %266 {strides = array<i32>} : memref<64x128xf32, #tpu.memory_space<vmem>>, vector<8x128xf32>,
      %c6_i32 = arith.constant 6 : i32
      %c8_i32_108 = arith.constant 8 : i32
      %269 = arith.muli %c6_i32, %c8_i32_108 : i32
      %270 = tpu.assume_multiple %269, 8 : i32
      %271 = arith.index_cast %270 : i32 to index
      %c0_109 = arith.constant 0 : index
      %272 = vector.load %arg19[%271, %c0_109] : memref<64x512xf32, #tpu.memory_space<vmem>>, vector<8x512xf32>
      %273 = arith.truncf %266 : vector<8x128xf32> to vector<8x128xbf16>
      %c0_110 = arith.constant 0 : index
      %c0_111 = arith.constant 0 : index
      %274 = vector.load %arg5[%c0_110, %c0_111] : memref<128x512xbf16, #tpu.memory_space<vmem>>, vector<128x512xbf16>
      %cst_112 = arith.constant dense<0.000000e+00> : vector<8x512xf32>
      %275 = tpu.matmul %273, %274, %cst_112 {dimension_numbers = #tpu.dot_dimension_numbers<[1], [0], [0], [1], [0, 0, 1, 1], [], []>} : vector<8x128xbf16>, vector<128x512xbf16>, vector<8x512xf32> -> vector<8x512xf32>
      %276 = arith.addf %272, %275 : vector<8x512xf32>
      %277 = vector.extract_strided_slice %276 {offsets = [0, 0], sizes = [8, 128], strides = [1, 1]} : vector<8x512xf32> to vector<8x128xf32>
      %cst_113 = arith.constant 5.000000e-01 : f32
      %278 = vector.broadcast %cst_113 : f32 to vector<8x128xf32>
      %279 = arith.mulf %278, %277 : vector<8x128xf32>
      %280 = math.tanh %279 : vector<8x128xf32>
      %cst_114 = arith.constant 5.000000e-01 : f32
      %281 = vector.broadcast %cst_114 : f32 to vector<8x128xf32>
      %282 = arith.mulf %281, %280 : vector<8x128xf32>
      %cst_115 = arith.constant 5.000000e-01 : f32
      %283 = vector.broadcast %cst_115 : f32 to vector<8x128xf32>
      %284 = arith.addf %282, %283 : vector<8x128xf32>
      %285 = vector.extract_strided_slice %276 {offsets = [0, 128], sizes = [8, 128], strides = [1, 1]} : vector<8x512xf32> to vector<8x128xf32>
      %cst_116 = arith.constant 5.000000e-01 : f32
      %286 = vector.broadcast %cst_116 : f32 to vector<8x128xf32>
      %287 = arith.mulf %286, %285 : vector<8x128xf32>
      %288 = math.tanh %287 : vector<8x128xf32>
      %cst_117 = arith.constant 5.000000e-01 : f32
      %289 = vector.broadcast %cst_117 : f32 to vector<8x128xf32>
      %290 = arith.mulf %289, %288 : vector<8x128xf32>
      %cst_118 = arith.constant 5.000000e-01 : f32
      %291 = vector.broadcast %cst_118 : f32 to vector<8x128xf32>
      %292 = arith.addf %290, %291 : vector<8x128xf32>
      %293 = vector.extract_strided_slice %276 {offsets = [0, 256], sizes = [8, 128], strides = [1, 1]} : vector<8x512xf32> to vector<8x128xf32>
      %294 = math.tanh %293 : vector<8x128xf32>
      %295 = vector.extract_strided_slice %276 {offsets = [0, 384], sizes = [8, 128], strides = [1, 1]} : vector<8x512xf32> to vector<8x128xf32>
      %cst_119 = arith.constant 5.000000e-01 : f32
      %296 = vector.broadcast %cst_119 : f32 to vector<8x128xf32>
      %297 = arith.mulf %296, %295 : vector<8x128xf32>
      %298 = math.tanh %297 : vector<8x128xf32>
      %cst_120 = arith.constant 5.000000e-01 : f32
      %299 = vector.broadcast %cst_120 : f32 to vector<8x128xf32>
      %300 = arith.mulf %299, %298 : vector<8x128xf32>
      %cst_121 = arith.constant 5.000000e-01 : f32
      %301 = vector.broadcast %cst_121 : f32 to vector<8x128xf32>
      %302 = arith.addf %300, %301 : vector<8x128xf32>
      %303 = arith.mulf %292, %264 : vector<8x128xf32>
      %304 = arith.mulf %284, %294 : vector<8x128xf32>
      %305 = arith.addf %303, %304 : vector<8x128xf32>
      %306 = math.tanh %305 : vector<8x128xf32>
      %307 = arith.mulf %302, %306 : vector<8x128xf32>
      %308 = arith.index_cast %270 : i32 to index
      %c0_122 = arith.constant 0 : index
      %309 = vector.load %arg18[%308, %c0_122] : memref<64x128xf32, #tpu.memory_space<vmem>>, vector<8x128xf32>
      tpu.vector_store %arg18[%308, %c0_122], %307 {strides = array<i32>} : memref<64x128xf32, #tpu.memory_space<vmem>>, vector<8x128xf32>,
      %c7_i32 = arith.constant 7 : i32
      %c8_i32_123 = arith.constant 8 : i32
      %310 = arith.muli %c7_i32, %c8_i32_123 : i32
      %311 = tpu.assume_multiple %310, 8 : i32
      %312 = arith.index_cast %311 : i32 to index
      %c0_124 = arith.constant 0 : index
      %313 = vector.load %arg19[%312, %c0_124] : memref<64x512xf32, #tpu.memory_space<vmem>>, vector<8x512xf32>
      %314 = arith.truncf %307 : vector<8x128xf32> to vector<8x128xbf16>
      %c0_125 = arith.constant 0 : index
      %c0_126 = arith.constant 0 : index
      %315 = vector.load %arg5[%c0_125, %c0_126] : memref<128x512xbf16, #tpu.memory_space<vmem>>, vector<128x512xbf16>
      %cst_127 = arith.constant dense<0.000000e+00> : vector<8x512xf32>
      %316 = tpu.matmul %314, %315, %cst_127 {dimension_numbers = #tpu.dot_dimension_numbers<[1], [0], [0], [1], [0, 0, 1, 1], [], []>} : vector<8x128xbf16>, vector<128x512xbf16>, vector<8x512xf32> -> vector<8x512xf32>
      %317 = arith.addf %313, %316 : vector<8x512xf32>
      %318 = vector.extract_strided_slice %317 {offsets = [0, 0], sizes = [8, 128], strides = [1, 1]} : vector<8x512xf32> to vector<8x128xf32>
      %cst_128 = arith.constant 5.000000e-01 : f32
      %319 = vector.broadcast %cst_128 : f32 to vector<8x128xf32>
      %320 = arith.mulf %319, %318 : vector<8x128xf32>
      %321 = math.tanh %320 : vector<8x128xf32>
      %cst_129 = arith.constant 5.000000e-01 : f32
      %322 = vector.broadcast %cst_129 : f32 to vector<8x128xf32>
      %323 = arith.mulf %322, %321 : vector<8x128xf32>
      %cst_130 = arith.constant 5.000000e-01 : f32
      %324 = vector.broadcast %cst_130 : f32 to vector<8x128xf32>
      %325 = arith.addf %323, %324 : vector<8x128xf32>
      %326 = vector.extract_strided_slice %317 {offsets = [0, 128], sizes = [8, 128], strides = [1, 1]} : vector<8x512xf32> to vector<8x128xf32>
      %cst_131 = arith.constant 5.000000e-01 : f32
      %327 = vector.broadcast %cst_131 : f32 to vector<8x128xf32>
      %328 = arith.mulf %327, %326 : vector<8x128xf32>
      %329 = math.tanh %328 : vector<8x128xf32>
      %cst_132 = arith.constant 5.000000e-01 : f32
      %330 = vector.broadcast %cst_132 : f32 to vector<8x128xf32>
      %331 = arith.mulf %330, %329 : vector<8x128xf32>
      %cst_133 = arith.constant 5.000000e-01 : f32
      %332 = vector.broadcast %cst_133 : f32 to vector<8x128xf32>
      %333 = arith.addf %331, %332 : vector<8x128xf32>
      %334 = vector.extract_strided_slice %317 {offsets = [0, 256], sizes = [8, 128], strides = [1, 1]} : vector<8x512xf32> to vector<8x128xf32>
      %335 = math.tanh %334 : vector<8x128xf32>
      %336 = vector.extract_strided_slice %317 {offsets = [0, 384], sizes = [8, 128], strides = [1, 1]} : vector<8x512xf32> to vector<8x128xf32>
      %cst_134 = arith.constant 5.000000e-01 : f32
      %337 = vector.broadcast %cst_134 : f32 to vector<8x128xf32>
      %338 = arith.mulf %337, %336 : vector<8x128xf32>
      %339 = math.tanh %338 : vector<8x128xf32>
      %cst_135 = arith.constant 5.000000e-01 : f32
      %340 = vector.broadcast %cst_135 : f32 to vector<8x128xf32>
      %341 = arith.mulf %340, %339 : vector<8x128xf32>
      %cst_136 = arith.constant 5.000000e-01 : f32
      %342 = vector.broadcast %cst_136 : f32 to vector<8x128xf32>
      %343 = arith.addf %341, %342 : vector<8x128xf32>
      %344 = arith.mulf %333, %305 : vector<8x128xf32>
      %345 = arith.mulf %325, %335 : vector<8x128xf32>
      %346 = arith.addf %344, %345 : vector<8x128xf32>
      %347 = math.tanh %346 : vector<8x128xf32>
      %348 = arith.mulf %343, %347 : vector<8x128xf32>
      %349 = arith.index_cast %311 : i32 to index
      %c0_137 = arith.constant 0 : index
      %350 = vector.load %arg18[%349, %c0_137] : memref<64x128xf32, #tpu.memory_space<vmem>>, vector<8x128xf32>
      tpu.vector_store %arg18[%349, %c0_137], %348 {strides = array<i32>} : memref<64x128xf32, #tpu.memory_space<vmem>>, vector<8x128xf32>,
      %c8_i32_138 = arith.constant 8 : i32
      %c0_139 = arith.constant 0 : index
      %c0_140 = arith.constant 0 : index
      %351 = vector.load %arg18[%c0_139, %c0_140] : memref<64x128xf32, #tpu.memory_space<vmem>>, vector<64x128xf32>
      %352 = arith.truncf %351 : vector<64x128xf32> to vector<64x128xbf16>
      %c0_141 = arith.constant 0 : index
      %c0_142 = arith.constant 0 : index
      %353 = vector.load %arg7[%c0_141, %c0_142] : memref<128x512xbf16, #tpu.memory_space<vmem>>, vector<128x512xbf16>
      %cst_143 = arith.constant dense<0.000000e+00> : vector<64x512xf32>
      %354 = tpu.matmul %352, %353, %cst_143 {dimension_numbers = #tpu.dot_dimension_numbers<[1], [0], [0], [1], [0, 0, 1, 1], [], []>} : vector<64x128xbf16>, vector<128x512xbf16>, vector<64x512xf32> -> vector<64x512xf32>
      %c0_144 = arith.constant 0 : index
      %c0_145 = arith.constant 0 : index
      %355 = vector.load %arg9[%c0_144, %c0_145] : memref<1x512xf32, #tpu.memory_space<vmem>>, vector<1x512xf32>
      %356 = vector.broadcast %355 : vector<1x512xf32> to vector<64x512xf32>
      %357 = arith.addf %354, %356 : vector<64x512xf32>
      %c0_146 = arith.constant 0 : index
      %c0_147 = arith.constant 0 : index
      %358 = vector.load %arg19[%c0_146, %c0_147] : memref<64x512xf32, #tpu.memory_space<vmem>>, vector<64x512xf32>
      tpu.vector_store %arg19[%c0_146, %c0_147], %357 {strides = array<i32>} : memref<64x512xf32, #tpu.memory_space<vmem>>, vector<64x512xf32>,
      %cst_148 = arith.constant 0.000000e+00 : f32
      %359 = vector.broadcast %cst_148 : f32 to vector<8x128xf32>
      %cst_149 = arith.constant 0.000000e+00 : f32
      %360 = vector.broadcast %cst_149 : f32 to vector<8x128xf32>
      %c0_i32_150 = arith.constant 0 : i32
      %c8_i32_151 = arith.constant 8 : i32
      %361 = arith.muli %c0_i32_150, %c8_i32_151 : i32
      %362 = tpu.assume_multiple %361, 8 : i32
      %363 = arith.index_cast %362 : i32 to index
      %c0_152 = arith.constant 0 : index
      %364 = vector.load %arg19[%363, %c0_152] : memref<64x512xf32, #tpu.memory_space<vmem>>, vector<8x512xf32>
      %365 = arith.truncf %359 : vector<8x128xf32> to vector<8x128xbf16>
      %c0_153 = arith.constant 0 : index
      %c0_154 = arith.constant 0 : index
      %366 = vector.load %arg8[%c0_153, %c0_154] : memref<128x512xbf16, #tpu.memory_space<vmem>>, vector<128x512xbf16>
      %cst_155 = arith.constant dense<0.000000e+00> : vector<8x512xf32>
      %367 = tpu.matmul %365, %366, %cst_155 {dimension_numbers = #tpu.dot_dimension_numbers<[1], [0], [0], [1], [0, 0, 1, 1], [], []>} : vector<8x128xbf16>, vector<128x512xbf16>, vector<8x512xf32> -> vector<8x512xf32>
      %368 = arith.addf %364, %367 : vector<8x512xf32>
      %369 = vector.extract_strided_slice %368 {offsets = [0, 0], sizes = [8, 128], strides = [1, 1]} : vector<8x512xf32> to vector<8x128xf32>
      %cst_156 = arith.constant 5.000000e-01 : f32
      %370 = vector.broadcast %cst_156 : f32 to vector<8x128xf32>
      %371 = arith.mulf %370, %369 : vector<8x128xf32>
      %372 = math.tanh %371 : vector<8x128xf32>
      %cst_157 = arith.constant 5.000000e-01 : f32
      %373 = vector.broadcast %cst_157 : f32 to vector<8x128xf32>
      %374 = arith.mulf %373, %372 : vector<8x128xf32>
      %cst_158 = arith.constant 5.000000e-01 : f32
      %375 = vector.broadcast %cst_158 : f32 to vector<8x128xf32>
      %376 = arith.addf %374, %375 : vector<8x128xf32>
      %377 = vector.extract_strided_slice %368 {offsets = [0, 128], sizes = [8, 128], strides = [1, 1]} : vector<8x512xf32> to vector<8x128xf32>
      %cst_159 = arith.constant 5.000000e-01 : f32
      %378 = vector.broadcast %cst_159 : f32 to vector<8x128xf32>
      %379 = arith.mulf %378, %377 : vector<8x128xf32>
      %380 = math.tanh %379 : vector<8x128xf32>
      %cst_160 = arith.constant 5.000000e-01 : f32
      %381 = vector.broadcast %cst_160 : f32 to vector<8x128xf32>
      %382 = arith.mulf %381, %380 : vector<8x128xf32>
      %cst_161 = arith.constant 5.000000e-01 : f32
      %383 = vector.broadcast %cst_161 : f32 to vector<8x128xf32>
      %384 = arith.addf %382, %383 : vector<8x128xf32>
      %385 = vector.extract_strided_slice %368 {offsets = [0, 256], sizes = [8, 128], strides = [1, 1]} : vector<8x512xf32> to vector<8x128xf32>
      %386 = math.tanh %385 : vector<8x128xf32>
      %387 = vector.extract_strided_slice %368 {offsets = [0, 384], sizes = [8, 128], strides = [1, 1]} : vector<8x512xf32> to vector<8x128xf32>
      %cst_162 = arith.constant 5.000000e-01 : f32
      %388 = vector.broadcast %cst_162 : f32 to vector<8x128xf32>
      %389 = arith.mulf %388, %387 : vector<8x128xf32>
      %390 = math.tanh %389 : vector<8x128xf32>
      %cst_163 = arith.constant 5.000000e-01 : f32
      %391 = vector.broadcast %cst_163 : f32 to vector<8x128xf32>
      %392 = arith.mulf %391, %390 : vector<8x128xf32>
      %cst_164 = arith.constant 5.000000e-01 : f32
      %393 = vector.broadcast %cst_164 : f32 to vector<8x128xf32>
      %394 = arith.addf %392, %393 : vector<8x128xf32>
      %395 = arith.mulf %384, %360 : vector<8x128xf32>
      %396 = arith.mulf %376, %386 : vector<8x128xf32>
      %397 = arith.addf %395, %396 : vector<8x128xf32>
      %398 = math.tanh %397 : vector<8x128xf32>
      %399 = arith.mulf %394, %398 : vector<8x128xf32>
      %c1_i32_165 = arith.constant 1 : i32
      %c8_i32_166 = arith.constant 8 : i32
      %400 = arith.muli %c1_i32_165, %c8_i32_166 : i32
      %401 = tpu.assume_multiple %400, 8 : i32
      %402 = arith.index_cast %401 : i32 to index
      %c0_167 = arith.constant 0 : index
      %403 = vector.load %arg19[%402, %c0_167] : memref<64x512xf32, #tpu.memory_space<vmem>>, vector<8x512xf32>
      %404 = arith.truncf %399 : vector<8x128xf32> to vector<8x128xbf16>
      %c0_168 = arith.constant 0 : index
      %c0_169 = arith.constant 0 : index
      %405 = vector.load %arg8[%c0_168, %c0_169] : memref<128x512xbf16, #tpu.memory_space<vmem>>, vector<128x512xbf16>
      %cst_170 = arith.constant dense<0.000000e+00> : vector<8x512xf32>
      %406 = tpu.matmul %404, %405, %cst_170 {dimension_numbers = #tpu.dot_dimension_numbers<[1], [0], [0], [1], [0, 0, 1, 1], [], []>} : vector<8x128xbf16>, vector<128x512xbf16>, vector<8x512xf32> -> vector<8x512xf32>
      %407 = arith.addf %403, %406 : vector<8x512xf32>
      %408 = vector.extract_strided_slice %407 {offsets = [0, 0], sizes = [8, 128], strides = [1, 1]} : vector<8x512xf32> to vector<8x128xf32>
      %cst_171 = arith.constant 5.000000e-01 : f32
      %409 = vector.broadcast %cst_171 : f32 to vector<8x128xf32>
      %410 = arith.mulf %409, %408 : vector<8x128xf32>
      %411 = math.tanh %410 : vector<8x128xf32>
      %cst_172 = arith.constant 5.000000e-01 : f32
      %412 = vector.broadcast %cst_172 : f32 to vector<8x128xf32>
      %413 = arith.mulf %412, %411 : vector<8x128xf32>
      %cst_173 = arith.constant 5.000000e-01 : f32
      %414 = vector.broadcast %cst_173 : f32 to vector<8x128xf32>
      %415 = arith.addf %413, %414 : vector<8x128xf32>
      %416 = vector.extract_strided_slice %407 {offsets = [0, 128], sizes = [8, 128], strides = [1, 1]} : vector<8x512xf32> to vector<8x128xf32>
      %cst_174 = arith.constant 5.000000e-01 : f32
      %417 = vector.broadcast %cst_174 : f32 to vector<8x128xf32>
      %418 = arith.mulf %417, %416 : vector<8x128xf32>
      %419 = math.tanh %418 : vector<8x128xf32>
      %cst_175 = arith.constant 5.000000e-01 : f32
      %420 = vector.broadcast %cst_175 : f32 to vector<8x128xf32>
      %421 = arith.mulf %420, %419 : vector<8x128xf32>
      %cst_176 = arith.constant 5.000000e-01 : f32
      %422 = vector.broadcast %cst_176 : f32 to vector<8x128xf32>
      %423 = arith.addf %421, %422 : vector<8x128xf32>
      %424 = vector.extract_strided_slice %407 {offsets = [0, 256], sizes = [8, 128], strides = [1, 1]} : vector<8x512xf32> to vector<8x128xf32>
      %425 = math.tanh %424 : vector<8x128xf32>
      %426 = vector.extract_strided_slice %407 {offsets = [0, 384], sizes = [8, 128], strides = [1, 1]} : vector<8x512xf32> to vector<8x128xf32>
      %cst_177 = arith.constant 5.000000e-01 : f32
      %427 = vector.broadcast %cst_177 : f32 to vector<8x128xf32>
      %428 = arith.mulf %427, %426 : vector<8x128xf32>
      %429 = math.tanh %428 : vector<8x128xf32>
      %cst_178 = arith.constant 5.000000e-01 : f32
      %430 = vector.broadcast %cst_178 : f32 to vector<8x128xf32>
      %431 = arith.mulf %430, %429 : vector<8x128xf32>
      %cst_179 = arith.constant 5.000000e-01 : f32
      %432 = vector.broadcast %cst_179 : f32 to vector<8x128xf32>
      %433 = arith.addf %431, %432 : vector<8x128xf32>
      %434 = arith.mulf %423, %397 : vector<8x128xf32>
      %435 = arith.mulf %415, %425 : vector<8x128xf32>
      %436 = arith.addf %434, %435 : vector<8x128xf32>
      %437 = math.tanh %436 : vector<8x128xf32>
      %438 = arith.mulf %433, %437 : vector<8x128xf32>
      %c2_i32_180 = arith.constant 2 : i32
      %c8_i32_181 = arith.constant 8 : i32
      %439 = arith.muli %c2_i32_180, %c8_i32_181 : i32
      %440 = tpu.assume_multiple %439, 8 : i32
      %441 = arith.index_cast %440 : i32 to index
      %c0_182 = arith.constant 0 : index
      %442 = vector.load %arg19[%441, %c0_182] : memref<64x512xf32, #tpu.memory_space<vmem>>, vector<8x512xf32>
      %443 = arith.truncf %438 : vector<8x128xf32> to vector<8x128xbf16>
      %c0_183 = arith.constant 0 : index
      %c0_184 = arith.constant 0 : index
      %444 = vector.load %arg8[%c0_183, %c0_184] : memref<128x512xbf16, #tpu.memory_space<vmem>>, vector<128x512xbf16>
      %cst_185 = arith.constant dense<0.000000e+00> : vector<8x512xf32>
      %445 = tpu.matmul %443, %444, %cst_185 {dimension_numbers = #tpu.dot_dimension_numbers<[1], [0], [0], [1], [0, 0, 1, 1], [], []>} : vector<8x128xbf16>, vector<128x512xbf16>, vector<8x512xf32> -> vector<8x512xf32>
      %446 = arith.addf %442, %445 : vector<8x512xf32>
      %447 = vector.extract_strided_slice %446 {offsets = [0, 0], sizes = [8, 128], strides = [1, 1]} : vector<8x512xf32> to vector<8x128xf32>
      %cst_186 = arith.constant 5.000000e-01 : f32
      %448 = vector.broadcast %cst_186 : f32 to vector<8x128xf32>
      %449 = arith.mulf %448, %447 : vector<8x128xf32>
      %450 = math.tanh %449 : vector<8x128xf32>
      %cst_187 = arith.constant 5.000000e-01 : f32
      %451 = vector.broadcast %cst_187 : f32 to vector<8x128xf32>
      %452 = arith.mulf %451, %450 : vector<8x128xf32>
      %cst_188 = arith.constant 5.000000e-01 : f32
      %453 = vector.broadcast %cst_188 : f32 to vector<8x128xf32>
      %454 = arith.addf %452, %453 : vector<8x128xf32>
      %455 = vector.extract_strided_slice %446 {offsets = [0, 128], sizes = [8, 128], strides = [1, 1]} : vector<8x512xf32> to vector<8x128xf32>
      %cst_189 = arith.constant 5.000000e-01 : f32
      %456 = vector.broadcast %cst_189 : f32 to vector<8x128xf32>
      %457 = arith.mulf %456, %455 : vector<8x128xf32>
      %458 = math.tanh %457 : vector<8x128xf32>
      %cst_190 = arith.constant 5.000000e-01 : f32
      %459 = vector.broadcast %cst_190 : f32 to vector<8x128xf32>
      %460 = arith.mulf %459, %458 : vector<8x128xf32>
      %cst_191 = arith.constant 5.000000e-01 : f32
      %461 = vector.broadcast %cst_191 : f32 to vector<8x128xf32>
      %462 = arith.addf %460, %461 : vector<8x128xf32>
      %463 = vector.extract_strided_slice %446 {offsets = [0, 256], sizes = [8, 128], strides = [1, 1]} : vector<8x512xf32> to vector<8x128xf32>
      %464 = math.tanh %463 : vector<8x128xf32>
      %465 = vector.extract_strided_slice %446 {offsets = [0, 384], sizes = [8, 128], strides = [1, 1]} : vector<8x512xf32> to vector<8x128xf32>
      %cst_192 = arith.constant 5.000000e-01 : f32
      %466 = vector.broadcast %cst_192 : f32 to vector<8x128xf32>
      %467 = arith.mulf %466, %465 : vector<8x128xf32>
      %468 = math.tanh %467 : vector<8x128xf32>
      %cst_193 = arith.constant 5.000000e-01 : f32
      %469 = vector.broadcast %cst_193 : f32 to vector<8x128xf32>
      %470 = arith.mulf %469, %468 : vector<8x128xf32>
      %cst_194 = arith.constant 5.000000e-01 : f32
      %471 = vector.broadcast %cst_194 : f32 to vector<8x128xf32>
      %472 = arith.addf %470, %471 : vector<8x128xf32>
      %473 = arith.mulf %462, %436 : vector<8x128xf32>
      %474 = arith.mulf %454, %464 : vector<8x128xf32>
      %475 = arith.addf %473, %474 : vector<8x128xf32>
      %476 = math.tanh %475 : vector<8x128xf32>
      %477 = arith.mulf %472, %476 : vector<8x128xf32>
      %c3_i32_195 = arith.constant 3 : i32
      %c8_i32_196 = arith.constant 8 : i32
      %478 = arith.muli %c3_i32_195, %c8_i32_196 : i32
      %479 = tpu.assume_multiple %478, 8 : i32
      %480 = arith.index_cast %479 : i32 to index
      %c0_197 = arith.constant 0 : index
      %481 = vector.load %arg19[%480, %c0_197] : memref<64x512xf32, #tpu.memory_space<vmem>>, vector<8x512xf32>
      %482 = arith.truncf %477 : vector<8x128xf32> to vector<8x128xbf16>
      %c0_198 = arith.constant 0 : index
      %c0_199 = arith.constant 0 : index
      %483 = vector.load %arg8[%c0_198, %c0_199] : memref<128x512xbf16, #tpu.memory_space<vmem>>, vector<128x512xbf16>
      %cst_200 = arith.constant dense<0.000000e+00> : vector<8x512xf32>
      %484 = tpu.matmul %482, %483, %cst_200 {dimension_numbers = #tpu.dot_dimension_numbers<[1], [0], [0], [1], [0, 0, 1, 1], [], []>} : vector<8x128xbf16>, vector<128x512xbf16>, vector<8x512xf32> -> vector<8x512xf32>
      %485 = arith.addf %481, %484 : vector<8x512xf32>
      %486 = vector.extract_strided_slice %485 {offsets = [0, 0], sizes = [8, 128], strides = [1, 1]} : vector<8x512xf32> to vector<8x128xf32>
      %cst_201 = arith.constant 5.000000e-01 : f32
      %487 = vector.broadcast %cst_201 : f32 to vector<8x128xf32>
      %488 = arith.mulf %487, %486 : vector<8x128xf32>
      %489 = math.tanh %488 : vector<8x128xf32>
      %cst_202 = arith.constant 5.000000e-01 : f32
      %490 = vector.broadcast %cst_202 : f32 to vector<8x128xf32>
      %491 = arith.mulf %490, %489 : vector<8x128xf32>
      %cst_203 = arith.constant 5.000000e-01 : f32
      %492 = vector.broadcast %cst_203 : f32 to vector<8x128xf32>
      %493 = arith.addf %491, %492 : vector<8x128xf32>
      %494 = vector.extract_strided_slice %485 {offsets = [0, 128], sizes = [8, 128], strides = [1, 1]} : vector<8x512xf32> to vector<8x128xf32>
      %cst_204 = arith.constant 5.000000e-01 : f32
      %495 = vector.broadcast %cst_204 : f32 to vector<8x128xf32>
      %496 = arith.mulf %495, %494 : vector<8x128xf32>
      %497 = math.tanh %496 : vector<8x128xf32>
      %cst_205 = arith.constant 5.000000e-01 : f32
      %498 = vector.broadcast %cst_205 : f32 to vector<8x128xf32>
      %499 = arith.mulf %498, %497 : vector<8x128xf32>
      %cst_206 = arith.constant 5.000000e-01 : f32
      %500 = vector.broadcast %cst_206 : f32 to vector<8x128xf32>
      %501 = arith.addf %499, %500 : vector<8x128xf32>
      %502 = vector.extract_strided_slice %485 {offsets = [0, 256], sizes = [8, 128], strides = [1, 1]} : vector<8x512xf32> to vector<8x128xf32>
      %503 = math.tanh %502 : vector<8x128xf32>
      %504 = vector.extract_strided_slice %485 {offsets = [0, 384], sizes = [8, 128], strides = [1, 1]} : vector<8x512xf32> to vector<8x128xf32>
      %cst_207 = arith.constant 5.000000e-01 : f32
      %505 = vector.broadcast %cst_207 : f32 to vector<8x128xf32>
      %506 = arith.mulf %505, %504 : vector<8x128xf32>
      %507 = math.tanh %506 : vector<8x128xf32>
      %cst_208 = arith.constant 5.000000e-01 : f32
      %508 = vector.broadcast %cst_208 : f32 to vector<8x128xf32>
      %509 = arith.mulf %508, %507 : vector<8x128xf32>
      %cst_209 = arith.constant 5.000000e-01 : f32
      %510 = vector.broadcast %cst_209 : f32 to vector<8x128xf32>
      %511 = arith.addf %509, %510 : vector<8x128xf32>
      %512 = arith.mulf %501, %475 : vector<8x128xf32>
      %513 = arith.mulf %493, %503 : vector<8x128xf32>
      %514 = arith.addf %512, %513 : vector<8x128xf32>
      %515 = math.tanh %514 : vector<8x128xf32>
      %516 = arith.mulf %511, %515 : vector<8x128xf32>
      %c4_i32_210 = arith.constant 4 : i32
      %c8_i32_211 = arith.constant 8 : i32
      %517 = arith.muli %c4_i32_210, %c8_i32_211 : i32
      %518 = tpu.assume_multiple %517, 8 : i32
      %519 = arith.index_cast %518 : i32 to index
      %c0_212 = arith.constant 0 : index
      %520 = vector.load %arg19[%519, %c0_212] : memref<64x512xf32, #tpu.memory_space<vmem>>, vector<8x512xf32>
      %521 = arith.truncf %516 : vector<8x128xf32> to vector<8x128xbf16>
      %c0_213 = arith.constant 0 : index
      %c0_214 = arith.constant 0 : index
      %522 = vector.load %arg8[%c0_213, %c0_214] : memref<128x512xbf16, #tpu.memory_space<vmem>>, vector<128x512xbf16>
      %cst_215 = arith.constant dense<0.000000e+00> : vector<8x512xf32>
      %523 = tpu.matmul %521, %522, %cst_215 {dimension_numbers = #tpu.dot_dimension_numbers<[1], [0], [0], [1], [0, 0, 1, 1], [], []>} : vector<8x128xbf16>, vector<128x512xbf16>, vector<8x512xf32> -> vector<8x512xf32>
      %524 = arith.addf %520, %523 : vector<8x512xf32>
      %525 = vector.extract_strided_slice %524 {offsets = [0, 0], sizes = [8, 128], strides = [1, 1]} : vector<8x512xf32> to vector<8x128xf32>
      %cst_216 = arith.constant 5.000000e-01 : f32
      %526 = vector.broadcast %cst_216 : f32 to vector<8x128xf32>
      %527 = arith.mulf %526, %525 : vector<8x128xf32>
      %528 = math.tanh %527 : vector<8x128xf32>
      %cst_217 = arith.constant 5.000000e-01 : f32
      %529 = vector.broadcast %cst_217 : f32 to vector<8x128xf32>
      %530 = arith.mulf %529, %528 : vector<8x128xf32>
      %cst_218 = arith.constant 5.000000e-01 : f32
      %531 = vector.broadcast %cst_218 : f32 to vector<8x128xf32>
      %532 = arith.addf %530, %531 : vector<8x128xf32>
      %533 = vector.extract_strided_slice %524 {offsets = [0, 128], sizes = [8, 128], strides = [1, 1]} : vector<8x512xf32> to vector<8x128xf32>
      %cst_219 = arith.constant 5.000000e-01 : f32
      %534 = vector.broadcast %cst_219 : f32 to vector<8x128xf32>
      %535 = arith.mulf %534, %533 : vector<8x128xf32>
      %536 = math.tanh %535 : vector<8x128xf32>
      %cst_220 = arith.constant 5.000000e-01 : f32
      %537 = vector.broadcast %cst_220 : f32 to vector<8x128xf32>
      %538 = arith.mulf %537, %536 : vector<8x128xf32>
      %cst_221 = arith.constant 5.000000e-01 : f32
      %539 = vector.broadcast %cst_221 : f32 to vector<8x128xf32>
      %540 = arith.addf %538, %539 : vector<8x128xf32>
      %541 = vector.extract_strided_slice %524 {offsets = [0, 256], sizes = [8, 128], strides = [1, 1]} : vector<8x512xf32> to vector<8x128xf32>
      %542 = math.tanh %541 : vector<8x128xf32>
      %543 = vector.extract_strided_slice %524 {offsets = [0, 384], sizes = [8, 128], strides = [1, 1]} : vector<8x512xf32> to vector<8x128xf32>
      %cst_222 = arith.constant 5.000000e-01 : f32
      %544 = vector.broadcast %cst_222 : f32 to vector<8x128xf32>
      %545 = arith.mulf %544, %543 : vector<8x128xf32>
      %546 = math.tanh %545 : vector<8x128xf32>
      %cst_223 = arith.constant 5.000000e-01 : f32
      %547 = vector.broadcast %cst_223 : f32 to vector<8x128xf32>
      %548 = arith.mulf %547, %546 : vector<8x128xf32>
      %cst_224 = arith.constant 5.000000e-01 : f32
      %549 = vector.broadcast %cst_224 : f32 to vector<8x128xf32>
      %550 = arith.addf %548, %549 : vector<8x128xf32>
      %551 = arith.mulf %540, %514 : vector<8x128xf32>
      %552 = arith.mulf %532, %542 : vector<8x128xf32>
      %553 = arith.addf %551, %552 : vector<8x128xf32>
      %554 = math.tanh %553 : vector<8x128xf32>
      %555 = arith.mulf %550, %554 : vector<8x128xf32>
      %c5_i32_225 = arith.constant 5 : i32
      %c8_i32_226 = arith.constant 8 : i32
      %556 = arith.muli %c5_i32_225, %c8_i32_226 : i32
      %557 = tpu.assume_multiple %556, 8 : i32
      %558 = arith.index_cast %557 : i32 to index
      %c0_227 = arith.constant 0 : index
      %559 = vector.load %arg19[%558, %c0_227] : memref<64x512xf32, #tpu.memory_space<vmem>>, vector<8x512xf32>
      %560 = arith.truncf %555 : vector<8x128xf32> to vector<8x128xbf16>
      %c0_228 = arith.constant 0 : index
      %c0_229 = arith.constant 0 : index
      %561 = vector.load %arg8[%c0_228, %c0_229] : memref<128x512xbf16, #tpu.memory_space<vmem>>, vector<128x512xbf16>
      %cst_230 = arith.constant dense<0.000000e+00> : vector<8x512xf32>
      %562 = tpu.matmul %560, %561, %cst_230 {dimension_numbers = #tpu.dot_dimension_numbers<[1], [0], [0], [1], [0, 0, 1, 1], [], []>} : vector<8x128xbf16>, vector<128x512xbf16>, vector<8x512xf32> -> vector<8x512xf32>
      %563 = arith.addf %559, %562 : vector<8x512xf32>
      %564 = vector.extract_strided_slice %563 {offsets = [0, 0], sizes = [8, 128], strides = [1, 1]} : vector<8x512xf32> to vector<8x128xf32>
      %cst_231 = arith.constant 5.000000e-01 : f32
      %565 = vector.broadcast %cst_231 : f32 to vector<8x128xf32>
      %566 = arith.mulf %565, %564 : vector<8x128xf32>
      %567 = math.tanh %566 : vector<8x128xf32>
      %cst_232 = arith.constant 5.000000e-01 : f32
      %568 = vector.broadcast %cst_232 : f32 to vector<8x128xf32>
      %569 = arith.mulf %568, %567 : vector<8x128xf32>
      %cst_233 = arith.constant 5.000000e-01 : f32
      %570 = vector.broadcast %cst_233 : f32 to vector<8x128xf32>
      %571 = arith.addf %569, %570 : vector<8x128xf32>
      %572 = vector.extract_strided_slice %563 {offsets = [0, 128], sizes = [8, 128], strides = [1, 1]} : vector<8x512xf32> to vector<8x128xf32>
      %cst_234 = arith.constant 5.000000e-01 : f32
      %573 = vector.broadcast %cst_234 : f32 to vector<8x128xf32>
      %574 = arith.mulf %573, %572 : vector<8x128xf32>
      %575 = math.tanh %574 : vector<8x128xf32>
      %cst_235 = arith.constant 5.000000e-01 : f32
      %576 = vector.broadcast %cst_235 : f32 to vector<8x128xf32>
      %577 = arith.mulf %576, %575 : vector<8x128xf32>
      %cst_236 = arith.constant 5.000000e-01 : f32
      %578 = vector.broadcast %cst_236 : f32 to vector<8x128xf32>
      %579 = arith.addf %577, %578 : vector<8x128xf32>
      %580 = vector.extract_strided_slice %563 {offsets = [0, 256], sizes = [8, 128], strides = [1, 1]} : vector<8x512xf32> to vector<8x128xf32>
      %581 = math.tanh %580 : vector<8x128xf32>
      %582 = vector.extract_strided_slice %563 {offsets = [0, 384], sizes = [8, 128], strides = [1, 1]} : vector<8x512xf32> to vector<8x128xf32>
      %cst_237 = arith.constant 5.000000e-01 : f32
      %583 = vector.broadcast %cst_237 : f32 to vector<8x128xf32>
      %584 = arith.mulf %583, %582 : vector<8x128xf32>
      %585 = math.tanh %584 : vector<8x128xf32>
      %cst_238 = arith.constant 5.000000e-01 : f32
      %586 = vector.broadcast %cst_238 : f32 to vector<8x128xf32>
      %587 = arith.mulf %586, %585 : vector<8x128xf32>
      %cst_239 = arith.constant 5.000000e-01 : f32
      %588 = vector.broadcast %cst_239 : f32 to vector<8x128xf32>
      %589 = arith.addf %587, %588 : vector<8x128xf32>
      %590 = arith.mulf %579, %553 : vector<8x128xf32>
      %591 = arith.mulf %571, %581 : vector<8x128xf32>
      %592 = arith.addf %590, %591 : vector<8x128xf32>
      %593 = math.tanh %592 : vector<8x128xf32>
      %594 = arith.mulf %589, %593 : vector<8x128xf32>
      %c6_i32_240 = arith.constant 6 : i32
      %c8_i32_241 = arith.constant 8 : i32
      %595 = arith.muli %c6_i32_240, %c8_i32_241 : i32
      %596 = tpu.assume_multiple %595, 8 : i32
      %597 = arith.index_cast %596 : i32 to index
      %c0_242 = arith.constant 0 : index
      %598 = vector.load %arg19[%597, %c0_242] : memref<64x512xf32, #tpu.memory_space<vmem>>, vector<8x512xf32>
      %599 = arith.truncf %594 : vector<8x128xf32> to vector<8x128xbf16>
      %c0_243 = arith.constant 0 : index
      %c0_244 = arith.constant 0 : index
      %600 = vector.load %arg8[%c0_243, %c0_244] : memref<128x512xbf16, #tpu.memory_space<vmem>>, vector<128x512xbf16>
      %cst_245 = arith.constant dense<0.000000e+00> : vector<8x512xf32>
      %601 = tpu.matmul %599, %600, %cst_245 {dimension_numbers = #tpu.dot_dimension_numbers<[1], [0], [0], [1], [0, 0, 1, 1], [], []>} : vector<8x128xbf16>, vector<128x512xbf16>, vector<8x512xf32> -> vector<8x512xf32>
      %602 = arith.addf %598, %601 : vector<8x512xf32>
      %603 = vector.extract_strided_slice %602 {offsets = [0, 0], sizes = [8, 128], strides = [1, 1]} : vector<8x512xf32> to vector<8x128xf32>
      %cst_246 = arith.constant 5.000000e-01 : f32
      %604 = vector.broadcast %cst_246 : f32 to vector<8x128xf32>
      %605 = arith.mulf %604, %603 : vector<8x128xf32>
      %606 = math.tanh %605 : vector<8x128xf32>
      %cst_247 = arith.constant 5.000000e-01 : f32
      %607 = vector.broadcast %cst_247 : f32 to vector<8x128xf32>
      %608 = arith.mulf %607, %606 : vector<8x128xf32>
      %cst_248 = arith.constant 5.000000e-01 : f32
      %609 = vector.broadcast %cst_248 : f32 to vector<8x128xf32>
      %610 = arith.addf %608, %609 : vector<8x128xf32>
      %611 = vector.extract_strided_slice %602 {offsets = [0, 128], sizes = [8, 128], strides = [1, 1]} : vector<8x512xf32> to vector<8x128xf32>
      %cst_249 = arith.constant 5.000000e-01 : f32
      %612 = vector.broadcast %cst_249 : f32 to vector<8x128xf32>
      %613 = arith.mulf %612, %611 : vector<8x128xf32>
      %614 = math.tanh %613 : vector<8x128xf32>
      %cst_250 = arith.constant 5.000000e-01 : f32
      %615 = vector.broadcast %cst_250 : f32 to vector<8x128xf32>
      %616 = arith.mulf %615, %614 : vector<8x128xf32>
      %cst_251 = arith.constant 5.000000e-01 : f32
      %617 = vector.broadcast %cst_251 : f32 to vector<8x128xf32>
      %618 = arith.addf %616, %617 : vector<8x128xf32>
      %619 = vector.extract_strided_slice %602 {offsets = [0, 256], sizes = [8, 128], strides = [1, 1]} : vector<8x512xf32> to vector<8x128xf32>
      %620 = math.tanh %619 : vector<8x128xf32>
      %621 = vector.extract_strided_slice %602 {offsets = [0, 384], sizes = [8, 128], strides = [1, 1]} : vector<8x512xf32> to vector<8x128xf32>
      %cst_252 = arith.constant 5.000000e-01 : f32
      %622 = vector.broadcast %cst_252 : f32 to vector<8x128xf32>
      %623 = arith.mulf %622, %621 : vector<8x128xf32>
      %624 = math.tanh %623 : vector<8x128xf32>
      %cst_253 = arith.constant 5.000000e-01 : f32
      %625 = vector.broadcast %cst_253 : f32 to vector<8x128xf32>
      %626 = arith.mulf %625, %624 : vector<8x128xf32>
      %cst_254 = arith.constant 5.000000e-01 : f32
      %627 = vector.broadcast %cst_254 : f32 to vector<8x128xf32>
      %628 = arith.addf %626, %627 : vector<8x128xf32>
      %629 = arith.mulf %618, %592 : vector<8x128xf32>
      %630 = arith.mulf %610, %620 : vector<8x128xf32>
      %631 = arith.addf %629, %630 : vector<8x128xf32>
      %632 = math.tanh %631 : vector<8x128xf32>
      %633 = arith.mulf %628, %632 : vector<8x128xf32>
      %c7_i32_255 = arith.constant 7 : i32
      %c8_i32_256 = arith.constant 8 : i32
      %634 = arith.muli %c7_i32_255, %c8_i32_256 : i32
      %635 = tpu.assume_multiple %634, 8 : i32
      %636 = arith.index_cast %635 : i32 to index
      %c0_257 = arith.constant 0 : index
      %637 = vector.load %arg19[%636, %c0_257] : memref<64x512xf32, #tpu.memory_space<vmem>>, vector<8x512xf32>
      %638 = arith.truncf %633 : vector<8x128xf32> to vector<8x128xbf16>
      %c0_258 = arith.constant 0 : index
      %c0_259 = arith.constant 0 : index
      %639 = vector.load %arg8[%c0_258, %c0_259] : memref<128x512xbf16, #tpu.memory_space<vmem>>, vector<128x512xbf16>
      %cst_260 = arith.constant dense<0.000000e+00> : vector<8x512xf32>
      %640 = tpu.matmul %638, %639, %cst_260 {dimension_numbers = #tpu.dot_dimension_numbers<[1], [0], [0], [1], [0, 0, 1, 1], [], []>} : vector<8x128xbf16>, vector<128x512xbf16>, vector<8x512xf32> -> vector<8x512xf32>
      %641 = arith.addf %637, %640 : vector<8x512xf32>
      %642 = vector.extract_strided_slice %641 {offsets = [0, 0], sizes = [8, 128], strides = [1, 1]} : vector<8x512xf32> to vector<8x128xf32>
      %cst_261 = arith.constant 5.000000e-01 : f32
      %643 = vector.broadcast %cst_261 : f32 to vector<8x128xf32>
      %644 = arith.mulf %643, %642 : vector<8x128xf32>
      %645 = math.tanh %644 : vector<8x128xf32>
      %cst_262 = arith.constant 5.000000e-01 : f32
      %646 = vector.broadcast %cst_262 : f32 to vector<8x128xf32>
      %647 = arith.mulf %646, %645 : vector<8x128xf32>
      %cst_263 = arith.constant 5.000000e-01 : f32
      %648 = vector.broadcast %cst_263 : f32 to vector<8x128xf32>
      %649 = arith.addf %647, %648 : vector<8x128xf32>
      %650 = vector.extract_strided_slice %641 {offsets = [0, 128], sizes = [8, 128], strides = [1, 1]} : vector<8x512xf32> to vector<8x128xf32>
      %cst_264 = arith.constant 5.000000e-01 : f32
      %651 = vector.broadcast %cst_264 : f32 to vector<8x128xf32>
      %652 = arith.mulf %651, %650 : vector<8x128xf32>
      %653 = math.tanh %652 : vector<8x128xf32>
      %cst_265 = arith.constant 5.000000e-01 : f32
      %654 = vector.broadcast %cst_265 : f32 to vector<8x128xf32>
      %655 = arith.mulf %654, %653 : vector<8x128xf32>
      %cst_266 = arith.constant 5.000000e-01 : f32
      %656 = vector.broadcast %cst_266 : f32 to vector<8x128xf32>
      %657 = arith.addf %655, %656 : vector<8x128xf32>
      %658 = vector.extract_strided_slice %641 {offsets = [0, 256], sizes = [8, 128], strides = [1, 1]} : vector<8x512xf32> to vector<8x128xf32>
      %659 = math.tanh %658 : vector<8x128xf32>
      %660 = vector.extract_strided_slice %641 {offsets = [0, 384], sizes = [8, 128], strides = [1, 1]} : vector<8x512xf32> to vector<8x128xf32>
      %cst_267 = arith.constant 5.000000e-01 : f32
      %661 = vector.broadcast %cst_267 : f32 to vector<8x128xf32>
      %662 = arith.mulf %661, %660 : vector<8x128xf32>
      %663 = math.tanh %662 : vector<8x128xf32>
      %cst_268 = arith.constant 5.000000e-01 : f32
      %664 = vector.broadcast %cst_268 : f32 to vector<8x128xf32>
      %665 = arith.mulf %664, %663 : vector<8x128xf32>
      %cst_269 = arith.constant 5.000000e-01 : f32
      %666 = vector.broadcast %cst_269 : f32 to vector<8x128xf32>
      %667 = arith.addf %665, %666 : vector<8x128xf32>
      %668 = arith.mulf %657, %631 : vector<8x128xf32>
      %669 = arith.mulf %649, %659 : vector<8x128xf32>
      %670 = arith.addf %668, %669 : vector<8x128xf32>
      %671 = math.tanh %670 : vector<8x128xf32>
      %672 = arith.mulf %667, %671 : vector<8x128xf32>
      %c8_i32_270 = arith.constant 8 : i32
      %c56 = arith.constant 56 : index
      %c0_271 = arith.constant 0 : index
      %673 = vector.load %arg17[%c56, %c0_271] : memref<64x128xf32, #tpu.memory_space<vmem>>, vector<8x128xf32>
      %674 = arith.truncf %673 : vector<8x128xf32> to vector<8x128xbf16>
      %675 = arith.truncf %672 : vector<8x128xf32> to vector<8x128xbf16>
      %676 = tpu.concatenate %674, %675 in 1 : vector<8x128xbf16>, vector<8x128xbf16> -> vector<8x256xbf16>
      %c0_272 = arith.constant 0 : index
      %c0_273 = arith.constant 0 : index
      %677 = vector.load %arg10[%c0_272, %c0_273] : memref<256x512xbf16, #tpu.memory_space<vmem>>, vector<256x512xbf16>
      %cst_274 = arith.constant dense<0.000000e+00> : vector<8x512xf32>
      %678 = tpu.matmul %676, %677, %cst_274 {dimension_numbers = #tpu.dot_dimension_numbers<[1], [0], [0], [1], [0, 0, 1, 1], [], []>} : vector<8x256xbf16>, vector<256x512xbf16>, vector<8x512xf32> -> vector<8x512xf32>
      %c0_275 = arith.constant 0 : index
      %c0_276 = arith.constant 0 : index
      %679 = vector.load %arg11[%c0_275, %c0_276] : memref<1x512xf32, #tpu.memory_space<vmem>>, vector<1x512xf32>
      %680 = vector.broadcast %679 : vector<1x512xf32> to vector<8x512xf32>
      %681 = arith.addf %678, %680 : vector<8x512xf32>
      %cst_277 = arith.constant 0.000000e+00 : f32
      %682 = vector.broadcast %cst_277 : f32 to vector<8x512xf32>
      %683 = arith.maximumf %681, %682 : vector<8x512xf32>
      %684 = arith.truncf %683 : vector<8x512xf32> to vector<8x512xbf16>
      %c0_278 = arith.constant 0 : index
      %c0_279 = arith.constant 0 : index
      %685 = vector.load %arg12[%c0_278, %c0_279] : memref<512x128xbf16, #tpu.memory_space<vmem>>, vector<512x128xbf16>
      %cst_280 = arith.constant dense<0.000000e+00> : vector<8x128xf32>
      %686 = tpu.matmul %684, %685, %cst_280 {dimension_numbers = #tpu.dot_dimension_numbers<[1], [0], [0], [1], [0, 0, 1, 1], [], []>} : vector<8x512xbf16>, vector<512x128xbf16>, vector<8x128xf32> -> vector<8x128xf32>
      %c0_281 = arith.constant 0 : index
      %c0_282 = arith.constant 0 : index
      %687 = vector.load %arg13[%c0_281, %c0_282] : memref<1x128xf32, #tpu.memory_space<vmem>>, vector<1x128xf32>
      %688 = vector.broadcast %687 : vector<1x128xf32> to vector<8x128xf32>
      %689 = arith.addf %686, %688 : vector<8x128xf32>
      %cst_283 = arith.constant 0.000000e+00 : f32
      %690 = vector.broadcast %cst_283 : f32 to vector<8x128xf32>
      %691 = arith.maximumf %689, %690 : vector<8x128xf32>
      %692 = arith.truncf %691 : vector<8x128xf32> to vector<8x128xbf16>
      %c0_284 = arith.constant 0 : index
      %c0_285 = arith.constant 0 : index
      %693 = vector.load %arg14[%c0_284, %c0_285] : memref<128x128xbf16, #tpu.memory_space<vmem>>, vector<128x128xbf16>
      %cst_286 = arith.constant dense<0.000000e+00> : vector<8x128xf32>
      %694 = tpu.matmul %692, %693, %cst_286 {dimension_numbers = #tpu.dot_dimension_numbers<[1], [0], [0], [1], [0, 0, 1, 1], [], []>} : vector<8x128xbf16>, vector<128x128xbf16>, vector<8x128xf32> -> vector<8x128xf32>
      %c0_287 = arith.constant 0 : index
      %c0_288 = arith.constant 0 : index
      %695 = vector.load %arg15[%c0_287, %c0_288] : memref<1x128xf32, #tpu.memory_space<vmem>>, vector<1x128xf32>
      %696 = vector.broadcast %695 : vector<1x128xf32> to vector<8x128xf32>
      %697 = arith.addf %694, %696 : vector<8x128xf32>
      %c0_289 = arith.constant 0 : index
      %c0_290 = arith.constant 0 : index
      %698 = vector.load %arg16[%c0_289, %c0_290] : memref<8x128xf32, #tpu.memory_space<vmem>>, vector<8x128xf32>
      tpu.vector_store %arg16[%c0_289, %c0_290], %697 {strides = array<i32>} : memref<8x128xf32, #tpu.memory_space<vmem>>, vector<8x128xf32>,
    } else {
    }
    return
  }
  func.func @transform_0(%arg0: i32) -> (i32, i32) {
    %c0_i32 = arith.constant 0 : i32
    %c0_i32_0 = arith.constant 0 : i32
    return %arg0, %c0_i32 : i32, i32
  }
  func.func @transform_1(%arg0: i32) -> (i32, i32) {
    %c0_i32 = arith.constant 0 : i32
    %c0_i32_0 = arith.constant 0 : i32
    %c0_i32_1 = arith.constant 0 : i32
    return %c0_i32, %c0_i32_0 : i32, i32
  }
  func.func @transform_2(%arg0: i32) -> (i32, i32) {
    %c0_i32 = arith.constant 0 : i32
    %c0_i32_0 = arith.constant 0 : i32
    %c0_i32_1 = arith.constant 0 : i32
    return %c0_i32, %c0_i32_0 : i32, i32
  }
  func.func @transform_3(%arg0: i32) -> (i32, i32) {
    %c0_i32 = arith.constant 0 : i32
    %c0_i32_0 = arith.constant 0 : i32
    %c0_i32_1 = arith.constant 0 : i32
    return %c0_i32, %c0_i32_0 : i32, i32
  }
  func.func @transform_4(%arg0: i32) -> (i32, i32) {
    %c0_i32 = arith.constant 0 : i32
    %c0_i32_0 = arith.constant 0 : i32
    %c0_i32_1 = arith.constant 0 : i32
    return %c0_i32, %c0_i32_0 : i32, i32
  }
  func.func @transform_5(%arg0: i32) -> (i32, i32) {
    %c0_i32 = arith.constant 0 : i32
    %c0_i32_0 = arith.constant 0 : i32
    %c0_i32_1 = arith.constant 0 : i32
    return %c0_i32, %c0_i32_0 : i32, i32
  }
  func.func @transform_6(%arg0: i32) -> (i32, i32) {
    %c0_i32 = arith.constant 0 : i32
    %c0_i32_0 = arith.constant 0 : i32
    %c0_i32_1 = arith.constant 0 : i32
    return %c0_i32, %c0_i32_0 : i32, i32
  }
  func.func @transform_7(%arg0: i32) -> (i32, i32) {
    %c0_i32 = arith.constant 0 : i32
    %c0_i32_0 = arith.constant 0 : i32
    %c0_i32_1 = arith.constant 0 : i32
    return %c0_i32, %c0_i32_0 : i32, i32
  }
  func.func @transform_8(%arg0: i32) -> (i32, i32) {
    %c0_i32 = arith.constant 0 : i32
    %c0_i32_0 = arith.constant 0 : i32
    %c0_i32_1 = arith.constant 0 : i32
    return %c0_i32, %c0_i32_0 : i32, i32
  }
  func.func @transform_9(%arg0: i32) -> (i32, i32) {
    %c0_i32 = arith.constant 0 : i32
    %c0_i32_0 = arith.constant 0 : i32
    %c0_i32_1 = arith.constant 0 : i32
    return %c0_i32, %c0_i32_0 : i32, i32
  }
  func.func @transform_10(%arg0: i32) -> (i32, i32) {
    %c0_i32 = arith.constant 0 : i32
    %c0_i32_0 = arith.constant 0 : i32
    %c0_i32_1 = arith.constant 0 : i32
    return %c0_i32, %c0_i32_0 : i32, i32
  }
  func.func @transform_11(%arg0: i32) -> (i32, i32) {
    %c0_i32 = arith.constant 0 : i32
    %c0_i32_0 = arith.constant 0 : i32
    %c0_i32_1 = arith.constant 0 : i32
    return %c0_i32, %c0_i32_0 : i32, i32
  }
  func.func @transform_12(%arg0: i32) -> (i32, i32) {
    %c0_i32 = arith.constant 0 : i32
    %c0_i32_0 = arith.constant 0 : i32
    %c0_i32_1 = arith.constant 0 : i32
    return %c0_i32, %c0_i32_0 : i32, i32
  }
  func.func @transform_13(%arg0: i32) -> (i32, i32) {
    %c0_i32 = arith.constant 0 : i32
    %c0_i32_0 = arith.constant 0 : i32
    %c0_i32_1 = arith.constant 0 : i32
    return %c0_i32, %c0_i32_0 : i32, i32
  }
  func.func @transform_14(%arg0: i32) -> (i32, i32) {
    %c0_i32 = arith.constant 0 : i32
    %c0_i32_0 = arith.constant 0 : i32
    %c0_i32_1 = arith.constant 0 : i32
    return %c0_i32, %c0_i32_0 : i32, i32
  }
  func.func @transform_15(%arg0: i32) -> (i32, i32) {
    %c0_i32 = arith.constant 0 : i32
    %c0_i32_0 = arith.constant 0 : i32
    %c0_i32_1 = arith.constant 0 : i32
    return %c0_i32, %c0_i32_0 : i32, i32
  }
}

</mosaic_0001>

<bundles_post_ra>
// kernel: lstm_group_forward.1
= control target key start
LH: loop header
LB: loop body
LE: loop exit
PB: predicated region body
PF: predicated region fallthrough
CT: control target
= control target key end

     0   :  { %vm7757_vm0 = vmmov 0   ;;  %s10183_s1 = inlined_call_operand.vmem [shape: bf16[1024,128], index: 1, kind: input, shape index: {}]   ;;  %s10184_s0 = inlined_call_operand.vmem [shape: bf16[64,1024], index: 0, kind: input, shape index: {}]   ;;  %s10185_s3 = inlined_call_operand.vmem [shape: bf16[128,512], index: 3, kind: input, shape index: {}]   ;;  %s10186_s4 = inlined_call_operand.vmem [shape: bf16[128,512], index: 4, kind: input, shape index: {}]   ;;  %s10187_s2 = inlined_call_operand.vmem [shape: f32[1,128], index: 2, kind: input, shape index: {}]   ;;  %s10188_s5 = inlined_call_operand.vmem [shape: f32[1,512], index: 5, kind: input, shape index: {}]   ;;  %s10189_s6 = inlined_call_operand.vmem [shape: bf16[128,512], index: 6, kind: input, shape index: {}]   ;;  %s10190_s7 = inlined_call_operand.vmem [shape: bf16[128,512], index: 7, kind: input, shape index: {}]   ;;  %s10191_s8 = inlined_call_operand.vmem [shape: f32[1,512], index: 8, kind: input, shape index: {}]   ;;  %s10192_s9 = inlined_call_operand.vmem [shape: bf16[256,512], index: 9, kind: input, shape index: {}]   ;;  %s10193_s11 = inlined_call_operand.vmem [shape: bf16[512,128], index: 11, kind: input, shape index: {}]   ;;  %s10194_s13 = inlined_call_operand.vmem [shape: bf16[128,128], index: 13, kind: input, shape index: {}]   ;;  %s10195_s10 = inlined_call_operand.vmem [shape: f32[1,512], index: 10, kind: input, shape index: {}]   ;;  %s10196_s12 = inlined_call_operand.vmem [shape: f32[1,128], index: 12, kind: input, shape index: {}]   ;;  %s10197_s14 = inlined_call_operand.vmem [shape: f32[1,128], index: 14, kind: input, shape index: {}]   ;;  %s10198_s15 = inlined_call_operand.vmem [shape: f32[8,128], index: 15, kind: output, shape index: {}]  }
   0x1   :  { %v7111_v0 = vld [vmem:[%s10183_s1 + $0x40] sm:$0xff]   ;;  %v7115_v4 = vld [vmem:[%s10183_s1 + $0x48] sm:$0xff]   ;;  %v7119_v8 = vld [vmem:[%s10183_s1 + $0x50] sm:$0xff]  }
   0x2   :  { %v7112_v1 = vld [vmem:[%s10183_s1 + $0xc0] sm:$0xff]   ;;  %6875 = vmatprep.subr.bf16.mxu0 %v7111_v0  ;;  %v7116_v5 = vld [vmem:[%s10183_s1 + $0xc8] sm:$0xff]   ;;  %v7120_v9 = vld [vmem:[%s10183_s1 + $0xd0] sm:$0xff]  }
   0x3   :  { %v7113_v2 = vld [vmem:[%s10183_s1] sm:$0xff]   ;;  %6915 = vmatprep.subr.bf16.mxu1 %v7112_v1  ;;  %v7117_v6 = vld [vmem:[%s10183_s1 + $0x8] sm:$0xff]   ;;  %v7121_v10 = vld [vmem:[%s10183_s1 + $0x10] sm:$0xff]  }
   0x4   :  { %v7114_v3 = vld [vmem:[%s10183_s1 + $0x80] sm:$0xff]   ;;  %6876 = vmatpush3.bf16.msra.mxu0 %v7113_v2  ;;  %v7118_v7 = vld [vmem:[%s10183_s1 + $0x88] sm:$0xff]   ;;  %v7122_v11 = vld [vmem:[%s10183_s1 + $0x90] sm:$0xff]  }
   0x5   :  { %6916 = vmatpush3.bf16.msra.mxu1 %v7114_v3  ;;  %6877 = vmatprep.subr.bf16.mxu0 %v7115_v4  ;;  %v7123_v12 = vld [vmem:[%s10183_s1 + $0x58] sm:$0xff]   ;;  %v7127_v16 = vld [vmem:[%s10183_s1 + $0x60] sm:$0xff]   ;;  %v7131_v20 = vld [vmem:[%s10183_s1 + $0x68] sm:$0xff]  }
   0x6   :  { %6917 = vmatprep.subr.bf16.mxu1 %v7116_v5  ;;  %v7124_v13 = vld [vmem:[%s10183_s1 + $0xd8] sm:$0xff]   ;;  %v7128_v17 = vld [vmem:[%s10183_s1 + $0xe0] sm:$0xff]   ;;  %v7132_v21 = vld [vmem:[%s10183_s1 + $0xe8] sm:$0xff]  }
   0x7   :  { %v7125_v14 = vld [vmem:[%s10183_s1 + $0x18] sm:$0xff]   ;;  %v7129_v18 = vld [vmem:[%s10183_s1 + $0x20] sm:$0xff]   ;;  %v7133_v22 = vld [vmem:[%s10183_s1 + $0x28] sm:$0xff]  }
   0x8   :  { %6878 = vmatpush3.bf16.msra.mxu0 %v7117_v6  ;;  %v7126_v15 = vld [vmem:[%s10183_s1 + $0x98] sm:$0xff]   ;;  %v7130_v19 = vld [vmem:[%s10183_s1 + $0xa0] sm:$0xff]   ;;  %v7134_v23 = vld [vmem:[%s10183_s1 + $0xa8] sm:$0xff]  }
   0x9   :  { %6918 = vmatpush3.bf16.msra.mxu1 %v7118_v7  ;;  %6879 = vmatprep.subr.bf16.mxu0 %v7119_v8  ;;  %v7135_v24 = vld [vmem:[%s10183_s1 + $0x70] sm:$0xff]   ;;  %v7139_v28 = vld [vmem:[%s10183_s1 + $0x78] sm:$0xff]   ;;  %v52_v32 = vld [vmem:[%s10184_s0] sm:$0xff] }
   0xa   :  { %6919 = vmatprep.subr.bf16.mxu1 %v7120_v9  ;;  %v7136_v25 = vld [vmem:[%s10183_s1 + $0xf0] sm:$0xff]   ;;  %v7140_v29 = vld [vmem:[%s10183_s1 + $0xf8] sm:$0xff]   ;;  %v56_v33 = vld [vmem:[%s10184_s0 + $0x20] sm:$0xff] }
   0xb   :  { %v7137_v26 = vld [vmem:[%s10183_s1 + $0x30] sm:$0xff]   ;;  %v7141_v30 = vld [vmem:[%s10183_s1 + $0x38] sm:$0xff]   ;;  %v53_v34 = vld [vmem:[%s10184_s0 + $0x8] sm:$0xff]  ;;  %v6321_v35 = vcombine.low %v52_v32, %v56_v33  ;;  %v6322_v36 = vcombine.high %v52_v32, %v56_v33 }
   0xc   :  { %6880 = vmatpush3.bf16.msra.mxu0 %v7121_v10  ;;  %v7138_v27 = vld [vmem:[%s10183_s1 + $0xb0] sm:$0xff]   ;;  %v7142_v31 = vld [vmem:[%s10183_s1 + $0xb8] sm:$0xff]   ;;  %v57_v37 = vld [vmem:[%s10184_s0 + $0x28] sm:$0xff] }
   0xd   :  { %6920 = vmatpush3.bf16.msra.mxu1 %v7122_v11  ;;  %6881 = vmatprep.subr.bf16.mxu0 %v7123_v12  ;;  %v6323_v38 = vcombine.low %v53_v34, %v57_v37  ;;  %v6324_v39 = vcombine.high %v53_v34, %v57_v37  ;;  %v7143_v40 = vld [vmem:[%s10183_s1 + $0x140] sm:$0xff]   ;;  %v7147_v44 = vld [vmem:[%s10183_s1 + $0x148] sm:$0xff]   ;;  %v7151_v56 = vld [vmem:[%s10183_s1 + $0x150] sm:$0xff]  }
   0xe   :  { %6921 = vmatprep.subr.bf16.mxu1 %v7124_v13  ;;  %795 = vmatprep.mubr.bf16.mxu0 %v6322_v36  ;;  %v7144_v41 = vld [vmem:[%s10183_s1 + $0x1c0] sm:$0xff]   ;;  %v7148_v45 = vld [vmem:[%s10183_s1 + $0x1c8] sm:$0xff]   ;;  %v7152_v57 = vld [vmem:[%s10183_s1 + $0x1d0] sm:$0xff]  }
   0xf   :  { %860 = vmatprep.mubr.bf16.mxu1 %v6324_v39  ;;  %v7145_v42 = vld [vmem:[%s10183_s1 + $0x100] sm:$0xff]   ;;  %v7149_v46 = vld [vmem:[%s10183_s1 + $0x108] sm:$0xff]   ;;  %v7153_v58 = vld [vmem:[%s10183_s1 + $0x110] sm:$0xff]  }
  0x10   :  { %6882 = vmatpush3.bf16.msra.mxu0 %v7125_v14  ;;  %v7146_v43 = vld [vmem:[%s10183_s1 + $0x180] sm:$0xff]   ;;  %v7150_v47 = vld [vmem:[%s10183_s1 + $0x188] sm:$0xff]   ;;  %v7154_v59 = vld [vmem:[%s10183_s1 + $0x190] sm:$0xff]  }
  0x11   :  { %6922 = vmatpush3.bf16.msra.mxu1 %v7126_v15  ;;  %6883 = vmatprep.subr.bf16.mxu0 %v7127_v16  ;;  %v60_v48 = vld [vmem:[%s10184_s0 + $0x40] sm:$0xff]  ;;  %v61_v51 = vld [vmem:[%s10184_s0 + $0x48] sm:$0xff]  ;;  %v7155_v60 = vld [vmem:[%s10183_s1 + $0x158] sm:$0xff]  }
  0x12   :  { %6923 = vmatprep.subr.bf16.mxu1 %v7128_v17  ;;  %v64_v49 = vld [vmem:[%s10184_s0 + $0x60] sm:$0xff]  ;;  %v65_v52 = vld [vmem:[%s10184_s0 + $0x68] sm:$0xff]  ;;  %v7156_v61 = vld [vmem:[%s10183_s1 + $0x1d8] sm:$0xff]  }
  0x13   :  { %v6330_v50 = vcombine.high %v60_v48, %v64_v49  ;;  %v6329_v53 = vcombine.low %v60_v48, %v64_v49  ;;  %v6332_v54 = vcombine.high %v61_v51, %v65_v52  ;;  %v6331_v55 = vcombine.low %v61_v51, %v65_v52  ;;  %v7157_v62 = vld [vmem:[%s10183_s1 + $0x118] sm:$0xff]   ;;  %v68_v0 = vld [vmem:[%s10184_s0 + $0x80] sm:$0xff]  ;;  %v69_v2 = vld [vmem:[%s10184_s0 + $0x88] sm:$0xff] }
  0x14   :  { %6884 = vmatpush3.bf16.msra.mxu0 %v7129_v18  ;;  %v7158_v63 = vld [vmem:[%s10183_s1 + $0x198] sm:$0xff]   ;;  %v72_v1 = vld [vmem:[%s10184_s0 + $0xa0] sm:$0xff]  ;;  %v73_v3 = vld [vmem:[%s10184_s0 + $0xa8] sm:$0xff] }
  0x15   :  { %6924 = vmatpush3.bf16.msra.mxu1 %v7130_v19  ;;  %6885 = vmatprep.subr.bf16.mxu0 %v7131_v20  ;;  %v6338_v4 = vcombine.high %v68_v0, %v72_v1  ;;  %v6340_v5 = vcombine.high %v69_v2, %v73_v3  ;;  %v6337_v6 = vcombine.low %v68_v0, %v72_v1  ;;  %v7159_v8 = vld [vmem:[%s10183_s1 + $0x160] sm:$0xff]   ;;  %v7163_v12 = vld [vmem:[%s10183_s1 + $0x168] sm:$0xff]   ;;  %v54_v32 = vld [vmem:[%s10184_s0 + $0x10] sm:$0xff] }
  0x16   :  { %6925 = vmatprep.subr.bf16.mxu1 %v7132_v21  ;;  %v6339_v7 = vcombine.low %v69_v2, %v73_v3  ;;  %v7160_v9 = vld [vmem:[%s10183_s1 + $0x1e0] sm:$0xff]   ;;  %v7164_v13 = vld [vmem:[%s10183_s1 + $0x1e8] sm:$0xff]   ;;  %v58_v33 = vld [vmem:[%s10184_s0 + $0x30] sm:$0xff] }
  0x17   :  { %v7161_v10 = vld [vmem:[%s10183_s1 + $0x120] sm:$0xff]   ;;  %v7165_v14 = vld [vmem:[%s10183_s1 + $0x128] sm:$0xff]   ;;  %v6325_v34 = vcombine.low %v54_v32, %v58_v33  ;;  %v55_v36 = vld [vmem:[%s10184_s0 + $0x18] sm:$0xff] }
  0x18   :  { %6886 = vmatpush3.bf16.msra.mxu0 %v7133_v22  ;;  %v7162_v11 = vld [vmem:[%s10183_s1 + $0x1a0] sm:$0xff]   ;;  %v7166_v15 = vld [vmem:[%s10183_s1 + $0x1a8] sm:$0xff]   ;;  %v59_v37 = vld [vmem:[%s10184_s0 + $0x38] sm:$0xff] }
  0x19   :  { %6926 = vmatpush3.bf16.msra.mxu1 %v7134_v23  ;;  %6887 = vmatprep.subr.bf16.mxu0 %v7135_v24  ;;  %v76_v16 = vld [vmem:[%s10184_s0 + $0xc0] sm:$0xff]  ;;  %v77_v18 = vld [vmem:[%s10184_s0 + $0xc8] sm:$0xff]  ;;  %v7167_v24 = vld [vmem:[%s10183_s1 + $0x170] sm:$0xff]   ;;  %v6327_v39 = vcombine.low %v55_v36, %v59_v37 }
  0x1a   :  { %6927 = vmatprep.subr.bf16.mxu1 %v7136_v25  ;;  %v80_v17 = vld [vmem:[%s10184_s0 + $0xe0] sm:$0xff]  ;;  %v81_v20 = vld [vmem:[%s10184_s0 + $0xe8] sm:$0xff]  ;;  %v7168_v25 = vld [vmem:[%s10183_s1 + $0x1f0] sm:$0xff]  }
  0x1b   :  { %v6346_v19 = vcombine.high %v76_v16, %v80_v17  ;;  %v6345_v21 = vcombine.low %v76_v16, %v80_v17  ;;  %v6348_v22 = vcombine.high %v77_v18, %v81_v20  ;;  %v6347_v23 = vcombine.low %v77_v18, %v81_v20  ;;  %v71_v48 = vld [vmem:[%s10184_s0 + $0x98] sm:$0xff]  ;;  %v7177_v0 = vld [vmem:[%s10185_s3 + $0x4] ss:$16 sps:$4 sm:$0xff]   ;;  %v7175_v1 = vld [vmem:[%s10185_s3] ss:$16 sps:$4 sm:$0xff]  }
  0x1c   :  { %6888 = vmatpush3.bf16.msra.mxu0 %v7137_v26  ;;  %v7169_v26 = vld [vmem:[%s10183_s1 + $0x130] sm:$0xff]   ;;  %v75_v49 = vld [vmem:[%s10184_s0 + $0xb8] sm:$0xff] }
  0x1d   :  { %6928 = vmatpush3.bf16.msra.mxu1 %v7138_v27  ;;  %6889 = vmatprep.subr.bf16.mxu0 %v7139_v28  ;;  %v7170_v27 = vld [vmem:[%s10183_s1 + $0x1b0] sm:$0xff]   ;;  %v7171_v28 = vld [vmem:[%s10183_s1 + $0x178] sm:$0xff]  }
  0x1e   :  { %6929 = vmatprep.subr.bf16.mxu1 %v7140_v29  ;;  %v7172_v29 = vld [vmem:[%s10183_s1 + $0x1f8] sm:$0xff]   ;;  %v7201_v16 = vld [vmem:[%s10185_s3 + $0x84] ss:$16 sps:$4 sm:$0xff]   ;;  %v7199_v18 = vld [vmem:[%s10185_s3 + $0x80] ss:$16 sps:$4 sm:$0xff]  }
  0x1f   :  { %v7178_v2 = vld [vmem:[%s10185_s3 + $0x8] ss:$16 sps:$4 sm:$0xff]   ;;  %v7180_v3 = vld [vmem:[%s10185_s3 + $0xc] ss:$16 sps:$4 sm:$0xff]   ;;  %v7207_v20 = vld [vmem:[%s10185_s3 + $0xa4] ss:$16 sps:$4 sm:$0xff]  }
  0x20   :  { %6890 = vmatpush3.bf16.msra.mxu0 %v7141_v30  ;;  %v7173_v30 = vld [vmem:[%s10183_s1 + $0x138] sm:$0xff]  }
  0x21   :  { %6930 = vmatpush3.bf16.msra.mxu1 %v7142_v31  ;;  %6955 = vmatprep.subr.bf16.mxu0 %v7143_v40  ;;  %v7174_v31 = vld [vmem:[%s10183_s1 + $0x1b8] sm:$0xff]   ;;  %v6328_v40 = vcombine.high %v55_v36, %v59_v37  ;;  %v6320_v37 = vld [vmem:[%s10187_s2] ss:$0 sm:$0xff] }
  0x22   :  { %6995 = vmatprep.subr.bf16.mxu1 %v7144_v41  ;;  %v66_v41 = vld [vmem:[%s10184_s0 + $0x70] sm:$0xff]  ;;  %v7204_v17 = vld [vmem:[%s10185_s3 + $0x8c] ss:$16 sps:$4 sm:$0xff]  }
  0x23   :  { %796 = vmatmul.mubr.bf16.vlgmr.msra.gmra.mrb[0].mxu0 %v6321_v35  ;;  %v6326_v35 = vcombine.high %v54_v32, %v58_v33  ;;  %v8225_v32 = vld [vmem:[%s10186_s4 + $0x4] ss:$16 sps:$4 sm:$0xff]   ;;  %v10199_v33 = vmov 0  }
  0x24   :  { %861 = vmatmul.mubr.bf16.vlgmr.msra.gmra.mrb[0].mxu1 %v6323_v38  ;;  %6956 = vmatpush3.bf16.msra.mxu0 %v7145_v42  ;;  %v62_v38 = vld [vmem:[%s10184_s0 + $0x50] sm:$0xff]  ;;  %v63_v42 = vld [vmem:[%s10184_s0 + $0x58] sm:$0xff] }
  0x25   :  { %6996 = vmatpush3.bf16.msra.mxu1 %v7146_v43  ;;  %6957 = vmatprep.subr.bf16.mxu0 %v7147_v44  ;;  %v67_v43 = vld [vmem:[%s10184_s0 + $0x78] sm:$0xff]  ;;  %v6334_v44 = vcombine.high %v62_v38, %v66_v41 }
  0x26   :  { %6997 = vmatprep.subr.bf16.mxu1 %v7148_v45  ;;  %803 = vmatprep.mubr.bf16.mxu0 %v6330_v50  ;;  %v6336_v45 = vcombine.high %v63_v42, %v67_v43  ;;  %v6333_v50 = vcombine.low %v62_v38, %v66_v41  ;;  %v6335_v51 = vcombine.low %v63_v42, %v67_v43 }
  0x27   :  { %868 = vmatprep.mubr.bf16.mxu1 %v6332_v54  ;;  %v78_v54 = vld [vmem:[%s10184_s0 + $0xd0] sm:$0xff] }
  0x28   :  { %6958 = vmatpush3.bf16.msra.mxu0 %v7149_v46  ;;  %v70_v46 = vld [vmem:[%s10184_s0 + $0x90] sm:$0xff] }
  0x29   :  { %6998 = vmatpush3.bf16.msra.mxu1 %v7150_v47  ;;  %6959 = vmatprep.subr.bf16.mxu0 %v7151_v56  ;;  %v74_v47 = vld [vmem:[%s10184_s0 + $0xb0] sm:$0xff]  ;;  %v79_v56 = vld [vmem:[%s10184_s0 + $0xd8] sm:$0xff] }
  0x2a   :  { %6999 = vmatprep.subr.bf16.mxu1 %v7152_v57  ;;  %v6342_v52 = vcombine.high %v70_v46, %v74_v47  ;;  %v83_v57 = vld [vmem:[%s10184_s0 + $0xf8] sm:$0xff] }
  0x2b   :  { %804 = vmatmul.mubr.bf16.gmra.mrb[4].mxu0 %v6329_v53  ;;  %v6344_v53 = vcombine.high %v71_v48, %v75_v49 }
  0x2c   :  { %869 = vmatmul.mubr.bf16.gmra.mrb[4].mxu1 %v6331_v55  ;;  %6960 = vmatpush3.bf16.msra.mxu0 %v7153_v58  ;;  %v82_v55 = vld [vmem:[%s10184_s0 + $0xf0] sm:$0xff]  ;;  %v6341_v58 = vcombine.low %v70_v46, %v74_v47 }
  0x2d   :  { %7000 = vmatpush3.bf16.msra.mxu1 %v7154_v59  ;;  %6961 = vmatprep.subr.bf16.mxu0 %v7155_v60  ;;  %v6343_v59 = vcombine.low %v71_v48, %v75_v49  ;;  %v6350_v60 = vcombine.high %v78_v54, %v82_v55 }
  0x2e   :  { %7001 = vmatprep.subr.bf16.mxu1 %v7156_v61  ;;  %811 = vmatprep.mubr.bf16.mxu0 %v6338_v4  ;;  %v6352_v61 = vcombine.high %v79_v56, %v83_v57  ;;  %v7181_v4 = vld [vmem:[%s10185_s3 + $0x20] ss:$16 sps:$4 sm:$0xff]  }
  0x2f   :  { %876 = vmatprep.mubr.bf16.mxu1 %v6340_v5  ;;  %v7183_v5 = vld [vmem:[%s10185_s3 + $0x24] ss:$16 sps:$4 sm:$0xff]  }
  0x30   :  { %6962 = vmatpush3.bf16.msra.mxu0 %v7157_v62  ;;  %v6349_v62 = vcombine.low %v78_v54, %v82_v55 }
  0x31   :  { %7002 = vmatpush3.bf16.msra.mxu1 %v7158_v63  ;;  %6963 = vmatprep.subr.bf16.mxu0 %v7159_v8  ;;  %v6351_v63 = vcombine.low %v79_v56, %v83_v57  ;;  %v7189_v8 = vld [vmem:[%s10185_s3 + $0x44] ss:$16 sps:$4 sm:$0xff]  }
  0x32   :  { %7003 = vmatprep.subr.bf16.mxu1 %v7160_v9  ;;  %v7192_v9 = vld [vmem:[%s10185_s3 + $0x4c] ss:$16 sps:$4 sm:$0xff]  }
  0x33   :  { %812 = vmatmul.mubr.bf16.gmra.mrb[8].mxu0 %v6337_v6  ;;  %v7184_v6 = vld [vmem:[%s10185_s3 + $0x28] ss:$16 sps:$4 sm:$0xff]  }
  0x34   :  { %877 = vmatmul.mubr.bf16.gmra.mrb[8].mxu1 %v6339_v7  ;;  %6964 = vmatpush3.bf16.msra.mxu0 %v7161_v10  ;;  %v7186_v7 = vld [vmem:[%s10185_s3 + $0x2c] ss:$16 sps:$4 sm:$0xff]   ;;  %v7187_v10 = vld [vmem:[%s10185_s3 + $0x40] ss:$16 sps:$4 sm:$0xff]  }
  0x35   :  { %7004 = vmatpush3.bf16.msra.mxu1 %v7162_v11  ;;  %6965 = vmatprep.subr.bf16.mxu0 %v7163_v12  ;;  %v7190_v11 = vld [vmem:[%s10185_s3 + $0x48] ss:$16 sps:$4 sm:$0xff]   ;;  %v7195_v12 = vld [vmem:[%s10185_s3 + $0x64] ss:$16 sps:$4 sm:$0xff]  }
  0x36   :  { %7005 = vmatprep.subr.bf16.mxu1 %v7164_v13  ;;  %819 = vmatprep.mubr.bf16.mxu0 %v6346_v19  ;;  %v7198_v13 = vld [vmem:[%s10185_s3 + $0x6c] ss:$16 sps:$4 sm:$0xff]   ;;  %v7202_v19 = vld [vmem:[%s10185_s3 + $0x88] ss:$16 sps:$4 sm:$0xff]  }
  0x37   :  { %884 = vmatprep.mubr.bf16.mxu1 %v6348_v22  ;;  %v7205_v22 = vld [vmem:[%s10185_s3 + $0xa0] ss:$16 sps:$4 sm:$0xff]  }
  0x38   :  { %6966 = vmatpush3.bf16.msra.mxu0 %v7165_v14  ;;  %v7193_v14 = vld [vmem:[%s10185_s3 + $0x60] ss:$16 sps:$4 sm:$0xff]  }
  0x39   :  { %7006 = vmatpush3.bf16.msra.mxu1 %v7166_v15  ;;  %6967 = vmatprep.subr.bf16.mxu0 %v7167_v24  ;;  %v7196_v15 = vld [vmem:[%s10185_s3 + $0x68] ss:$16 sps:$4 sm:$0xff]   ;;  %v7213_v24 = vld [vmem:[%s10185_s3 + $0xc4] ss:$16 sps:$4 sm:$0xff]  }
  0x3a   :  { %7007 = vmatprep.subr.bf16.mxu1 %v7168_v25  ;;  %v7216_v25 = vld [vmem:[%s10185_s3 + $0xcc] ss:$16 sps:$4 sm:$0xff]  }
  0x3b   :  { %820 = vmatmul.mubr.bf16.gmra.mrb[12].mxu0 %v6345_v21  ;;  %v7210_v21 = vld [vmem:[%s10185_s3 + $0xac] ss:$16 sps:$4 sm:$0xff]  }
  0x3c   :  { %885 = vmatmul.mubr.bf16.gmra.mrb[12].mxu1 %v6347_v23  ;;  %6968 = vmatpush3.bf16.msra.mxu0 %v7169_v26  ;;  %v7208_v23 = vld [vmem:[%s10185_s3 + $0xa8] ss:$16 sps:$4 sm:$0xff]   ;;  %v7211_v26 = vld [vmem:[%s10185_s3 + $0xc0] ss:$16 sps:$4 sm:$0xff]  }
  0x3d   :  { %7008 = vmatpush3.bf16.msra.mxu1 %v7170_v27  ;;  %6969 = vmatprep.subr.bf16.mxu0 %v7171_v28  ;;  %v7214_v27 = vld [vmem:[%s10185_s3 + $0xc8] ss:$16 sps:$4 sm:$0xff]   ;;  %v7219_v28 = vld [vmem:[%s10185_s3 + $0xe4] ss:$16 sps:$4 sm:$0xff]  }
  0x3e   :  { %7009 = vmatprep.subr.bf16.mxu1 %v7172_v29  ;;  %925 = vmatprep.mubr.bf16.mxu0 %v6326_v35  ;;  %v7222_v29 = vld [vmem:[%s10185_s3 + $0xec] ss:$16 sps:$4 sm:$0xff]  }
  0x3f   :  { %990 = vmatprep.mubr.bf16.mxu1 %v6328_v40 }
  0x40   :  { %6970 = vmatpush3.bf16.msra.mxu0 %v7173_v30  ;;  %v7217_v30 = vld [vmem:[%s10185_s3 + $0xe0] ss:$16 sps:$4 sm:$0xff]  }
  0x41   :  { %7010 = vmatpush3.bf16.msra.mxu1 %v7174_v31  ;;  %1262 = vmatprep.subr.bf16.mxu0 %v7177_v0  ;;  %v7220_v31 = vld [vmem:[%s10185_s3 + $0xe8] ss:$16 sps:$4 sm:$0xff]  }
  0x42   :  { %1335 = vmatprep.subr.bf16.mxu1 %v7180_v3 }
  0x43   :  { %926 = vmatmul.mubr.bf16.vlgmr.msra.gmra.mrb[16].mxu0 %v6325_v34  ;;  %v8233_v34 = vld [vmem:[%s10186_s4 + $0xc] ss:$16 sps:$4 sm:$0xff]  }
  0x44   :  { %991 = vmatmul.mubr.bf16.vlgmr.msra.gmra.mrb[16].mxu1 %v6327_v39  ;;  %933 = vmatprep.mubr.bf16.mxu0 %v6334_v44 }
  0x45   :  { %998 = vmatprep.mubr.bf16.mxu1 %v6336_v45  ;;  %1263 = vmatpush1.bf16.msra.mxu0 %v7175_v1 }
  0x46   :  { %1336 = vmatpush1.bf16.msra.mxu1 %v7178_v2  ;;  %1264 = vmatprep.subr.bf16.mxu0 %v7183_v5 }
  0x47   :  { %1337 = vmatprep.subr.bf16.mxu1 %v7186_v7 }
  0x49   :  { %1265 = vmatpush1.bf16.msra.mxu0 %v7181_v4 }
  0x4a   :  { %1338 = vmatpush1.bf16.msra.mxu1 %v7184_v6  ;;  %1266 = vmatprep.subr.bf16.mxu0 %v7189_v8 }
  0x4b   :  { %934 = vmatmul.mubr.bf16.gmra.mrb[20].mxu0 %v6333_v50  ;;  %1339 = vmatprep.subr.bf16.mxu1 %v7192_v9 }
  0x4c   :  { %999 = vmatmul.mubr.bf16.gmra.mrb[20].mxu1 %v6335_v51  ;;  %941 = vmatprep.mubr.bf16.mxu0 %v6342_v52 }
  0x4d   :  { %1006 = vmatprep.mubr.bf16.mxu1 %v6344_v53  ;;  %1267 = vmatpush1.bf16.msra.mxu0 %v7187_v10 }
  0x4e   :  { %1340 = vmatpush1.bf16.msra.mxu1 %v7190_v11  ;;  %1268 = vmatprep.subr.bf16.mxu0 %v7195_v12 }
  0x4f   :  { %1341 = vmatprep.subr.bf16.mxu1 %v7198_v13 }
  0x51   :  { %1269 = vmatpush1.bf16.msra.mxu0 %v7193_v14 }
  0x52   :  { %1342 = vmatpush1.bf16.msra.mxu1 %v7196_v15  ;;  %1270 = vmatprep.subr.bf16.mxu0 %v7201_v16 }
  0x53   :  { %942 = vmatmul.mubr.bf16.gmra.mrb[24].mxu0 %v6341_v58  ;;  %1343 = vmatprep.subr.bf16.mxu1 %v7204_v17 }
  0x54   :  { %1007 = vmatmul.mubr.bf16.gmra.mrb[24].mxu1 %v6343_v59  ;;  %949 = vmatprep.mubr.bf16.mxu0 %v6350_v60 }
  0x55   :  { %1014 = vmatprep.mubr.bf16.mxu1 %v6352_v61  ;;  %1271 = vmatpush1.bf16.msra.mxu0 %v7199_v18 }
  0x56   :  { %1344 = vmatpush1.bf16.msra.mxu1 %v7202_v19  ;;  %1272 = vmatprep.subr.bf16.mxu0 %v7207_v20 }
  0x57   :  { %1345 = vmatprep.subr.bf16.mxu1 %v7210_v21 }
  0x59   :  { %1273 = vmatpush1.bf16.msra.mxu0 %v7205_v22 }
  0x5a   :  { %1346 = vmatpush1.bf16.msra.mxu1 %v7208_v23  ;;  %1274 = vmatprep.subr.bf16.mxu0 %v7213_v24 }
  0x5b   :  { %950 = vmatmul.mubr.bf16.gmra.mrb[28].mxu0 %v6349_v62  ;;  %1347 = vmatprep.subr.bf16.mxu1 %v7216_v25 }
  0x5c   :  { %1015 = vmatmul.mubr.bf16.gmra.mrb[28].mxu1 %v6351_v63  ;;  %1294 = vmatprep.mubr.bf16.mxu0 %v10199_v33 }
  0x5d   :  { %1275 = vmatpush1.bf16.msra.mxu0 %v7211_v26  ;;  %1367 = vmatprep.mubr.bf16.mxu1 %v10199_v33 }
  0x5e   :  { %1348 = vmatpush1.bf16.msra.mxu1 %v7214_v27  ;;  %1276 = vmatprep.subr.bf16.mxu0 %v7219_v28 }
  0x5f   :  { %1349 = vmatprep.subr.bf16.mxu1 %v7222_v29 }
  0x61   :  { %1277 = vmatpush1.bf16.msra.mxu0 %v7217_v30 }
  0x62   :  { %1350 = vmatpush1.bf16.msra.mxu1 %v7220_v31  ;;  %1639 = vmatprep.subr.bf16.mxu0 %v8225_v32 }
  0x63   :  { %1680 = vmatprep.subr.bf16.mxu1 %v8233_v34 }
  0xf6   :  { %v6891_v35 = vpop.f32.mrb[0].mxu0 }
  0xf7   :  { %v6931_v36 = vpop.f32.mrb[0].mxu1  ;;  %v6892_v38 = vpop.f32.mrb[1].mxu0 }
  0xf8   :  { %v6893_v39 = vadd.f32 %v6892_v38, %v6891_v35  ;;  %v6932_v40 = vpop.f32.mrb[1].mxu1  ;;  %v6894_v41 = vpop.f32.mrb[2].mxu0 }
  0xf9   :  { %v6933_v42 = vadd.f32 %v6932_v40, %v6931_v36  ;;  %v6934_v43 = vpop.f32.mrb[2].mxu1  ;;  %v6895_v44 = vpop.f32.mrb[3].mxu0 }
  0xfa   :  { %v798_v45 = vadd.f32 %v6893_v39, %v6320_v37  ;;  %v6896_v46 = vadd.f32 %v6895_v44, %v6894_v41  ;;  %v6935_v47 = vpop.f32.mrb[3].mxu1 }
  0xfb   :  { %v6936_v48 = vadd.f32 %v6935_v47, %v6934_v43 }
  0xfc   :  { %v863_v49 = vadd.f32 %v6933_v42, %v798_v45  ;;  %v801_v50 = vadd.f32 %v6896_v46, %v6320_v37 }
  0xfe   :  { %v8239_v51 = vadd.f32 %v6936_v48, %v801_v50  ;;  %v6897_v52 = vpop.f32.mrb[4].mxu0 }
  0xff   :  { %v6937_v53 = vpop.f32.mrb[4].mxu1  ;;  %v6898_v54 = vpop.f32.mrb[5].mxu0 }
 0x100   :  { %v6899_v55 = vadd.f32 %v6898_v54, %v6897_v52  ;;  %v6938_v56 = vpop.f32.mrb[5].mxu1  ;;  %v6900_v57 = vpop.f32.mrb[6].mxu0 }
 0x101   :  { %v6939_v58 = vadd.f32 %v6938_v56, %v6937_v53  ;;  %v6940_v59 = vpop.f32.mrb[6].mxu1  ;;  %v6901_v60 = vpop.f32.mrb[7].mxu0 }
 0x102   :  { %v806_v61 = vadd.f32 %v6899_v55, %v6320_v37  ;;  %v6902_v62 = vadd.f32 %v6901_v60, %v6900_v57  ;;  %v6941_v63 = vpop.f32.mrb[7].mxu1  ;;  %v8257_v60 = vld [vmem:[%s10186_s4] ss:$16 sps:$4 sm:$0xff]  }
 0x103   :  { %v6942_v0 = vadd.f32 %v6941_v63, %v6940_v59 }
 0x104   :  { %v8241_v1 = vadd.f32 %v6939_v58, %v806_v61  ;;  %v809_v2 = vadd.f32 %v6902_v62, %v6320_v37  ;;  %v8262_v61 = vld [vmem:[%s10186_s4 + $0x8] ss:$16 sps:$4 sm:$0xff]  }
 0x106   :  { %v8243_v3 = vadd.f32 %v6942_v0, %v809_v2  ;;  %v6903_v4 = vpop.f32.mrb[8].mxu0  ;;  %v8272_v2 = vld [vmem:[%s10186_s4 + $0x2c] ss:$16 sps:$4 sm:$0xff]  }
 0x107   :  { %v6943_v5 = vpop.f32.mrb[8].mxu1  ;;  %v6904_v6 = vpop.f32.mrb[9].mxu0 }
 0x108   :  { %v6944_v7 = vpop.f32.mrb[9].mxu1  ;;  %v6905_v8 = vadd.f32 %v6904_v6, %v6903_v4  ;;  %v6906_v10 = vpop.f32.mrb[10].mxu0 }
 0x109   :  { %v6945_v9 = vadd.f32 %v6944_v7, %v6943_v5  ;;  %v6946_v11 = vpop.f32.mrb[10].mxu1  ;;  %v6907_v12 = vpop.f32.mrb[11].mxu0 }
 0x10a   :  { %v6947_v13 = vpop.f32.mrb[11].mxu1  ;;  %v814_v14 = vadd.f32 %v6905_v8, %v6320_v37  ;;  %v6908_v15 = vadd.f32 %v6907_v12, %v6906_v10  ;;  %v8285_v12 = vld [vmem:[%s10186_s4 + $0x28] ss:$16 sps:$4 sm:$0xff]  }
 0x10b   :  { %v6948_v16 = vadd.f32 %v6947_v13, %v6946_v11  ;;  %v8280_v11 = vld [vmem:[%s10186_s4 + $0x20] ss:$16 sps:$4 sm:$0xff]  }
 0x10c   :  { %v8245_v17 = vadd.f32 %v6945_v9, %v814_v14  ;;  %v817_v18 = vadd.f32 %v6908_v15, %v6320_v37  ;;  %v8293_v14 = vld [vmem:[%s10186_s4 + $0x44] ss:$16 sps:$4 sm:$0xff]   ;;  %v8298_v15 = vld [vmem:[%s10186_s4 + $0x4c] ss:$16 sps:$4 sm:$0xff]  }
 0x10e   :  { %v8247_v19 = vadd.f32 %v6948_v16, %v817_v18  ;;  %v6909_v20 = vpop.f32.mrb[12].mxu0 }
 0x10f   :  { %v6949_v21 = vpop.f32.mrb[12].mxu1  ;;  %v6910_v22 = vpop.f32.mrb[13].mxu0 }
 0x110   :  { %v6911_v23 = vadd.f32 %v6910_v22, %v6909_v20  ;;  %v6950_v24 = vpop.f32.mrb[13].mxu1  ;;  %v6912_v25 = vpop.f32.mrb[14].mxu0  ;;  %v8312_v22 = vld [vmem:[%s10186_s4 + $0x48] ss:$16 sps:$4 sm:$0xff]  }
 0x111   :  { %v6951_v26 = vadd.f32 %v6950_v24, %v6949_v21  ;;  %v6952_v27 = vpop.f32.mrb[14].mxu1  ;;  %v6913_v28 = vpop.f32.mrb[15].mxu0  ;;  %v8307_v21 = vld [vmem:[%s10186_s4 + $0x40] ss:$16 sps:$4 sm:$0xff]  }
 0x112   :  { %v822_v29 = vadd.f32 %v6911_v23, %v6320_v37  ;;  %v6914_v30 = vadd.f32 %v6913_v28, %v6912_v25  ;;  %v6953_v31 = vpop.f32.mrb[15].mxu1  ;;  %v8324_v28 = vld [vmem:[%s10186_s4 + $0x6c] ss:$16 sps:$4 sm:$0xff]  }
 0x113   :  { %v6954_v35 = vadd.f32 %v6953_v31, %v6952_v27  ;;  %v8319_v27 = vld [vmem:[%s10186_s4 + $0x64] ss:$16 sps:$4 sm:$0xff]  }
 0x114   :  { %v8249_v36 = vadd.f32 %v6951_v26, %v822_v29  ;;  %v825_v38 = vadd.f32 %v6914_v30, %v6320_v37 }
 0x116   :  { %v8251_v39 = vadd.f32 %v6954_v35, %v825_v38  ;;  %v6971_v40 = vpop.f32.mrb[16].mxu0 }
 0x117   :  { %v7011_v41 = vpop.f32.mrb[16].mxu1  ;;  %v6972_v42 = vpop.f32.mrb[17].mxu0 }
 0x118   :  { %v6973_v43 = vadd.f32 %v6972_v42, %v6971_v40  ;;  %v7012_v44 = vpop.f32.mrb[17].mxu1  ;;  %v6974_v45 = vpop.f32.mrb[18].mxu0  ;;  %v8332_v42 = vld [vmem:[%s10186_s4 + $0x60] ss:$16 sps:$4 sm:$0xff]  }
 0x119   :  { %v7013_v46 = vadd.f32 %v7012_v44, %v7011_v41  ;;  %v7014_v47 = vpop.f32.mrb[18].mxu1  ;;  %v6975_v48 = vpop.f32.mrb[19].mxu0 }
 0x11a   :  { %v928_v50 = vadd.f32 %v6973_v43, %v863_v49  ;;  %v6976_v52 = vadd.f32 %v6975_v48, %v6974_v45  ;;  %v7015_v53 = vpop.f32.mrb[19].mxu1  ;;  %v8337_v43 = vld [vmem:[%s10186_s4 + $0x68] ss:$16 sps:$4 sm:$0xff]   ;;  %v8345_v45 = vld [vmem:[%s10186_s4 + $0x84] ss:$16 sps:$4 sm:$0xff]  }
 0x11b   :  { %v7016_v54 = vadd.f32 %v7015_v53, %v7014_v47  ;;  %v8364_v53 = vld [vmem:[%s10186_s4 + $0x88] ss:$16 sps:$4 sm:$0xff]  }
 0x11c   :  { %v993_v55 = vadd.f32 %v7013_v46, %v928_v50  ;;  %v931_v56 = vadd.f32 %v6976_v52, %v8239_v51  ;;  %v8267_v51 = vld [vmem:[%s10186_s4 + $0x24] ss:$16 sps:$4 sm:$0xff]   ;;  %v8350_v46 = vld [vmem:[%s10186_s4 + $0x8c] ss:$16 sps:$4 sm:$0xff]   ;;  %v8359_v52 = vld [vmem:[%s10186_s4 + $0x80] ss:$16 sps:$4 sm:$0xff]  }
 0x11e   :  { %v996_v57 = vadd.f32 %v7016_v54, %v931_v56  ;;  %v6977_v37 = vpop.f32.mrb[20].mxu0 }
 0x11f   :  { %v7017_v58 = vpop.f32.mrb[20].mxu1  ;;  %v6978_v59 = vpop.f32.mrb[21].mxu0 }
 0x120   :  { %v1044_v49 = vpack.c.bf16 %v996_v57, %v993_v55  ;;  %v6979_v62 = vadd.f32 %v6978_v59, %v6977_v37  ;;  %v7018_v63 = vpop.f32.mrb[21].mxu1  ;;  %v6980_v0 = vpop.f32.mrb[22].mxu0  ;;  %v8371_v37 = vld [vmem:[%s10186_s4 + $0xa4] ss:$16 sps:$4 sm:$0xff]  }
 0x121   :  { %v7019_v4 = vadd.f32 %v7018_v63, %v7017_v58  ;;  %v7020_v5 = vpop.f32.mrb[22].mxu1  ;;  %v6981_v6 = vpop.f32.mrb[23].mxu0  ;;  %v8376_v58 = vld [vmem:[%s10186_s4 + $0xac] ss:$16 sps:$4 sm:$0xff]  }
 0x122   :  { %v936_v7 = vadd.f32 %v6979_v62, %v8241_v1  ;;  %v6982_v8 = vadd.f32 %v6981_v6, %v6980_v0  ;;  %v7021_v9 = vpop.f32.mrb[23].mxu1  ;;  %1295 = vmatmul.mubr.bf16.vlgmr.msra.gmra.mrb[32].mxu0 %v1044_v49  ;;  %1368 = vmatmul.mubr.bf16.vlgmr.msra.gmra.mrb[32].mxu1 %v1044_v49  ;;  %v8384_v6 = vld [vmem:[%s10186_s4 + $0xa0] ss:$16 sps:$4 sm:$0xff]  }
 0x123   :  { %v7022_v10 = vadd.f32 %v7021_v9, %v7020_v5  ;;  %1640 = vmatpush1.bf16.msra.mxu0 %v8257_v60  ;;  %1681 = vmatpush1.bf16.msra.mxu1 %v8262_v61  ;;  %v8397_v9 = vld [vmem:[%s10186_s4 + $0xc4] ss:$16 sps:$4 sm:$0xff]  }
 0x124   :  { %v1001_v1 = vadd.f32 %v7019_v4, %v936_v7  ;;  %v939_v13 = vadd.f32 %v6982_v8, %v8243_v3  ;;  %1641 = vmatprep.subr.bf16.mxu0 %v8267_v51  ;;  %1682 = vmatprep.subr.bf16.mxu1 %v8272_v2  ;;  %v8389_v7 = vld [vmem:[%s10186_s4 + $0xa8] ss:$16 sps:$4 sm:$0xff]  }
 0x125   :  { %1304 = vmatprep.mubr.bf16.mxu0 %v10199_v33  ;;  %1377 = vmatprep.mubr.bf16.mxu1 %v10199_v33 }
 0x126   :  { %v1004_v16 = vadd.f32 %v7022_v10, %v939_v13  ;;  %v6983_v3 = vpop.f32.mrb[24].mxu0  ;;  %v8402_v10 = vld [vmem:[%s10186_s4 + $0xcc] ss:$16 sps:$4 sm:$0xff]   ;;  %v8418_v13 = vld [vmem:[%s10186_s4 + $0xc8] ss:$16 sps:$4 sm:$0xff]  }
 0x127   :  { %v7023_v18 = vpop.f32.mrb[24].mxu1  ;;  %v6984_v20 = vpop.f32.mrb[25].mxu0  ;;  %1642 = vmatpush1.bf16.msra.mxu0 %v8280_v11  ;;  %1683 = vmatpush1.bf16.msra.mxu1 %v8285_v12 }
 0x128   :  { %v6985_v23 = vadd.f32 %v6984_v20, %v6983_v3  ;;  %v7024_v24 = vpop.f32.mrb[25].mxu1  ;;  %v6986_v25 = vpop.f32.mrb[26].mxu0  ;;  %v1045_v26 = vpack.c.bf16 %v1004_v16, %v1001_v1  ;;  %1643 = vmatprep.subr.bf16.mxu0 %v8293_v14  ;;  %1684 = vmatprep.subr.bf16.mxu1 %v8298_v15  ;;  %v8426_v3 = vld [vmem:[%s10186_s4 + $0xe4] ss:$16 sps:$4 sm:$0xff]   ;;  %v8438_v20 = vld [vmem:[%s10186_s4 + $0xe0] ss:$16 sps:$4 sm:$0xff]  }
 0x129   :  { %v7025_v29 = vadd.f32 %v7024_v24, %v7023_v18  ;;  %v7026_v30 = vpop.f32.mrb[26].mxu1  ;;  %v6987_v31 = vpop.f32.mrb[27].mxu0  ;;  %v8431_v18 = vld [vmem:[%s10186_s4 + $0xec] ss:$16 sps:$4 sm:$0xff]   ;;  %v1082_v24 = vlaneseq }
 0x12a   :  { %v944_v35 = vadd.f32 %v6985_v23, %v8245_v17  ;;  %v6988_v38 = vadd.f32 %v6987_v31, %v6986_v25  ;;  %v7027_v40 = vpop.f32.mrb[27].mxu1  ;;  %1305 = vmatmul.mubr.bf16.gmra.mrb[36].mxu0 %v1045_v26  ;;  %1378 = vmatmul.mubr.bf16.gmra.mrb[36].mxu1 %v1045_v26  ;;  %v8443_v23 = vld [vmem:[%s10186_s4 + $0xe8] ss:$16 sps:$4 sm:$0xff]  }
 0x12b   :  { %v7028_v41 = vadd.f32 %v7027_v40, %v7026_v30  ;;  %1644 = vmatpush1.bf16.msra.mxu0 %v8307_v21  ;;  %1685 = vmatpush1.bf16.msra.mxu1 %v8312_v22  ;;  %v1083_v25 = vshrl.u32 %v1082_v24, 7  ;;  %v1080_v30 = vld [vmem:[%s10188_s5] sm:$0xf] }
 0x12c   :  { %v1009_v17 = vadd.f32 %v7025_v29, %v944_v35  ;;  %v947_v44 = vadd.f32 %v6988_v38, %v8247_v19  ;;  %1645 = vmatprep.subr.bf16.mxu0 %v8319_v27  ;;  %1686 = vmatprep.subr.bf16.mxu1 %v8324_v28 }
 0x12d   :  { %1314 = vmatprep.mubr.bf16.mxu0 %v10199_v33  ;;  %1387 = vmatprep.mubr.bf16.mxu1 %v10199_v33  ;;  %v8489_v26 = vsub.s32 0, %v1083_v25  ;;  %v8491_v29 = vsub.s32 2, %v1083_v25  ;;  %v8496_v31 = vsub.s32 1, %v1083_v25  ;;  %v8498_v35 = vsub.s32 3, %v1083_v25 }
 0x12e   :  { %v1012_v47 = vadd.f32 %v7028_v41, %v947_v44  ;;  %v6989_v19 = vpop.f32.mrb[28].mxu0 }
 0x12f   :  { %v7029_v48 = vpop.f32.mrb[28].mxu1  ;;  %v6990_v50 = vpop.f32.mrb[29].mxu0  ;;  %1646 = vmatpush1.bf16.msra.mxu0 %v8332_v42  ;;  %1687 = vmatpush1.bf16.msra.mxu1 %v8337_v43  ;;  %10211 = vst [vmem:[#allocation6_spill] sm:$0xff] %v8489_v26  ;;  %10212 = vst [vmem:[#allocation7_spill] sm:$0xff] %v8491_v29  ;;  %v1089_v44 = vrot.slane %v1080_v30, %v8496_v31 }
 0x130   :  { %v6991_v54 = vadd.f32 %v6990_v50, %v6989_v19  ;;  %v7030_v55 = vpop.f32.mrb[29].mxu1  ;;  %v6992_v56 = vpop.f32.mrb[30].mxu0  ;;  %v1046_v57 = vpack.c.bf16 %v1012_v47, %v1009_v17  ;;  %1647 = vmatprep.subr.bf16.mxu0 %v8345_v45  ;;  %1688 = vmatprep.subr.bf16.mxu1 %v8350_v46  ;;  %10213 = vst [vmem:[#allocation8_spill] sm:$0xff] %v8496_v31  ;;  %10214 = vst [vmem:[#allocation9_spill] sm:$0xff] %v8498_v35 }
 0x131   :  { %v7031_v59 = vadd.f32 %v7030_v55, %v7029_v48  ;;  %v7032_v49 = vpop.f32.mrb[30].mxu1  ;;  %v6993_v62 = vpop.f32.mrb[31].mxu0  ;;  %v1097_v47 = vrot.slane %v1080_v30, %v8498_v35 }
 0x132   :  { %v952_v63 = vadd.f32 %v6991_v54, %v8249_v36  ;;  %v6994_v0 = vadd.f32 %v6993_v62, %v6992_v56  ;;  %v7033_v4 = vpop.f32.mrb[31].mxu1  ;;  %1315 = vmatmul.mubr.bf16.gmra.mrb[40].mxu0 %v1046_v57  ;;  %1388 = vmatmul.mubr.bf16.gmra.mrb[40].mxu1 %v1046_v57 }
 0x133   :  { %v7034_v5 = vadd.f32 %v7033_v4, %v7032_v49  ;;  %1648 = vmatpush1.bf16.msra.mxu0 %v8359_v52  ;;  %1689 = vmatpush1.bf16.msra.mxu1 %v8364_v53 }
 0x134   :  { %v1017_v36 = vadd.f32 %v7031_v59, %v952_v63  ;;  %v955_v8 = vadd.f32 %v6994_v0, %v8251_v39  ;;  %1649 = vmatprep.subr.bf16.mxu0 %v8371_v37  ;;  %1690 = vmatprep.subr.bf16.mxu1 %v8376_v58  ;;  %v8413_v39 = vld [vmem:[%s10186_s4 + $0xc0] ss:$16 sps:$4 sm:$0xff]  }
 0x135   :  { %1324 = vmatprep.mubr.bf16.mxu0 %v10199_v33  ;;  %1397 = vmatprep.mubr.bf16.mxu1 %v10199_v33 }
 0x136   :  { %v8406_v1 = vadd.f32 %v7034_v5, %v955_v8 }
 0x137   :  { %1650 = vmatpush1.bf16.msra.mxu0 %v8384_v6  ;;  %1691 = vmatpush1.bf16.msra.mxu1 %v8389_v7 }
 0x138   :  { %10210 = vst [vmem:[#allocation5_spill] sm:$0xff] %v8406_v1  ;;  %v1047_v16 = vpack.c.bf16 %v8406_v1, %v1017_v36  ;;  %1651 = vmatprep.subr.bf16.mxu0 %v8397_v9  ;;  %1692 = vmatprep.subr.bf16.mxu1 %v8402_v10 }
 0x13a   :  { %1325 = vmatmul.mubr.bf16.gmra.mrb[44].mxu0 %v1047_v16  ;;  %1398 = vmatmul.mubr.bf16.gmra.mrb[44].mxu1 %v1047_v16 }
 0x13b   :  { %1652 = vmatpush1.bf16.msra.mxu0 %v8413_v39  ;;  %1693 = vmatpush1.bf16.msra.mxu1 %v8418_v13 }
 0x13c   :  { %1653 = vmatprep.subr.bf16.mxu0 %v8426_v3  ;;  %1694 = vmatprep.subr.bf16.mxu1 %v8431_v18 }
 0x13d   :  { %1671 = vmatprep.mubr.bf16.mxu0 %v10199_v33  ;;  %1712 = vmatprep.mubr.bf16.mxu1 %v10199_v33 }
 0x13f   :  { %1654 = vmatpush1.bf16.msra.mxu0 %v8438_v20  ;;  %1695 = vmatpush1.bf16.msra.mxu1 %v8443_v23 }
 0x140   :  { %1944 = vmatprep.subr.bf16.mxu0 %v8225_v32  ;;  %1985 = vmatprep.subr.bf16.mxu1 %v8233_v34 }
 0x142   :  { %1672 = vmatmul.mubr.bf16.vlgmr.msra.gmra.mrb[48].mxu0 %v10199_v33  ;;  %1713 = vmatmul.mubr.bf16.vlgmr.msra.gmra.mrb[48].mxu1 %v10199_v33 }
 0x143   :  { %1945 = vmatpush1.bf16.msra.mxu0 %v8257_v60  ;;  %1986 = vmatpush1.bf16.msra.mxu1 %v8262_v61 }
 0x144   :  { %1946 = vmatprep.subr.bf16.mxu0 %v8267_v51  ;;  %1987 = vmatprep.subr.bf16.mxu1 %v8272_v2 }
 0x145   :  { %1976 = vmatprep.mubr.bf16.mxu0 %v10199_v33  ;;  %2017 = vmatprep.mubr.bf16.mxu1 %v10199_v33 }
 0x147   :  { %1947 = vmatpush1.bf16.msra.mxu0 %v8280_v11  ;;  %1988 = vmatpush1.bf16.msra.mxu1 %v8285_v12 }
 0x148   :  { %1948 = vmatprep.subr.bf16.mxu0 %v8293_v14  ;;  %1989 = vmatprep.subr.bf16.mxu1 %v8298_v15 }
 0x14b   :  { %1949 = vmatpush1.bf16.msra.mxu0 %v8307_v21  ;;  %1990 = vmatpush1.bf16.msra.mxu1 %v8312_v22 }
 0x14c   :  { %1950 = vmatprep.subr.bf16.mxu0 %v8319_v27  ;;  %1991 = vmatprep.subr.bf16.mxu1 %v8324_v28 }
 0x14f   :  { %1951 = vmatpush1.bf16.msra.mxu0 %v8332_v42  ;;  %1992 = vmatpush1.bf16.msra.mxu1 %v8337_v43 }
 0x150   :  { %1952 = vmatprep.subr.bf16.mxu0 %v8345_v45  ;;  %1993 = vmatprep.subr.bf16.mxu1 %v8350_v46 }
 0x153   :  { %1953 = vmatpush1.bf16.msra.mxu0 %v8359_v52  ;;  %1994 = vmatpush1.bf16.msra.mxu1 %v8364_v53 }
 0x154   :  { %1954 = vmatprep.subr.bf16.mxu0 %v8371_v37  ;;  %1995 = vmatprep.subr.bf16.mxu1 %v8376_v58 }
 0x157   :  { %1955 = vmatpush1.bf16.msra.mxu0 %v8384_v6  ;;  %1996 = vmatpush1.bf16.msra.mxu1 %v8389_v7 }
 0x158   :  { %1956 = vmatprep.subr.bf16.mxu0 %v8397_v9  ;;  %1997 = vmatprep.subr.bf16.mxu1 %v8402_v10 }
 0x15b   :  { %1957 = vmatpush1.bf16.msra.mxu0 %v8413_v39  ;;  %1998 = vmatpush1.bf16.msra.mxu1 %v8418_v13 }
 0x15c   :  { %1958 = vmatprep.subr.bf16.mxu0 %v8426_v3  ;;  %1999 = vmatprep.subr.bf16.mxu1 %v8431_v18 }
 0x15f   :  { %1959 = vmatpush1.bf16.msra.mxu0 %v8438_v20  ;;  %2000 = vmatpush1.bf16.msra.mxu1 %v8443_v23 }
 0x160   :  { %2250 = vmatprep.subr.bf16.mxu0 %v8225_v32  ;;  %2291 = vmatprep.subr.bf16.mxu1 %v8233_v34  ;;  %v1085_v32 = vrot.slane %v1080_v30, %v8489_v26  ;;  %v1093_v34 = vrot.slane %v1080_v30, %v8491_v29 }
 0x1f5   :  { %v8500_v38 = vpop.f32.mrb[32].mxu0  ;;  %v8502_v40 = vpop.f32.mrb[32].mxu1 }
 0x1f6   :  { %v1298_v41 = vpop.f32.mrb[33].mxu0  ;;  %v1371_v17 = vpop.f32.mrb[33].mxu1 }
 0x1f7   :  { %v1300_v19 = vpop.f32.mrb[34].mxu0  ;;  %v1373_v48 = vpop.f32.mrb[34].mxu1 }
 0x1f8   :  { %v8508_v50 = vadd.f32 %v1300_v19, %v1085_v32  ;;  %v8510_v54 = vadd.f32 %v1373_v48, %v1093_v34  ;;  %v1302_v55 = vpop.f32.mrb[35].mxu0  ;;  %v1375_v56 = vpop.f32.mrb[35].mxu1 }
 0x1f9   :  { %v8512_v57 = vadd.f32 %v1302_v55, %v1089_v44  ;;  %v8514_v59 = vadd.f32 %v1375_v56, %v1097_v47 }
 0x1fd   :  { %v1306_v49 = vpop.f32.mrb[36].mxu0  ;;  %v1379_v62 = vpop.f32.mrb[36].mxu1 }
 0x1fe   :  { %v8516_v63 = vadd.f32 %v1306_v49, %v1085_v32  ;;  %v8518_v0 = vadd.f32 %v1379_v62, %v1093_v34  ;;  %v1308_v4 = vpop.f32.mrb[37].mxu0  ;;  %v1381_v5 = vpop.f32.mrb[37].mxu1 }
 0x1ff   :  { %v8520_v36 = vadd.f32 %v1308_v4, %v1089_v44  ;;  %v8522_v8 = vadd.f32 %v1381_v5, %v1097_v47  ;;  %v1310_v16 = vpop.f32.mrb[38].mxu0  ;;  %v1383_v24 = vpop.f32.mrb[38].mxu1 }
 0x200   :  { %v8524_v25 = vadd.f32 %v1310_v16, %v1085_v32  ;;  %v8526_v30 = vadd.f32 %v1383_v24, %v1093_v34  ;;  %v1312_v19 = vpop.f32.mrb[39].mxu0  ;;  %v1385_v48 = vpop.f32.mrb[39].mxu1 }
 0x201   :  { %v8528_v55 = vadd.f32 %v1312_v19, %v1089_v44  ;;  %v8530_v56 = vadd.f32 %v1385_v48, %v1097_v47 }
 0x202   :  { %10215 = vst [vmem:[#allocation10_spill] sm:$0xff] %v8524_v25  ;;  %10216 = vst [vmem:[#allocation11_spill] sm:$0xff] %v8526_v30 }
 0x203   :  { %10217 = vst [vmem:[#allocation12_spill] sm:$0xff] %v8528_v55  ;;  %10218 = vst [vmem:[#allocation13_spill] sm:$0xff] %v8530_v56 }
 0x205   :  { %v1316_v49 = vpop.f32.mrb[40].mxu0  ;;  %v1389_v62 = vpop.f32.mrb[40].mxu1 }
 0x206   :  { %v8532_v33 = vadd.f32 %v1316_v49, %v1085_v32  ;;  %v8534_v4 = vadd.f32 %v1389_v62, %v1093_v34  ;;  %v1318_v5 = vpop.f32.mrb[41].mxu0  ;;  %v1391_v1 = vpop.f32.mrb[41].mxu1 }
 0x207   :  { %v8536_v35 = vadd.f32 %v1318_v5, %v1089_v44  ;;  %v8538_v16 = vadd.f32 %v1391_v1, %v1097_v47  ;;  %v1320_v24 = vpop.f32.mrb[42].mxu0  ;;  %v1393_v31 = vpop.f32.mrb[42].mxu1 }
 0x208   :  { %10219 = vst [vmem:[#allocation14_spill] sm:$0xff] %v8532_v33  ;;  %10220 = vst [vmem:[#allocation15_spill] sm:$0xff] %v8534_v4  ;;  %v8540_v29 = vadd.f32 %v1320_v24, %v1085_v32  ;;  %v8542_v19 = vadd.f32 %v1393_v31, %v1093_v34  ;;  %v1322_v48 = vpop.f32.mrb[43].mxu0  ;;  %v1395_v26 = vpop.f32.mrb[43].mxu1 }
 0x209   :  { %10221 = vst [vmem:[#allocation16_spill] sm:$0xff] %v8536_v35  ;;  %10222 = vst [vmem:[#allocation17_spill] sm:$0xff] %v8538_v16  ;;  %v8544_v56 = vadd.f32 %v1322_v48, %v1089_v44  ;;  %v8546_v49 = vadd.f32 %v1395_v26, %v1097_v47 }
 0x20a   :  { %10223 = vst [vmem:[#allocation18_spill] sm:$0xff] %v8540_v29  ;;  %10224 = vst [vmem:[#allocation19_spill] sm:$0xff] %v8542_v19 }
 0x20b   :  { %10225 = vst [vmem:[#allocation20_spill] sm:$0xff] %v8544_v56  ;;  %10226 = vst [vmem:[#allocation21_spill] sm:$0xff] %v8546_v49 }
 0x20d   :  { %v1326_v62 = vpop.f32.mrb[44].mxu0  ;;  %v1399_v4 = vpop.f32.mrb[44].mxu1 }
 0x20e   :  { %v8548_v33 = vadd.f32 %v1326_v62, %v1085_v32  ;;  %v8550_v5 = vadd.f32 %v1399_v4, %v1093_v34  ;;  %v1328_v1 = vpop.f32.mrb[45].mxu0  ;;  %v1401_v16 = vpop.f32.mrb[45].mxu1  ;;  %v1297_v4 = vadd.f32 %v8500_v38, %v1085_v32 }
 0x20f   :  { %v8552_v35 = vadd.f32 %v1328_v1, %v1089_v44  ;;  %v8554_v24 = vadd.f32 %v1401_v16, %v1097_v47  ;;  %v1330_v31 = vpop.f32.mrb[46].mxu0  ;;  %v1403_v19 = vpop.f32.mrb[46].mxu1  ;;  %v1299_v1 = vadd.f32 %v1298_v41, %v1089_v44 }
 0x210   :  { %10227 = vst [vmem:[#allocation22_spill] sm:$0xff] %v8548_v33  ;;  %10228 = vst [vmem:[#allocation23_spill] sm:$0xff] %v8550_v5  ;;  %v8556_v29 = vadd.f32 %v1330_v31, %v1085_v32  ;;  %v8558_v48 = vadd.f32 %v1403_v19, %v1093_v34  ;;  %v1332_v26 = vpop.f32.mrb[47].mxu0  ;;  %v1405_v49 = vpop.f32.mrb[47].mxu1  ;;  %v1370_v5 = vadd.f32 %v8502_v40, %v1093_v34 }
 0x211   :  { %10229 = vst [vmem:[#allocation24_spill] sm:$0xff] %v8552_v35  ;;  %10230 = vst [vmem:[#allocation25_spill] sm:$0xff] %v8554_v24  ;;  %v8560_v56 = vadd.f32 %v1332_v26, %v1089_v44  ;;  %v8562_v62 = vadd.f32 %v1405_v49, %v1097_v47  ;;  %v1372_v35 = vadd.f32 %v1371_v17, %v1097_v47 }
 0x212   :  { %10231 = vst [vmem:[#allocation26_spill] sm:$0xff] %v8556_v29  ;;  %10232 = vst [vmem:[#allocation27_spill] sm:$0xff] %v8558_v48 }
 0x213   :  { %10233 = vst [vmem:[#allocation28_spill] sm:$0xff] %v8560_v56  ;;  %10234 = vst [vmem:[#allocation29_spill] sm:$0xff] %v8562_v62 }
 0x215   :  { %v1673_v16 = vpop.f32.mrb[48].mxu0  ;;  %v1714_v24 = vpop.f32.mrb[48].mxu1 }
 0x216   :  { %v1721_v33 = vadd.f32 %v1673_v16, %v1297_v4  ;;  %v1723_v55 = vadd.f32 %v1714_v24, %v1370_v5  ;;  %v1675_v31 = vpop.f32.mrb[49].mxu0  ;;  %v1716_v29 = vpop.f32.mrb[49].mxu1 }
 0x217   :  { %v1722_v19 = vadd.f32 %v1675_v31, %v1299_v1  ;;  %v1724_v48 = vadd.f32 %v1716_v29, %v1372_v35  ;;  %v1677_v30 = vpop.f32.mrb[50].mxu0  ;;  %v1718_v25 = vpop.f32.mrb[50].mxu1 }
 0x218   :  { %v1725_v26 = vmul.f32 0.5, %v1721_v33  ;;  %v1678_v56 = vpop.f32.mrb[51].mxu0  ;;  %v1719_v49 = vpop.f32.mrb[51].mxu1 }
 0x219   :  { %v1729_v62 = vmul.f32 0.5, %v1722_v19  ;;  %v1734_v38 = vmul.f32 0.5, %v1724_v48  ;;  %v10235_v48 = vmov 0  }
 0x21a   :  { %7563 = vtanh.f32 %v1725_v26 }
 0x21b   :  { %7565 = vtanh.f32 %v1729_v62 }
 0x21c   :  { %7567 = vtanh.f32 %v1723_v55 }
 0x21d   :  { %7569 = vtanh.f32 %v1734_v38 }
 0x224   :  { %v7564_v40 = vpop.eup %7563 }
 0x225   :  { %v7566_v32 = vpop.eup %7565  ;;  %v1727_v34 = vmul.f32 0.5, %v7564_v40 }
 0x226   :  { %v1731_v41 = vmul.f32 0.5, %v7566_v32  ;;  %v7568_v44 = vpop.eup %7567 }
 0x227   :  { %v1728_v17 = vadd.f32 0.5, %v1727_v34  ;;  %v7570_v33 = vpop.eup %7569 }
 0x228   :  { %v1732_v47 = vadd.f32 0.5, %v1731_v41  ;;  %v1736_v25 = vmul.f32 0.5, %v7570_v33 }
 0x229   :  { %v1739_v5 = vmul.f32 %v7568_v44, %v1728_v17 }
 0x22a   :  { %v1738_v29 = vmul.f32 0.0, %v1732_v47  ;;  %v1737_v30 = vadd.f32 0.5, %v1736_v25 }
 0x22c   :  { %v8566_v35 = vadd.f32 %v1739_v5, %v1738_v29 }
 0x22e   :  { %7571 = vtanh.f32 %v8566_v35 }
 0x238   :  { %v7572_v56 = vpop.eup %7571 }
 0x239   :  { %v8569_v55 = vmul.f32 %v7572_v56, %v1737_v30  ;;  %v8627_v56 = vld [vmem:[%s10186_s4 + $0xc] ss:$16 sps:$4 sm:$0xff]  }
 0x23b   :  { %v1751_v24 = vpack.c.bf16 %v8569_v55, %v8569_v55 }
 0x23d   :  { %1977 = vmatmul.mubr.bf16.vlgmr.msra.gmra.mrb[52].mxu0 %v1751_v24  ;;  %2018 = vmatmul.mubr.bf16.vlgmr.msra.gmra.mrb[52].mxu1 %v1751_v24  ;;  %v8632_v24 = vld [vmem:[%s10186_s4] ss:$16 sps:$4 sm:$0xff]  }
 0x23e   :  { %2251 = vmatpush1.bf16.msra.mxu0 %v8257_v60  ;;  %2292 = vmatpush1.bf16.msra.mxu1 %v8262_v61 }
 0x23f   :  { %2252 = vmatprep.subr.bf16.mxu0 %v8267_v51  ;;  %2293 = vmatprep.subr.bf16.mxu1 %v8272_v2 }
 0x240   :  { %2282 = vmatprep.mubr.bf16.mxu0 %v10235_v48  ;;  %2323 = vmatprep.mubr.bf16.mxu1 %v10235_v48 }
 0x242   :  { %2253 = vmatpush1.bf16.msra.mxu0 %v8280_v11  ;;  %2294 = vmatpush1.bf16.msra.mxu1 %v8285_v12 }
 0x243   :  { %2254 = vmatprep.subr.bf16.mxu0 %v8293_v14  ;;  %2295 = vmatprep.subr.bf16.mxu1 %v8298_v15 }
 0x246   :  { %2255 = vmatpush1.bf16.msra.mxu0 %v8307_v21  ;;  %2296 = vmatpush1.bf16.msra.mxu1 %v8312_v22 }
 0x247   :  { %2256 = vmatprep.subr.bf16.mxu0 %v8319_v27  ;;  %2297 = vmatprep.subr.bf16.mxu1 %v8324_v28 }
 0x24a   :  { %2257 = vmatpush1.bf16.msra.mxu0 %v8332_v42  ;;  %2298 = vmatpush1.bf16.msra.mxu1 %v8337_v43 }
 0x24b   :  { %2258 = vmatprep.subr.bf16.mxu0 %v8345_v45  ;;  %2299 = vmatprep.subr.bf16.mxu1 %v8350_v46 }
 0x24e   :  { %2259 = vmatpush1.bf16.msra.mxu0 %v8359_v52  ;;  %2300 = vmatpush1.bf16.msra.mxu1 %v8364_v53 }
 0x24f   :  { %2260 = vmatprep.subr.bf16.mxu0 %v8371_v37  ;;  %2301 = vmatprep.subr.bf16.mxu1 %v8376_v58 }
 0x252   :  { %2261 = vmatpush1.bf16.msra.mxu0 %v8384_v6  ;;  %2302 = vmatpush1.bf16.msra.mxu1 %v8389_v7 }
 0x253   :  { %2262 = vmatprep.subr.bf16.mxu0 %v8397_v9  ;;  %2303 = vmatprep.subr.bf16.mxu1 %v8402_v10 }
 0x256   :  { %2263 = vmatpush1.bf16.msra.mxu0 %v8413_v39  ;;  %2304 = vmatpush1.bf16.msra.mxu1 %v8418_v13 }
 0x257   :  { %2264 = vmatprep.subr.bf16.mxu0 %v8426_v3  ;;  %2305 = vmatprep.subr.bf16.mxu1 %v8431_v18 }
 0x25a   :  { %2265 = vmatpush1.bf16.msra.mxu0 %v8438_v20  ;;  %2306 = vmatpush1.bf16.msra.mxu1 %v8443_v23 }
 0x25b   :  { %2597 = vmatprep.subr.bf16.mxu1 %v8627_v56 }
 0x310   :  { %v1978_v60 = vpop.f32.mrb[52].mxu0  ;;  %v2019_v61 = vpop.f32.mrb[52].mxu1 }
 0x311   :  { %v2026_v51 = vadd.f32 %v1978_v60, %v8508_v50  ;;  %v2028_v2 = vadd.f32 %v2019_v61, %v8510_v54  ;;  %v1980_v11 = vpop.f32.mrb[53].mxu0  ;;  %v2021_v12 = vpop.f32.mrb[53].mxu1  ;;  %v8637_v60 = vld [vmem:[%s10186_s4 + $0x8] ss:$16 sps:$4 sm:$0xff]   ;;  %v8646_v61 = vld [vmem:[%s10186_s4 + $0x24] ss:$16 sps:$4 sm:$0xff]  }
 0x312   :  { %v2027_v62 = vadd.f32 %v1980_v11, %v8512_v57  ;;  %v2029_v4 = vadd.f32 %v2021_v12, %v8514_v59  ;;  %v1982_v1 = vpop.f32.mrb[54].mxu0  ;;  %v2023_v16 = vpop.f32.mrb[54].mxu1  ;;  %v8661_v11 = vld [vmem:[%s10186_s4 + $0x28] ss:$16 sps:$4 sm:$0xff]  }
 0x313   :  { %v2030_v31 = vmul.f32 0.5, %v2026_v51  ;;  %v1983_v19 = vpop.f32.mrb[55].mxu0  ;;  %v2024_v26 = vpop.f32.mrb[55].mxu1  ;;  %v8651_v51 = vld [vmem:[%s10186_s4 + $0x2c] ss:$16 sps:$4 sm:$0xff]  }
 0x314   :  { %v2034_v49 = vmul.f32 0.5, %v2027_v62  ;;  %v2039_v38 = vmul.f32 0.5, %v2029_v4  ;;  %v8716_v1 = vld [vmem:[%s10186_s4 + $0x44] ss:$16 sps:$4 sm:$0xff]   ;;  %v8721_v16 = vld [vmem:[%s10186_s4 + $0x4c] ss:$16 sps:$4 sm:$0xff]  }
 0x315   :  { %7573 = vtanh.f32 %v2030_v31  ;;  %v8726_v31 = vld [vmem:[%s10186_s4 + $0x40] ss:$16 sps:$4 sm:$0xff]   ;;  %v8731_v19 = vld [vmem:[%s10186_s4 + $0x48] ss:$16 sps:$4 sm:$0xff]   ;;  %v8740_v26 = vld [vmem:[%s10186_s4 + $0x64] ss:$16 sps:$4 sm:$0xff]  }
 0x316   :  { %7575 = vtanh.f32 %v2034_v49  ;;  %v8745_v49 = vld [vmem:[%s10186_s4 + $0x6c] ss:$16 sps:$4 sm:$0xff]  }
 0x317   :  { %7577 = vtanh.f32 %v2028_v2  ;;  %v8656_v2 = vld [vmem:[%s10186_s4 + $0x20] ss:$16 sps:$4 sm:$0xff]  }
 0x318   :  { %7579 = vtanh.f32 %v2039_v38  ;;  %v8750_v38 = vld [vmem:[%s10186_s4 + $0x60] ss:$16 sps:$4 sm:$0xff]  }
 0x31f   :  { %v7574_v40 = vpop.eup %7573 }
 0x320   :  { %v7576_v50 = vpop.eup %7575  ;;  %v2032_v32 = vmul.f32 0.5, %v7574_v40  ;;  %v8755_v40 = vld [vmem:[%s10186_s4 + $0x68] ss:$16 sps:$4 sm:$0xff]  }
 0x321   :  { %v2036_v54 = vmul.f32 0.5, %v7576_v50  ;;  %v7578_v41 = vpop.eup %7577  ;;  %v8764_v50 = vld [vmem:[%s10186_s4 + $0x84] ss:$16 sps:$4 sm:$0xff]  }
 0x322   :  { %v2033_v34 = vadd.f32 0.5, %v2032_v32  ;;  %v7580_v47 = vpop.eup %7579  ;;  %v8769_v32 = vld [vmem:[%s10186_s4 + $0x8c] ss:$16 sps:$4 sm:$0xff]  }
 0x323   :  { %v2037_v57 = vadd.f32 0.5, %v2036_v54  ;;  %v2041_v5 = vmul.f32 0.5, %v7580_v47  ;;  %v8774_v54 = vld [vmem:[%s10186_s4 + $0x80] ss:$16 sps:$4 sm:$0xff]   ;;  %v8817_v47 = vld [vmem:[%s10186_s4 + $0xcc] ss:$16 sps:$4 sm:$0xff]  }
 0x324   :  { %v2044_v17 = vmul.f32 %v7578_v41, %v2033_v34  ;;  %v8779_v34 = vld [vmem:[%s10186_s4 + $0x88] ss:$16 sps:$4 sm:$0xff]   ;;  %v8788_v41 = vld [vmem:[%s10186_s4 + $0xa4] ss:$16 sps:$4 sm:$0xff]  }
 0x325   :  { %v2043_v59 = vmul.f32 %v2037_v57, %v8566_v35  ;;  %v2042_v29 = vadd.f32 0.5, %v2041_v5  ;;  %v8622_v35 = vld [vmem:[%s10186_s4 + $0x4] ss:$16 sps:$4 sm:$0xff]   ;;  %v8793_v57 = vld [vmem:[%s10186_s4 + $0xac] ss:$16 sps:$4 sm:$0xff]  }
 0x326   :  { %2556 = vmatprep.subr.bf16.mxu0 %v8622_v35  ;;  %v8822_v5 = vld [vmem:[%s10186_s4 + $0xc0] ss:$16 sps:$4 sm:$0xff]  }
 0x327   :  { %v8610_v44 = vadd.f32 %v2044_v17, %v2043_v59  ;;  %v8798_v17 = vld [vmem:[%s10186_s4 + $0xa0] ss:$16 sps:$4 sm:$0xff]   ;;  %v8803_v59 = vld [vmem:[%s10186_s4 + $0xa8] ss:$16 sps:$4 sm:$0xff]  }
 0x329   :  { %7581 = vtanh.f32 %v8610_v44 }
 0x333   :  { %v7582_v33 = vpop.eup %7581 }
 0x334   :  { %v8613_v25 = vmul.f32 %v7582_v33, %v2042_v29  ;;  %v8827_v29 = vld [vmem:[%s10186_s4 + $0xc8] ss:$16 sps:$4 sm:$0xff]   ;;  %v8836_v33 = vld [vmem:[%s10186_s4 + $0xe4] ss:$16 sps:$4 sm:$0xff]  }
 0x336   :  { %v2057_v30 = vpack.c.bf16 %v8613_v25, %v8613_v25 }
 0x338   :  { %2283 = vmatmul.mubr.bf16.vlgmr.msra.gmra.mrb[56].mxu0 %v2057_v30  ;;  %2324 = vmatmul.mubr.bf16.vlgmr.msra.gmra.mrb[56].mxu1 %v2057_v30  ;;  %v8841_v30 = vld [vmem:[%s10186_s4 + $0xec] ss:$16 sps:$4 sm:$0xff]  }
 0x339   :  { %2588 = vmatprep.mubr.bf16.mxu0 %v10235_v48  ;;  %2629 = vmatprep.mubr.bf16.mxu1 %v10235_v48 }
 0x33a   :  { %2557 = vmatpush1.bf16.msra.mxu0 %v8632_v24  ;;  %2598 = vmatpush1.bf16.msra.mxu1 %v8637_v60 }
 0x33b   :  { %2558 = vmatprep.subr.bf16.mxu0 %v8646_v61  ;;  %2599 = vmatprep.subr.bf16.mxu1 %v8651_v51 }
 0x33e   :  { %2559 = vmatpush1.bf16.msra.mxu0 %v8656_v2  ;;  %2600 = vmatpush1.bf16.msra.mxu1 %v8661_v11 }
 0x33f   :  { %2560 = vmatprep.subr.bf16.mxu0 %v8293_v14  ;;  %2601 = vmatprep.subr.bf16.mxu1 %v8298_v15 }
 0x342   :  { %2561 = vmatpush1.bf16.msra.mxu0 %v8307_v21  ;;  %2602 = vmatpush1.bf16.msra.mxu1 %v8312_v22 }
 0x343   :  { %2562 = vmatprep.subr.bf16.mxu0 %v8319_v27  ;;  %2603 = vmatprep.subr.bf16.mxu1 %v8324_v28 }
 0x346   :  { %2563 = vmatpush1.bf16.msra.mxu0 %v8332_v42  ;;  %2604 = vmatpush1.bf16.msra.mxu1 %v8337_v43 }
 0x347   :  { %2564 = vmatprep.subr.bf16.mxu0 %v8345_v45  ;;  %2605 = vmatprep.subr.bf16.mxu1 %v8350_v46 }
 0x34a   :  { %2565 = vmatpush1.bf16.msra.mxu0 %v8359_v52  ;;  %2606 = vmatpush1.bf16.msra.mxu1 %v8364_v53 }
 0x34b   :  { %2566 = vmatprep.subr.bf16.mxu0 %v8371_v37  ;;  %2607 = vmatprep.subr.bf16.mxu1 %v8376_v58 }
 0x34e   :  { %2567 = vmatpush1.bf16.msra.mxu0 %v8384_v6  ;;  %2608 = vmatpush1.bf16.msra.mxu1 %v8389_v7 }
 0x34f   :  { %2568 = vmatprep.subr.bf16.mxu0 %v8397_v9  ;;  %2609 = vmatprep.subr.bf16.mxu1 %v8402_v10 }
 0x352   :  { %2569 = vmatpush1.bf16.msra.mxu0 %v8413_v39  ;;  %2610 = vmatpush1.bf16.msra.mxu1 %v8418_v13 }
 0x353   :  { %2570 = vmatprep.subr.bf16.mxu0 %v8426_v3  ;;  %2611 = vmatprep.subr.bf16.mxu1 %v8431_v18 }
 0x356   :  { %2571 = vmatpush1.bf16.msra.mxu0 %v8438_v20  ;;  %2612 = vmatpush1.bf16.msra.mxu1 %v8443_v23 }
 0x357   :  { %2862 = vmatprep.subr.bf16.mxu0 %v8622_v35  ;;  %2903 = vmatprep.subr.bf16.mxu1 %v8627_v56 }
 0x40b   :  { %v2284_v14 = vpop.f32.mrb[56].mxu0  ;;  %v2325_v15 = vpop.f32.mrb[56].mxu1 }
 0x40c   :  { %v2332_v21 = vadd.f32 %v2284_v14, %v8516_v63  ;;  %v2334_v22 = vadd.f32 %v2325_v15, %v8518_v0  ;;  %v2286_v27 = vpop.f32.mrb[57].mxu0  ;;  %v2327_v28 = vpop.f32.mrb[57].mxu1  ;;  %v8846_v14 = vld [vmem:[%s10186_s4 + $0xe0] ss:$16 sps:$4 sm:$0xff]   ;;  %v8851_v15 = vld [vmem:[%s10186_s4 + $0xe8] ss:$16 sps:$4 sm:$0xff]  }
 0x40d   :  { %v2333_v42 = vadd.f32 %v2286_v27, %v8520_v36  ;;  %v2335_v43 = vadd.f32 %v2327_v28, %v8522_v8  ;;  %v2288_v45 = vpop.f32.mrb[58].mxu0  ;;  %v2329_v46 = vpop.f32.mrb[58].mxu1  ;;  %v10236_v27 = vld [vmem:[#allocation10_spill] sm:$0xff] }
 0x40e   :  { %v2336_v52 = vmul.f32 0.5, %v2332_v21  ;;  %v2289_v53 = vpop.f32.mrb[59].mxu0  ;;  %v2330_v37 = vpop.f32.mrb[59].mxu1 }
 0x40f   :  { %v2340_v58 = vmul.f32 0.5, %v2333_v42  ;;  %v2345_v6 = vmul.f32 0.5, %v2335_v43  ;;  %v10237_v42 = vld [vmem:[#allocation11_spill] sm:$0xff]  ;;  %v10239_v37 = vld [vmem:[#allocation13_spill] sm:$0xff] }
 0x410   :  { %7583 = vtanh.f32 %v2336_v52  ;;  %v10238_v52 = vld [vmem:[#allocation12_spill] sm:$0xff] }
 0x411   :  { %7585 = vtanh.f32 %v2340_v58 }
 0x412   :  { %7587 = vtanh.f32 %v2334_v22 }
 0x413   :  { %7589 = vtanh.f32 %v2345_v6 }
 0x41a   :  { %v7584_v7 = vpop.eup %7583 }
 0x41b   :  { %v7586_v9 = vpop.eup %7585  ;;  %v2338_v10 = vmul.f32 0.5, %v7584_v7 }
 0x41c   :  { %v2342_v39 = vmul.f32 0.5, %v7586_v9  ;;  %v7588_v3 = vpop.eup %7587 }
 0x41d   :  { %v2339_v13 = vadd.f32 0.5, %v2338_v10  ;;  %v7590_v0 = vpop.eup %7589 }
 0x41e   :  { %v2343_v18 = vadd.f32 0.5, %v2342_v39  ;;  %v2347_v36 = vmul.f32 0.5, %v7590_v0 }
 0x41f   :  { %v2350_v20 = vmul.f32 %v7588_v3, %v2339_v13 }
 0x420   :  { %v2349_v23 = vmul.f32 %v2343_v18, %v8610_v44  ;;  %v2348_v8 = vadd.f32 0.5, %v2347_v36  ;;  %v8812_v44 = vld [vmem:[%s10186_s4 + $0xc4] ss:$16 sps:$4 sm:$0xff]  }
 0x422   :  { %v8698_v63 = vadd.f32 %v2350_v20, %v2349_v23 }
 0x424   :  { %7591 = vtanh.f32 %v8698_v63 }
 0x42e   :  { %v7592_v12 = vpop.eup %7591 }
 0x42f   :  { %v8701_v62 = vmul.f32 %v7592_v12, %v2348_v8 }
 0x431   :  { %v2363_v4 = vpack.c.bf16 %v8701_v62, %v8701_v62 }
 0x433   :  { %2589 = vmatmul.mubr.bf16.vlgmr.msra.gmra.mrb[60].mxu0 %v2363_v4  ;;  %2630 = vmatmul.mubr.bf16.vlgmr.msra.gmra.mrb[60].mxu1 %v2363_v4 }
 0x434   :  { %2863 = vmatpush1.bf16.msra.mxu0 %v8632_v24  ;;  %2904 = vmatpush1.bf16.msra.mxu1 %v8637_v60 }
 0x435   :  { %2864 = vmatprep.subr.bf16.mxu0 %v8646_v61  ;;  %2905 = vmatprep.subr.bf16.mxu1 %v8651_v51 }
 0x436   :  { %2894 = vmatprep.mubr.bf16.mxu0 %v10235_v48  ;;  %2935 = vmatprep.mubr.bf16.mxu1 %v10235_v48 }
 0x438   :  { %2865 = vmatpush1.bf16.msra.mxu0 %v8656_v2  ;;  %2906 = vmatpush1.bf16.msra.mxu1 %v8661_v11 }
 0x439   :  { %2866 = vmatprep.subr.bf16.mxu0 %v8716_v1  ;;  %2907 = vmatprep.subr.bf16.mxu1 %v8721_v16 }
 0x43c   :  { %2867 = vmatpush1.bf16.msra.mxu0 %v8726_v31  ;;  %2908 = vmatpush1.bf16.msra.mxu1 %v8731_v19 }
 0x43d   :  { %2868 = vmatprep.subr.bf16.mxu0 %v8740_v26  ;;  %2909 = vmatprep.subr.bf16.mxu1 %v8745_v49 }
 0x440   :  { %2869 = vmatpush1.bf16.msra.mxu0 %v8750_v38  ;;  %2910 = vmatpush1.bf16.msra.mxu1 %v8755_v40 }
 0x441   :  { %2870 = vmatprep.subr.bf16.mxu0 %v8764_v50  ;;  %2911 = vmatprep.subr.bf16.mxu1 %v8769_v32 }
 0x444   :  { %2871 = vmatpush1.bf16.msra.mxu0 %v8774_v54  ;;  %2912 = vmatpush1.bf16.msra.mxu1 %v8779_v34 }
 0x445   :  { %2872 = vmatprep.subr.bf16.mxu0 %v8788_v41  ;;  %2913 = vmatprep.subr.bf16.mxu1 %v8793_v57 }
 0x448   :  { %2873 = vmatpush1.bf16.msra.mxu0 %v8798_v17  ;;  %2914 = vmatpush1.bf16.msra.mxu1 %v8803_v59 }
 0x449   :  { %2874 = vmatprep.subr.bf16.mxu0 %v8812_v44  ;;  %2915 = vmatprep.subr.bf16.mxu1 %v8817_v47 }
 0x44c   :  { %2875 = vmatpush1.bf16.msra.mxu0 %v8822_v5  ;;  %2916 = vmatpush1.bf16.msra.mxu1 %v8827_v29 }
 0x44d   :  { %2876 = vmatprep.subr.bf16.mxu0 %v8836_v33  ;;  %2917 = vmatprep.subr.bf16.mxu1 %v8841_v30 }
 0x450   :  { %2877 = vmatpush1.bf16.msra.mxu0 %v8846_v14  ;;  %2918 = vmatpush1.bf16.msra.mxu1 %v8851_v15 }
 0x451   :  { %3168 = vmatprep.subr.bf16.mxu0 %v8622_v35  ;;  %3209 = vmatprep.subr.bf16.mxu1 %v8627_v56 }
 0x506   :  { %v2590_v21 = vpop.f32.mrb[60].mxu0  ;;  %v2631_v22 = vpop.f32.mrb[60].mxu1 }
 0x507   :  { %v2638_v28 = vadd.f32 %v2590_v21, %v10236_v27  ;;  %v2640_v43 = vadd.f32 %v2631_v22, %v10237_v42  ;;  %v2592_v45 = vpop.f32.mrb[61].mxu0  ;;  %v2633_v46 = vpop.f32.mrb[61].mxu1 }
 0x508   :  { %v2639_v53 = vadd.f32 %v2592_v45, %v10238_v52  ;;  %v2641_v58 = vadd.f32 %v2633_v46, %v10239_v37  ;;  %v2594_v6 = vpop.f32.mrb[62].mxu0  ;;  %v2635_v7 = vpop.f32.mrb[62].mxu1 }
 0x509   :  { %v2642_v9 = vmul.f32 0.5, %v2638_v28  ;;  %v2595_v10 = vpop.f32.mrb[63].mxu0  ;;  %v2636_v39 = vpop.f32.mrb[63].mxu1 }
 0x50a   :  { %v2646_v13 = vmul.f32 0.5, %v2639_v53  ;;  %v2651_v3 = vmul.f32 0.5, %v2641_v58  ;;  %v10240_v53 = vld [vmem:[#allocation14_spill] sm:$0xff]  ;;  %v10241_v58 = vld [vmem:[#allocation15_spill] sm:$0xff]  ;;  %v10242_v10 = vld [vmem:[#allocation16_spill] sm:$0xff] }
 0x50b   :  { %7593 = vtanh.f32 %v2642_v9 }
 0x50c   :  { %7595 = vtanh.f32 %v2646_v13  ;;  %v10243_v13 = vld [vmem:[#allocation17_spill] sm:$0xff] }
 0x50d   :  { %7597 = vtanh.f32 %v2640_v43 }
 0x50e   :  { %7599 = vtanh.f32 %v2651_v3 }
 0x515   :  { %v7594_v18 = vpop.eup %7593 }
 0x516   :  { %v7596_v20 = vpop.eup %7595  ;;  %v2644_v23 = vmul.f32 0.5, %v7594_v18 }
 0x517   :  { %v2648_v0 = vmul.f32 0.5, %v7596_v20  ;;  %v7598_v8 = vpop.eup %7597 }
 0x518   :  { %v2645_v36 = vadd.f32 0.5, %v2644_v23  ;;  %v7600_v27 = vpop.eup %7599 }
 0x519   :  { %v2649_v12 = vadd.f32 0.5, %v2648_v0  ;;  %v2653_v28 = vmul.f32 0.5, %v7600_v27 }
 0x51a   :  { %v2656_v4 = vmul.f32 %v7598_v8, %v2645_v36 }
 0x51b   :  { %v2655_v21 = vmul.f32 %v2649_v12, %v8698_v63  ;;  %v2654_v42 = vadd.f32 0.5, %v2653_v28 }
 0x51d   :  { %v8864_v22 = vadd.f32 %v2656_v4, %v2655_v21 }
 0x51f   :  { %7601 = vtanh.f32 %v8864_v22 }
 0x529   :  { %v7602_v43 = vpop.eup %7601 }
 0x52a   :  { %v8867_v45 = vmul.f32 %v7602_v43, %v2654_v42 }
 0x52c   :  { %v2669_v46 = vpack.c.bf16 %v8867_v45, %v8867_v45 }
 0x52e   :  { %2895 = vmatmul.mubr.bf16.vlgmr.msra.gmra.mrb[64].mxu0 %v2669_v46  ;;  %2936 = vmatmul.mubr.bf16.vlgmr.msra.gmra.mrb[64].mxu1 %v2669_v46 }
 0x52f   :  { %3169 = vmatpush1.bf16.msra.mxu0 %v8632_v24  ;;  %3210 = vmatpush1.bf16.msra.mxu1 %v8637_v60 }
 0x530   :  { %3170 = vmatprep.subr.bf16.mxu0 %v8646_v61  ;;  %3211 = vmatprep.subr.bf16.mxu1 %v8651_v51 }
 0x531   :  { %3200 = vmatprep.mubr.bf16.mxu0 %v10235_v48  ;;  %3241 = vmatprep.mubr.bf16.mxu1 %v10235_v48 }
 0x533   :  { %3171 = vmatpush1.bf16.msra.mxu0 %v8656_v2  ;;  %3212 = vmatpush1.bf16.msra.mxu1 %v8661_v11 }
 0x534   :  { %3172 = vmatprep.subr.bf16.mxu0 %v8716_v1  ;;  %3213 = vmatprep.subr.bf16.mxu1 %v8721_v16 }
 0x537   :  { %3173 = vmatpush1.bf16.msra.mxu0 %v8726_v31  ;;  %3214 = vmatpush1.bf16.msra.mxu1 %v8731_v19 }
 0x538   :  { %3174 = vmatprep.subr.bf16.mxu0 %v8740_v26  ;;  %3215 = vmatprep.subr.bf16.mxu1 %v8745_v49 }
 0x53b   :  { %3175 = vmatpush1.bf16.msra.mxu0 %v8750_v38  ;;  %3216 = vmatpush1.bf16.msra.mxu1 %v8755_v40 }
 0x53c   :  { %3176 = vmatprep.subr.bf16.mxu0 %v8764_v50  ;;  %3217 = vmatprep.subr.bf16.mxu1 %v8769_v32 }
 0x53f   :  { %3177 = vmatpush1.bf16.msra.mxu0 %v8774_v54  ;;  %3218 = vmatpush1.bf16.msra.mxu1 %v8779_v34 }
 0x540   :  { %3178 = vmatprep.subr.bf16.mxu0 %v8788_v41  ;;  %3219 = vmatprep.subr.bf16.mxu1 %v8793_v57 }
 0x543   :  { %3179 = vmatpush1.bf16.msra.mxu0 %v8798_v17  ;;  %3220 = vmatpush1.bf16.msra.mxu1 %v8803_v59 }
 0x544   :  { %3180 = vmatprep.subr.bf16.mxu0 %v8812_v44  ;;  %3221 = vmatprep.subr.bf16.mxu1 %v8817_v47 }
 0x547   :  { %3181 = vmatpush1.bf16.msra.mxu0 %v8822_v5  ;;  %3222 = vmatpush1.bf16.msra.mxu1 %v8827_v29 }
 0x548   :  { %3182 = vmatprep.subr.bf16.mxu0 %v8836_v33  ;;  %3223 = vmatprep.subr.bf16.mxu1 %v8841_v30 }
 0x54b   :  { %3183 = vmatpush1.bf16.msra.mxu0 %v8846_v14  ;;  %3224 = vmatpush1.bf16.msra.mxu1 %v8851_v15 }
 0x54c   :  { %3474 = vmatprep.subr.bf16.mxu0 %v8622_v35  ;;  %3515 = vmatprep.subr.bf16.mxu1 %v8627_v56 }
 0x601   :  { %v2896_v63 = vpop.f32.mrb[64].mxu0  ;;  %v2937_v52 = vpop.f32.mrb[64].mxu1 }
 0x602   :  { %v2944_v37 = vadd.f32 %v2896_v63, %v10240_v53  ;;  %v2946_v6 = vadd.f32 %v2937_v52, %v10241_v58  ;;  %v2898_v7 = vpop.f32.mrb[65].mxu0  ;;  %v2939_v9 = vpop.f32.mrb[65].mxu1 }
 0x603   :  { %v2945_v39 = vadd.f32 %v2898_v7, %v10242_v10  ;;  %v2947_v3 = vadd.f32 %v2939_v9, %v10243_v13  ;;  %v2900_v18 = vpop.f32.mrb[66].mxu0  ;;  %v2941_v20 = vpop.f32.mrb[66].mxu1  ;;  %v10246_v10 = vld [vmem:[#allocation20_spill] sm:$0xff]  ;;  %v10247_v13 = vld [vmem:[#allocation21_spill] sm:$0xff] }
 0x604   :  { %v2948_v23 = vmul.f32 0.5, %v2944_v37  ;;  %v2901_v0 = vpop.f32.mrb[67].mxu0  ;;  %v2942_v36 = vpop.f32.mrb[67].mxu1 }
 0x605   :  { %v2952_v35 = vmul.f32 0.5, %v2945_v39  ;;  %v2957_v56 = vmul.f32 0.5, %v2947_v3 }
 0x606   :  { %7603 = vtanh.f32 %v2948_v23 }
 0x607   :  { %7605 = vtanh.f32 %v2952_v35 }
 0x608   :  { %7607 = vtanh.f32 %v2946_v6 }
 0x609   :  { %7609 = vtanh.f32 %v2957_v56 }
 0x610   :  { %v7604_v8 = vpop.eup %7603 }
 0x611   :  { %v7606_v12 = vpop.eup %7605  ;;  %v2950_v4 = vmul.f32 0.5, %v7604_v8 }
 0x612   :  { %v2954_v21 = vmul.f32 0.5, %v7606_v12  ;;  %v7608_v28 = vpop.eup %7607 }
 0x613   :  { %v2951_v27 = vadd.f32 0.5, %v2950_v4  ;;  %v7610_v52 = vpop.eup %7609 }
 0x614   :  { %v2955_v42 = vadd.f32 0.5, %v2954_v21  ;;  %v2959_v53 = vmul.f32 0.5, %v7610_v52 }
 0x615   :  { %v2962_v43 = vmul.f32 %v7608_v28, %v2951_v27 }
 0x616   :  { %v2961_v46 = vmul.f32 %v2955_v42, %v8864_v22  ;;  %v2960_v37 = vadd.f32 0.5, %v2959_v53 }
 0x618   :  { %v8910_v63 = vadd.f32 %v2962_v43, %v2961_v46 }
 0x61a   :  { %7611 = vtanh.f32 %v8910_v63 }
 0x624   :  { %v7612_v58 = vpop.eup %7611 }
 0x625   :  { %v8913_v6 = vmul.f32 %v7612_v58, %v2960_v37 }
 0x627   :  { %v2975_v7 = vpack.c.bf16 %v8913_v6, %v8913_v6 }
 0x629   :  { %3201 = vmatmul.mubr.bf16.vlgmr.msra.gmra.mrb[68].mxu0 %v2975_v7  ;;  %3242 = vmatmul.mubr.bf16.vlgmr.msra.gmra.mrb[68].mxu1 %v2975_v7 }
 0x62a   :  { %3475 = vmatpush1.bf16.msra.mxu0 %v8632_v24  ;;  %3516 = vmatpush1.bf16.msra.mxu1 %v8637_v60 }
 0x62b   :  { %3476 = vmatprep.subr.bf16.mxu0 %v8646_v61  ;;  %3517 = vmatprep.subr.bf16.mxu1 %v8651_v51  ;;  %v10244_v61 = vld [vmem:[#allocation18_spill] sm:$0xff] }
 0x62c   :  { %3506 = vmatprep.mubr.bf16.mxu0 %v10235_v48  ;;  %3547 = vmatprep.mubr.bf16.mxu1 %v10235_v48 }
 0x62e   :  { %3477 = vmatpush1.bf16.msra.mxu0 %v8656_v2  ;;  %3518 = vmatpush1.bf16.msra.mxu1 %v8661_v11  ;;  %v10245_v2 = vld [vmem:[#allocation19_spill] sm:$0xff] }
 0x62f   :  { %3478 = vmatprep.subr.bf16.mxu0 %v8716_v1  ;;  %3519 = vmatprep.subr.bf16.mxu1 %v8721_v16 }
 0x632   :  { %3479 = vmatpush1.bf16.msra.mxu0 %v8726_v31  ;;  %3520 = vmatpush1.bf16.msra.mxu1 %v8731_v19 }
 0x633   :  { %3480 = vmatprep.subr.bf16.mxu0 %v8740_v26  ;;  %3521 = vmatprep.subr.bf16.mxu1 %v8745_v49 }
 0x636   :  { %3481 = vmatpush1.bf16.msra.mxu0 %v8750_v38  ;;  %3522 = vmatpush1.bf16.msra.mxu1 %v8755_v40 }
 0x637   :  { %3482 = vmatprep.subr.bf16.mxu0 %v8764_v50  ;;  %3523 = vmatprep.subr.bf16.mxu1 %v8769_v32 }
 0x63a   :  { %3483 = vmatpush1.bf16.msra.mxu0 %v8774_v54  ;;  %3524 = vmatpush1.bf16.msra.mxu1 %v8779_v34 }
 0x63b   :  { %3484 = vmatprep.subr.bf16.mxu0 %v8788_v41  ;;  %3525 = vmatprep.subr.bf16.mxu1 %v8793_v57 }
 0x63e   :  { %3485 = vmatpush1.bf16.msra.mxu0 %v8798_v17  ;;  %3526 = vmatpush1.bf16.msra.mxu1 %v8803_v59 }
 0x63f   :  { %3486 = vmatprep.subr.bf16.mxu0 %v8812_v44  ;;  %3527 = vmatprep.subr.bf16.mxu1 %v8817_v47 }
 0x642   :  { %3487 = vmatpush1.bf16.msra.mxu0 %v8822_v5  ;;  %3528 = vmatpush1.bf16.msra.mxu1 %v8827_v29 }
 0x643   :  { %3488 = vmatprep.subr.bf16.mxu0 %v8836_v33  ;;  %3529 = vmatprep.subr.bf16.mxu1 %v8841_v30 }
 0x646   :  { %3489 = vmatpush1.bf16.msra.mxu0 %v8846_v14  ;;  %3530 = vmatpush1.bf16.msra.mxu1 %v8851_v15 }
 0x6fc   :  { %v3202_v24 = vpop.f32.mrb[68].mxu0  ;;  %v3243_v60 = vpop.f32.mrb[68].mxu1 }
 0x6fd   :  { %v3250_v51 = vadd.f32 %v3202_v24, %v10244_v61  ;;  %v3252_v11 = vadd.f32 %v3243_v60, %v10245_v2  ;;  %v3204_v22 = vpop.f32.mrb[69].mxu0  ;;  %v3245_v9 = vpop.f32.mrb[69].mxu1  ;;  %v7324_v61 = vld [vmem:[%s10186_s4 + $0xc] ss:$16 sps:$4 sm:$0xff]   ;;  %v7322_v2 = vld [vmem:[%s10186_s4 + $0x8] ss:$16 sps:$4 sm:$0xff]  }
 0x6fe   :  { %v3251_v39 = vadd.f32 %v3204_v22, %v10246_v10  ;;  %v3253_v3 = vadd.f32 %v3245_v9, %v10247_v13  ;;  %v3206_v18 = vpop.f32.mrb[70].mxu0  ;;  %v3247_v20 = vpop.f32.mrb[70].mxu1  ;;  %3821 = vmatprep.subr.bf16.mxu1 %v7324_v61  ;;  %v7330_v22 = vld [vmem:[%s10186_s4 + $0x2c] ss:$16 sps:$4 sm:$0xff]   ;;  %v7325_v9 = vld [vmem:[%s10186_s4 + $0x20] ss:$16 sps:$4 sm:$0xff]  }
 0x6ff   :  { %v3254_v23 = vmul.f32 0.5, %v3250_v51  ;;  %v3207_v0 = vpop.f32.mrb[71].mxu0  ;;  %v3248_v36 = vpop.f32.mrb[71].mxu1  ;;  %v7319_v51 = vld [vmem:[%s10186_s4] ss:$16 sps:$4 sm:$0xff]  }
 0x700   :  { %v3258_v35 = vmul.f32 0.5, %v3251_v39  ;;  %v3263_v56 = vmul.f32 0.5, %v3253_v3  ;;  %v7328_v10 = vld [vmem:[%s10186_s4 + $0x28] ss:$16 sps:$4 sm:$0xff]  }
 0x701   :  { %7613 = vtanh.f32 %v3254_v23  ;;  %v7352_v61 = vld [vmem:[%s10189_s6 + $0x68] ss:$16 sps:$4 sm:$0xff]  }
 0x702   :  { %7615 = vtanh.f32 %v3258_v35 }
 0x703   :  { %7617 = vtanh.f32 %v3252_v11  ;;  %v7327_v11 = vld [vmem:[%s10186_s4 + $0x24] ss:$16 sps:$4 sm:$0xff]  }
 0x704   :  { %7619 = vtanh.f32 %v3263_v56 }
 0x70b   :  { %v7614_v8 = vpop.eup %7613 }
 0x70c   :  { %v7616_v12 = vpop.eup %7615  ;;  %v3256_v4 = vmul.f32 0.5, %v7614_v8 }
 0x70d   :  { %v3260_v21 = vmul.f32 0.5, %v7616_v12  ;;  %v7618_v28 = vpop.eup %7617 }
 0x70e   :  { %v3257_v27 = vadd.f32 0.5, %v3256_v4  ;;  %v7620_v53 = vpop.eup %7619  ;;  %v7331_v4 = vld [vmem:[%s10189_s6] ss:$16 sps:$4 sm:$0xff]  }
 0x70f   :  { %v3261_v42 = vadd.f32 0.5, %v3260_v21  ;;  %v3265_v37 = vmul.f32 0.5, %v7620_v53  ;;  %v7334_v21 = vld [vmem:[%s10189_s6 + $0x8] ss:$16 sps:$4 sm:$0xff]   ;;  %v7348_v53 = vld [vmem:[%s10189_s6 + $0x4c] ss:$16 sps:$4 sm:$0xff]  }
 0x710   :  { %v3268_v43 = vmul.f32 %v7618_v28, %v3257_v27  ;;  %v7339_v28 = vld [vmem:[%s10189_s6 + $0x24] ss:$16 sps:$4 sm:$0xff]  }
 0x711   :  { %v3267_v46 = vmul.f32 %v3261_v42, %v8910_v63  ;;  %v3266_v58 = vadd.f32 0.5, %v3265_v37  ;;  %v7321_v63 = vld [vmem:[%s10186_s4 + $0x4] ss:$16 sps:$4 sm:$0xff]   ;;  %v7342_v42 = vld [vmem:[%s10189_s6 + $0x2c] ss:$16 sps:$4 sm:$0xff]  }
 0x712   :  { %3780 = vmatprep.subr.bf16.mxu0 %v7321_v63  ;;  %v7343_v37 = vld [vmem:[%s10189_s6 + $0x40] ss:$16 sps:$4 sm:$0xff]  }
 0x713   :  { %v8954_v52 = vadd.f32 %v3268_v43, %v3267_v46  ;;  %v7337_v43 = vld [vmem:[%s10189_s6 + $0x20] ss:$16 sps:$4 sm:$0xff]   ;;  %v7340_v46 = vld [vmem:[%s10189_s6 + $0x28] ss:$16 sps:$4 sm:$0xff]  }
 0x714   :  { %v7349_v63 = vld [vmem:[%s10189_s6 + $0x60] ss:$16 sps:$4 sm:$0xff]  }
 0x715   :  { %7621 = vtanh.f32 %v8954_v52 }
 0x71f   :  { %v7622_v7 = vpop.eup %7621 }
 0x720   :  { %v8957_v24 = vmul.f32 %v7622_v7, %v3266_v58  ;;  %v7346_v58 = vld [vmem:[%s10189_s6 + $0x48] ss:$16 sps:$4 sm:$0xff]   ;;  %v7351_v7 = vld [vmem:[%s10189_s6 + $0x64] ss:$16 sps:$4 sm:$0xff]  }
 0x722   :  { %v3281_v60 = vpack.c.bf16 %v8957_v24, %v8957_v24 }
 0x724   :  { %3507 = vmatmul.mubr.bf16.vlgmr.msra.gmra.mrb[72].mxu0 %v3281_v60  ;;  %3548 = vmatmul.mubr.bf16.vlgmr.msra.gmra.mrb[72].mxu1 %v3281_v60  ;;  %v7354_v60 = vld [vmem:[%s10189_s6 + $0x6c] ss:$16 sps:$4 sm:$0xff]  }
 0x725   :  { %3812 = vmatprep.mubr.bf16.mxu0 %v10235_v48  ;;  %3853 = vmatprep.mubr.bf16.mxu1 %v10235_v48 }
 0x726   :  { %3781 = vmatpush1.bf16.msra.mxu0 %v7319_v51  ;;  %3822 = vmatpush1.bf16.msra.mxu1 %v7322_v2  ;;  %v7357_v51 = vld [vmem:[%s10189_s6 + $0x84] ss:$16 sps:$4 sm:$0xff]   ;;  %v7360_v2 = vld [vmem:[%s10189_s6 + $0x8c] ss:$16 sps:$4 sm:$0xff]  }
 0x727   :  { %3782 = vmatprep.subr.bf16.mxu0 %v7327_v11  ;;  %3823 = vmatprep.subr.bf16.mxu1 %v7330_v22  ;;  %v7355_v11 = vld [vmem:[%s10189_s6 + $0x80] ss:$16 sps:$4 sm:$0xff]   ;;  %v7358_v22 = vld [vmem:[%s10189_s6 + $0x88] ss:$16 sps:$4 sm:$0xff]  }
 0x72a   :  { %3783 = vmatpush1.bf16.msra.mxu0 %v7325_v9  ;;  %3824 = vmatpush1.bf16.msra.mxu1 %v7328_v10  ;;  %v7363_v9 = vld [vmem:[%s10189_s6 + $0xa4] ss:$16 sps:$4 sm:$0xff]   ;;  %v7366_v10 = vld [vmem:[%s10189_s6 + $0xac] ss:$16 sps:$4 sm:$0xff]  }
 0x72b   :  { %3784 = vmatprep.subr.bf16.mxu0 %v8716_v1  ;;  %3825 = vmatprep.subr.bf16.mxu1 %v8721_v16  ;;  %v7333_v1 = vld [vmem:[%s10189_s6 + $0x4] ss:$16 sps:$4 sm:$0xff]   ;;  %v7336_v16 = vld [vmem:[%s10189_s6 + $0xc] ss:$16 sps:$4 sm:$0xff]  }
 0x72e   :  { %3785 = vmatpush1.bf16.msra.mxu0 %v8726_v31  ;;  %3826 = vmatpush1.bf16.msra.mxu1 %v8731_v19 }
 0x72f   :  { %3786 = vmatprep.subr.bf16.mxu0 %v8740_v26  ;;  %3827 = vmatprep.subr.bf16.mxu1 %v8745_v49  ;;  %v10248_v26 = vld [vmem:[#allocation22_spill] sm:$0xff] }
 0x732   :  { %3787 = vmatpush1.bf16.msra.mxu0 %v8750_v38  ;;  %3828 = vmatpush1.bf16.msra.mxu1 %v8755_v40  ;;  %v10249_v38 = vld [vmem:[#allocation23_spill] sm:$0xff] }
 0x733   :  { %3788 = vmatprep.subr.bf16.mxu0 %v8764_v50  ;;  %3829 = vmatprep.subr.bf16.mxu1 %v8769_v32 }
 0x736   :  { %3789 = vmatpush1.bf16.msra.mxu0 %v8774_v54  ;;  %3830 = vmatpush1.bf16.msra.mxu1 %v8779_v34  ;;  %v10250_v54 = vld [vmem:[#allocation24_spill] sm:$0xff] }
 0x737   :  { %3790 = vmatprep.subr.bf16.mxu0 %v8788_v41  ;;  %3831 = vmatprep.subr.bf16.mxu1 %v8793_v57  ;;  %v10251_v41 = vld [vmem:[#allocation25_spill] sm:$0xff] }
 0x73a   :  { %3791 = vmatpush1.bf16.msra.mxu0 %v8798_v17  ;;  %3832 = vmatpush1.bf16.msra.mxu1 %v8803_v59 }
 0x73b   :  { %3792 = vmatprep.subr.bf16.mxu0 %v8812_v44  ;;  %3833 = vmatprep.subr.bf16.mxu1 %v8817_v47 }
 0x73e   :  { %3793 = vmatpush1.bf16.msra.mxu0 %v8822_v5  ;;  %3834 = vmatpush1.bf16.msra.mxu1 %v8827_v29 }
 0x73f   :  { %3794 = vmatprep.subr.bf16.mxu0 %v8836_v33  ;;  %3835 = vmatprep.subr.bf16.mxu1 %v8841_v30 }
 0x742   :  { %3795 = vmatpush1.bf16.msra.mxu0 %v8846_v14  ;;  %3836 = vmatpush1.bf16.msra.mxu1 %v8851_v15 }
 0x743   :  { %4112 = vmatprep.subr.bf16.mxu0 %v7333_v1  ;;  %4185 = vmatprep.subr.bf16.mxu1 %v7336_v16  ;;  %v7361_v1 = vld [vmem:[%s10189_s6 + $0xa0] ss:$16 sps:$4 sm:$0xff]   ;;  %v7364_v16 = vld [vmem:[%s10189_s6 + $0xa8] ss:$16 sps:$4 sm:$0xff]  }
 0x7f7   :  { %v3508_v31 = vpop.f32.mrb[72].mxu0  ;;  %v3549_v19 = vpop.f32.mrb[72].mxu1 }
 0x7f8   :  { %v3556_v49 = vadd.f32 %v3508_v31, %v10248_v26  ;;  %v3558_v40 = vadd.f32 %v3549_v19, %v10249_v38  ;;  %v3510_v50 = vpop.f32.mrb[73].mxu0  ;;  %v3551_v32 = vpop.f32.mrb[73].mxu1  ;;  %v7369_v31 = vld [vmem:[%s10189_s6 + $0xc4] ss:$16 sps:$4 sm:$0xff]   ;;  %v7372_v19 = vld [vmem:[%s10189_s6 + $0xcc] ss:$16 sps:$4 sm:$0xff]  }
 0x7f9   :  { %v3557_v34 = vadd.f32 %v3510_v50, %v10250_v54  ;;  %v3559_v57 = vadd.f32 %v3551_v32, %v10251_v41  ;;  %v3512_v17 = vpop.f32.mrb[74].mxu0  ;;  %v3553_v59 = vpop.f32.mrb[74].mxu1  ;;  %v7367_v26 = vld [vmem:[%s10189_s6 + $0xc0] ss:$16 sps:$4 sm:$0xff]   ;;  %v7375_v38 = vld [vmem:[%s10189_s6 + $0xe4] ss:$16 sps:$4 sm:$0xff]   ;;  %v3894_v54 = vpack.c.bf16 %v8613_v25, %v8569_v55  ;;  %v3896_v41 = vpack.c.bf16 %v8957_v24, %v8913_v6 }
 0x7fa   :  { %v3560_v44 = vmul.f32 0.5, %v3556_v49  ;;  %v3513_v47 = vpop.f32.mrb[75].mxu0  ;;  %v3554_v5 = vpop.f32.mrb[75].mxu1  ;;  %v7370_v49 = vld [vmem:[%s10189_s6 + $0xc8] ss:$16 sps:$4 sm:$0xff]  }
 0x7fb   :  { %v3564_v29 = vmul.f32 0.5, %v3557_v34  ;;  %v3569_v33 = vmul.f32 0.5, %v3559_v57  ;;  %v7373_v50 = vld [vmem:[%s10189_s6 + $0xe0] ss:$16 sps:$4 sm:$0xff]   ;;  %v7376_v32 = vld [vmem:[%s10189_s6 + $0xe8] ss:$16 sps:$4 sm:$0xff]   ;;  %v3895_v34 = vpack.c.bf16 %v8867_v45, %v8701_v62 }
 0x7fc   :  { %7623 = vtanh.f32 %v3560_v44  ;;  %v9136_v55 = vld [vmem:[%s10190_s7 + $0x4] ss:$16 sps:$4 sm:$0xff]   ;;  %v9141_v25 = vld [vmem:[%s10190_s7 + $0xc] ss:$16 sps:$4 sm:$0xff]   ;;  %v9147_v62 = vld [vmem:[%s10190_s7] ss:$16 sps:$4 sm:$0xff]  }
 0x7fd   :  { %7625 = vtanh.f32 %v3564_v29  ;;  %v9152_v45 = vld [vmem:[%s10190_s7 + $0x8] ss:$16 sps:$4 sm:$0xff]   ;;  %v9160_v6 = vld [vmem:[%s10190_s7 + $0x24] ss:$16 sps:$4 sm:$0xff]   ;;  %v9165_v24 = vld [vmem:[%s10190_s7 + $0x2c] ss:$16 sps:$4 sm:$0xff]  }
 0x7fe   :  { %7627 = vtanh.f32 %v3558_v40  ;;  %v7378_v40 = vld [vmem:[%s10189_s6 + $0xec] ss:$16 sps:$4 sm:$0xff]   ;;  %v9170_v57 = vld [vmem:[%s10190_s7 + $0x20] ss:$16 sps:$4 sm:$0xff]   ;;  %v9175_v17 = vld [vmem:[%s10190_s7 + $0x28] ss:$16 sps:$4 sm:$0xff]  }
 0x7ff   :  { %7629 = vtanh.f32 %v3569_v33  ;;  %v9184_v59 = vld [vmem:[%s10190_s7 + $0x44] ss:$16 sps:$4 sm:$0xff]   ;;  %v9189_v44 = vld [vmem:[%s10190_s7 + $0x4c] ss:$16 sps:$4 sm:$0xff]   ;;  %v9194_v47 = vld [vmem:[%s10190_s7 + $0x40] ss:$16 sps:$4 sm:$0xff]  }
 0x800   :  { %v9199_v5 = vld [vmem:[%s10190_s7 + $0x48] ss:$16 sps:$4 sm:$0xff]   ;;  %v9206_v29 = vld [vmem:[%s10190_s7 + $0x64] ss:$16 sps:$4 sm:$0xff]   ;;  %v9211_v33 = vld [vmem:[%s10190_s7 + $0x6c] ss:$16 sps:$4 sm:$0xff]  }
 0x806   :  { %v7624_v30 = vpop.eup %7623 }
 0x807   :  { %v7626_v14 = vpop.eup %7625  ;;  %v3562_v15 = vmul.f32 0.5, %v7624_v30  ;;  %v9216_v30 = vld [vmem:[%s10190_s7 + $0x60] ss:$16 sps:$4 sm:$0xff]  }
 0x808   :  { %v3566_v39 = vmul.f32 0.5, %v7626_v14  ;;  %v7628_v3 = vpop.eup %7627  ;;  %v9221_v14 = vld [vmem:[%s10190_s7 + $0x68] ss:$16 sps:$4 sm:$0xff]  }
 0x809   :  { %v3563_v13 = vadd.f32 0.5, %v3562_v15  ;;  %v7630_v36 = vpop.eup %7629  ;;  %v9232_v15 = vld [vmem:[%s10190_s7 + $0x84] ss:$16 sps:$4 sm:$0xff]  }
 0x80a   :  { %v3567_v18 = vadd.f32 0.5, %v3566_v39  ;;  %v3571_v35 = vmul.f32 0.5, %v7630_v36  ;;  %v9237_v39 = vld [vmem:[%s10190_s7 + $0x8c] ss:$16 sps:$4 sm:$0xff]   ;;  %v9271_v36 = vld [vmem:[%s10190_s7 + $0xa8] ss:$16 sps:$4 sm:$0xff]  }
 0x80b   :  { %v3574_v20 = vmul.f32 %v7628_v3, %v3563_v13  ;;  %v9242_v13 = vld [vmem:[%s10190_s7 + $0x80] ss:$16 sps:$4 sm:$0xff]   ;;  %v9247_v3 = vld [vmem:[%s10190_s7 + $0x88] ss:$16 sps:$4 sm:$0xff]  }
 0x80c   :  { %v3573_v23 = vmul.f32 %v3567_v18, %v8954_v52  ;;  %v3572_v56 = vadd.f32 0.5, %v3571_v35  ;;  %v7345_v52 = vld [vmem:[%s10189_s6 + $0x44] ss:$16 sps:$4 sm:$0xff]  }
 0x80d   :  { %v9256_v18 = vld [vmem:[%s10190_s7 + $0xa4] ss:$16 sps:$4 sm:$0xff]  }
 0x80e   :  { %v9022_v0 = vadd.f32 %v3574_v20, %v3573_v23  ;;  %v9261_v20 = vld [vmem:[%s10190_s7 + $0xac] ss:$16 sps:$4 sm:$0xff]   ;;  %v9266_v23 = vld [vmem:[%s10190_s7 + $0xa0] ss:$16 sps:$4 sm:$0xff]   ;;  %v9280_v35 = vld [vmem:[%s10190_s7 + $0xc4] ss:$16 sps:$4 sm:$0xff]  }
 0x810   :  { %7631 = vtanh.f32 %v9022_v0 }
 0x81a   :  { %v7632_v8 = vpop.eup %7631 }
 0x81b   :  { %v9025_v12 = vmul.f32 %v7632_v8, %v3572_v56  ;;  %v9285_v56 = vld [vmem:[%s10190_s7 + $0xcc] ss:$16 sps:$4 sm:$0xff]   ;;  %v9290_v8 = vld [vmem:[%s10190_s7 + $0xc0] ss:$16 sps:$4 sm:$0xff]  }
 0x81d   :  { %v3587_v27 = vpack.c.bf16 %v9025_v12, %v9025_v12 }
 0x81f   :  { %3813 = vmatmul.mubr.bf16.vlgmr.msra.gmra.mrb[76].mxu0 %v3587_v27  ;;  %3854 = vmatmul.mubr.bf16.vlgmr.msra.gmra.mrb[76].mxu1 %v3587_v27  ;;  %v9309_v27 = vld [vmem:[%s10190_s7 + $0xec] ss:$16 sps:$4 sm:$0xff]  }
 0x820   :  { %4113 = vmatpush1.bf16.msra.mxu0 %v7331_v4  ;;  %4186 = vmatpush1.bf16.msra.mxu1 %v7334_v21  ;;  %v9295_v4 = vld [vmem:[%s10190_s7 + $0xc8] ss:$16 sps:$4 sm:$0xff]   ;;  %v9304_v21 = vld [vmem:[%s10190_s7 + $0xe4] ss:$16 sps:$4 sm:$0xff]  }
 0x821   :  { %4114 = vmatprep.subr.bf16.mxu0 %v7339_v28  ;;  %4187 = vmatprep.subr.bf16.mxu1 %v7342_v42  ;;  %v9314_v28 = vld [vmem:[%s10190_s7 + $0xe0] ss:$16 sps:$4 sm:$0xff]   ;;  %v9319_v42 = vld [vmem:[%s10190_s7 + $0xe8] ss:$16 sps:$4 sm:$0xff]  }
 0x822   :  { %4144 = vmatprep.mubr.bf16.mxu0 %v10235_v48  ;;  %4217 = vmatprep.mubr.bf16.mxu1 %v10235_v48 }
 0x824   :  { %4115 = vmatpush1.bf16.msra.mxu0 %v7337_v43  ;;  %4188 = vmatpush1.bf16.msra.mxu1 %v7340_v46 }
 0x825   :  { %4116 = vmatprep.subr.bf16.mxu0 %v7345_v52  ;;  %4189 = vmatprep.subr.bf16.mxu1 %v7348_v53  ;;  %v10252_v52 = vld [vmem:[#allocation26_spill] sm:$0xff] }
 0x828   :  { %4117 = vmatpush1.bf16.msra.mxu0 %v7343_v37  ;;  %4190 = vmatpush1.bf16.msra.mxu1 %v7346_v58  ;;  %v10253_v37 = vld [vmem:[#allocation27_spill] sm:$0xff] }
 0x829   :  { %4118 = vmatprep.subr.bf16.mxu0 %v7351_v7  ;;  %4191 = vmatprep.subr.bf16.mxu1 %v7354_v60 }
 0x82c   :  { %4119 = vmatpush1.bf16.msra.mxu0 %v7349_v63  ;;  %4192 = vmatpush1.bf16.msra.mxu1 %v7352_v61  ;;  %v10254_v63 = vld [vmem:[#allocation28_spill] sm:$0xff] }
 0x82d   :  { %4120 = vmatprep.subr.bf16.mxu0 %v7357_v51  ;;  %4193 = vmatprep.subr.bf16.mxu1 %v7360_v2  ;;  %v10255_v51 = vld [vmem:[#allocation29_spill] sm:$0xff] }
 0x830   :  { %4121 = vmatpush1.bf16.msra.mxu0 %v7355_v11  ;;  %4194 = vmatpush1.bf16.msra.mxu1 %v7358_v22 }
 0x831   :  { %4122 = vmatprep.subr.bf16.mxu0 %v7363_v9  ;;  %4195 = vmatprep.subr.bf16.mxu1 %v7366_v10 }
 0x834   :  { %4123 = vmatpush1.bf16.msra.mxu0 %v7361_v1  ;;  %4196 = vmatpush1.bf16.msra.mxu1 %v7364_v16 }
 0x835   :  { %4124 = vmatprep.subr.bf16.mxu0 %v7369_v31  ;;  %4197 = vmatprep.subr.bf16.mxu1 %v7372_v19 }
 0x838   :  { %4125 = vmatpush1.bf16.msra.mxu0 %v7367_v26  ;;  %4198 = vmatpush1.bf16.msra.mxu1 %v7370_v49 }
 0x839   :  { %4126 = vmatprep.subr.bf16.mxu0 %v7375_v38  ;;  %4199 = vmatprep.subr.bf16.mxu1 %v7378_v40 }
 0x83c   :  { %4127 = vmatpush1.bf16.msra.mxu0 %v7373_v50  ;;  %4200 = vmatpush1.bf16.msra.mxu1 %v7376_v32 }
 0x83d   :  { %4486 = vmatprep.subr.bf16.mxu0 %v9136_v55  ;;  %4527 = vmatprep.subr.bf16.mxu1 %v9141_v25 }
 0x83f   :  { %4145 = vmatmul.mubr.bf16.vlgmr.msra.gmra.mrb[80].mxu0 %v3894_v54  ;;  %4218 = vmatmul.mubr.bf16.vlgmr.msra.gmra.mrb[80].mxu1 %v3894_v54 }
 0x840   :  { %4154 = vmatprep.mubr.bf16.mxu0 %v10235_v48  ;;  %4227 = vmatprep.mubr.bf16.mxu1 %v10235_v48 }
 0x841   :  { %4487 = vmatpush1.bf16.msra.mxu0 %v9147_v62  ;;  %4528 = vmatpush1.bf16.msra.mxu1 %v9152_v45 }
 0x842   :  { %4488 = vmatprep.subr.bf16.mxu0 %v9160_v6  ;;  %4529 = vmatprep.subr.bf16.mxu1 %v9165_v24 }
 0x845   :  { %4489 = vmatpush1.bf16.msra.mxu0 %v9170_v57  ;;  %4530 = vmatpush1.bf16.msra.mxu1 %v9175_v17 }
 0x846   :  { %4490 = vmatprep.subr.bf16.mxu0 %v9184_v59  ;;  %4531 = vmatprep.subr.bf16.mxu1 %v9189_v44 }
 0x847   :  { %4155 = vmatmul.mubr.bf16.gmra.mrb[84].mxu0 %v3895_v34  ;;  %4228 = vmatmul.mubr.bf16.gmra.mrb[84].mxu1 %v3895_v34 }
 0x848   :  { %4164 = vmatprep.mubr.bf16.mxu0 %v10235_v48  ;;  %4237 = vmatprep.mubr.bf16.mxu1 %v10235_v48 }
 0x849   :  { %4491 = vmatpush1.bf16.msra.mxu0 %v9194_v47  ;;  %4532 = vmatpush1.bf16.msra.mxu1 %v9199_v5 }
 0x84a   :  { %4492 = vmatprep.subr.bf16.mxu0 %v9206_v29  ;;  %4533 = vmatprep.subr.bf16.mxu1 %v9211_v33 }
 0x84d   :  { %4493 = vmatpush1.bf16.msra.mxu0 %v9216_v30  ;;  %4534 = vmatpush1.bf16.msra.mxu1 %v9221_v14 }
 0x84e   :  { %4494 = vmatprep.subr.bf16.mxu0 %v9232_v15  ;;  %4535 = vmatprep.subr.bf16.mxu1 %v9237_v39 }
 0x84f   :  { %4165 = vmatmul.mubr.bf16.gmra.mrb[88].mxu0 %v3896_v41  ;;  %4238 = vmatmul.mubr.bf16.gmra.mrb[88].mxu1 %v3896_v41 }
 0x850   :  { %4174 = vmatprep.mubr.bf16.mxu0 %v10235_v48  ;;  %4247 = vmatprep.mubr.bf16.mxu1 %v10235_v48 }
 0x851   :  { %4495 = vmatpush1.bf16.msra.mxu0 %v9242_v13  ;;  %4536 = vmatpush1.bf16.msra.mxu1 %v9247_v3 }
 0x852   :  { %4496 = vmatprep.subr.bf16.mxu0 %v9256_v18  ;;  %4537 = vmatprep.subr.bf16.mxu1 %v9261_v20 }
 0x855   :  { %4497 = vmatpush1.bf16.msra.mxu0 %v9266_v23  ;;  %4538 = vmatpush1.bf16.msra.mxu1 %v9271_v36 }
 0x856   :  { %4498 = vmatprep.subr.bf16.mxu0 %v9280_v35  ;;  %4539 = vmatprep.subr.bf16.mxu1 %v9285_v56 }
 0x859   :  { %4499 = vmatpush1.bf16.msra.mxu0 %v9290_v8  ;;  %4540 = vmatpush1.bf16.msra.mxu1 %v9295_v4 }
 0x85a   :  { %4500 = vmatprep.subr.bf16.mxu0 %v9304_v21  ;;  %4541 = vmatprep.subr.bf16.mxu1 %v9309_v27 }
 0x85d   :  { %4501 = vmatpush1.bf16.msra.mxu0 %v9314_v28  ;;  %4542 = vmatpush1.bf16.msra.mxu1 %v9319_v42 }
 0x85e   :  { %4595 = vmatprep.subr.bf16.mxu0 %v9136_v55  ;;  %4636 = vmatprep.subr.bf16.mxu1 %v9141_v25 }
 0x8f2   :  { %v3814_v43 = vpop.f32.mrb[76].mxu0  ;;  %v3855_v46 = vpop.f32.mrb[76].mxu1 }
 0x8f3   :  { %v3862_v53 = vadd.f32 %v3814_v43, %v10252_v52  ;;  %v3864_v58 = vadd.f32 %v3855_v46, %v10253_v37  ;;  %v3816_v7 = vpop.f32.mrb[77].mxu0  ;;  %v3857_v60 = vpop.f32.mrb[77].mxu1 }
 0x8f4   :  { %v3863_v61 = vadd.f32 %v3816_v7, %v10254_v63  ;;  %v3865_v2 = vadd.f32 %v3857_v60, %v10255_v51  ;;  %v3818_v11 = vpop.f32.mrb[78].mxu0  ;;  %v3859_v22 = vpop.f32.mrb[78].mxu1 }
 0x8f5   :  { %v3866_v9 = vmul.f32 0.5, %v3862_v53  ;;  %v3819_v10 = vpop.f32.mrb[79].mxu0  ;;  %v3860_v1 = vpop.f32.mrb[79].mxu1 }
 0x8f6   :  { %v3870_v16 = vmul.f32 0.5, %v3863_v61  ;;  %v3875_v31 = vmul.f32 0.5, %v3865_v2 }
 0x8f7   :  { %7633 = vtanh.f32 %v3866_v9 }
 0x8f8   :  { %7635 = vtanh.f32 %v3870_v16 }
 0x8f9   :  { %7637 = vtanh.f32 %v3864_v58 }
 0x8fa   :  { %7639 = vtanh.f32 %v3875_v31 }
 0x901   :  { %v7634_v19 = vpop.eup %7633 }
 0x902   :  { %v7636_v26 = vpop.eup %7635  ;;  %v3868_v49 = vmul.f32 0.5, %v7634_v19 }
 0x903   :  { %v3872_v38 = vmul.f32 0.5, %v7636_v26  ;;  %v7638_v50 = vpop.eup %7637 }
 0x904   :  { %v3869_v40 = vadd.f32 0.5, %v3868_v49  ;;  %v7640_v43 = vpop.eup %7639 }
 0x905   :  { %v3873_v32 = vadd.f32 0.5, %v3872_v38  ;;  %v3877_v46 = vmul.f32 0.5, %v7640_v43 }
 0x906   :  { %v3880_v54 = vmul.f32 %v7638_v50, %v3869_v40 }
 0x907   :  { %v3879_v34 = vmul.f32 %v3873_v32, %v9022_v0  ;;  %v3878_v7 = vadd.f32 0.5, %v3877_v46 }
 0x909   :  { %v3881_v41 = vadd.f32 %v3880_v54, %v3879_v34 }
 0x90b   :  { %7641 = vtanh.f32 %v3881_v41  ;;  %v3930_v41 = vld [vmem:[%s10191_s8] sm:$0xf] }
 0x912   :  { %v9332_v52 = vpop.f32.mrb[80].mxu0  ;;  %v9334_v53 = vpop.f32.mrb[80].mxu1 }
 0x913   :  { %v9336_v37 = vpop.f32.mrb[81].mxu0  ;;  %v9338_v58 = vpop.f32.mrb[81].mxu1 }
 0x914   :  { %v9340_v60 = vpop.f32.mrb[82].mxu0  ;;  %v9342_v63 = vpop.f32.mrb[82].mxu1 }
 0x915   :  { %v7642_v61 = vpop.eup %7641  ;;  %v9344_v51 = vpop.f32.mrb[83].mxu0 }
 0x916   :  { %v9346_v0 = vpop.f32.mrb[83].mxu1  ;;  %v3883_v2 = vmul.f32 %v7642_v61, %v3878_v7 }
 0x918   :  { %v3897_v11 = vpack.c.bf16 %v3883_v2, %v9025_v12 }
 0x91a   :  { %v9349_v22 = vpop.f32.mrb[84].mxu0  ;;  %v9351_v9 = vpop.f32.mrb[84].mxu1  ;;  %4175 = vmatmul.mubr.bf16.gmra.mrb[92].mxu0 %v3897_v11  ;;  %4248 = vmatmul.mubr.bf16.gmra.mrb[92].mxu1 %v3897_v11 }
 0x91b   :  { %10256 = vst [vmem:[#allocation10_spill] sm:$0xff] %v9349_v22  ;;  %10257 = vst [vmem:[#allocation11_spill] sm:$0xff] %v9351_v9  ;;  %v9353_v10 = vpop.f32.mrb[85].mxu0  ;;  %v9355_v1 = vpop.f32.mrb[85].mxu1  ;;  %4518 = vmatprep.mubr.bf16.mxu0 %v10235_v48  ;;  %4559 = vmatprep.mubr.bf16.mxu1 %v10235_v48 }
 0x91c   :  { %10258 = vst [vmem:[#allocation12_spill] sm:$0xff] %v9353_v10  ;;  %10259 = vst [vmem:[#allocation13_spill] sm:$0xff] %v9355_v1  ;;  %v9359_v16 = vpop.f32.mrb[86].mxu0  ;;  %v9361_v31 = vpop.f32.mrb[86].mxu1 }
 0x91d   :  { %10260 = vst [vmem:[#allocation14_spill] sm:$0xff] %v9359_v16  ;;  %10261 = vst [vmem:[#allocation15_spill] sm:$0xff] %v9361_v31  ;;  %v9363_v19 = vpop.f32.mrb[87].mxu0  ;;  %v9365_v12 = vpop.f32.mrb[87].mxu1 }
 0x91e   :  { %10262 = vst [vmem:[#allocation16_spill] sm:$0xff] %v9363_v19  ;;  %10263 = vst [vmem:[#allocation17_spill] sm:$0xff] %v9365_v12 }
 0x922   :  { %v9367_v26 = vpop.f32.mrb[88].mxu0  ;;  %v9369_v49 = vpop.f32.mrb[88].mxu1  ;;  %4519 = vmatmul.mubr.bf16.vlgmr.msra.gmra.mrb[96].mxu0 %v10235_v48  ;;  %4560 = vmatmul.mubr.bf16.vlgmr.msra.gmra.mrb[96].mxu1 %v10235_v48 }
 0x923   :  { %10264 = vst [vmem:[#allocation18_spill] sm:$0xff] %v9367_v26  ;;  %10265 = vst [vmem:[#allocation19_spill] sm:$0xff] %v9369_v49  ;;  %v9373_v38 = vpop.f32.mrb[89].mxu0  ;;  %v9375_v40 = vpop.f32.mrb[89].mxu1  ;;  %4596 = vmatpush1.bf16.msra.mxu0 %v9147_v62  ;;  %4637 = vmatpush1.bf16.msra.mxu1 %v9152_v45 }
 0x924   :  { %10266 = vst [vmem:[#allocation20_spill] sm:$0xff] %v9373_v38  ;;  %10267 = vst [vmem:[#allocation21_spill] sm:$0xff] %v9375_v40  ;;  %v9379_v50 = vpop.f32.mrb[90].mxu0  ;;  %v9381_v32 = vpop.f32.mrb[90].mxu1  ;;  %4597 = vmatprep.subr.bf16.mxu0 %v9160_v6  ;;  %4638 = vmatprep.subr.bf16.mxu1 %v9165_v24 }
 0x925   :  { %10268 = vst [vmem:[#allocation22_spill] sm:$0xff] %v9379_v50  ;;  %10269 = vst [vmem:[#allocation23_spill] sm:$0xff] %v9381_v32  ;;  %v9385_v54 = vpop.f32.mrb[91].mxu0  ;;  %v9387_v34 = vpop.f32.mrb[91].mxu1  ;;  %4627 = vmatprep.mubr.bf16.mxu0 %v10235_v48  ;;  %4668 = vmatprep.mubr.bf16.mxu1 %v10235_v48  ;;  %v10279_v32 = vld [vmem:[#allocation7_spill] sm:$0xff] }
 0x926   :  { %10270 = vst [vmem:[#allocation24_spill] sm:$0xff] %v9385_v54  ;;  %10271 = vst [vmem:[#allocation25_spill] sm:$0xff] %v9387_v34  ;;  %v10278_v34 = vld [vmem:[#allocation6_spill] sm:$0xff]  ;;  %v9438_v50 = vrot.slane %v3930_v41, %v10279_v32 }
 0x927   :  { %4598 = vmatpush1.bf16.msra.mxu0 %v9170_v57  ;;  %4639 = vmatpush1.bf16.msra.mxu1 %v9175_v17  ;;  %v9435_v54 = vrot.slane %v3930_v41, %v10278_v34 }
 0x928   :  { %4599 = vmatprep.subr.bf16.mxu0 %v9184_v59  ;;  %4640 = vmatprep.subr.bf16.mxu1 %v9189_v44  ;;  %v4220_v34 = vadd.f32 %v9334_v53, %v9438_v50 }
 0x92b   :  { %4600 = vmatpush1.bf16.msra.mxu0 %v9194_v47  ;;  %4641 = vmatpush1.bf16.msra.mxu1 %v9199_v5 }
 0x92c   :  { %4601 = vmatprep.subr.bf16.mxu0 %v9206_v29  ;;  %4642 = vmatprep.subr.bf16.mxu1 %v9211_v33 }
 0x92f   :  { %4602 = vmatpush1.bf16.msra.mxu0 %v9216_v30  ;;  %4643 = vmatpush1.bf16.msra.mxu1 %v9221_v14 }
 0x930   :  { %4603 = vmatprep.subr.bf16.mxu0 %v9232_v15  ;;  %4644 = vmatprep.subr.bf16.mxu1 %v9237_v39 }
 0x933   :  { %4604 = vmatpush1.bf16.msra.mxu0 %v9242_v13  ;;  %4645 = vmatpush1.bf16.msra.mxu1 %v9247_v3 }
 0x934   :  { %4605 = vmatprep.subr.bf16.mxu0 %v9256_v18  ;;  %4646 = vmatprep.subr.bf16.mxu1 %v9261_v20 }
 0x937   :  { %4606 = vmatpush1.bf16.msra.mxu0 %v9266_v23  ;;  %4647 = vmatpush1.bf16.msra.mxu1 %v9271_v36 }
 0x938   :  { %4607 = vmatprep.subr.bf16.mxu0 %v9280_v35  ;;  %4648 = vmatprep.subr.bf16.mxu1 %v9285_v56 }
 0x93b   :  { %4608 = vmatpush1.bf16.msra.mxu0 %v9290_v8  ;;  %4649 = vmatpush1.bf16.msra.mxu1 %v9295_v4 }
 0x93c   :  { %4609 = vmatprep.subr.bf16.mxu0 %v9304_v21  ;;  %4650 = vmatprep.subr.bf16.mxu1 %v9309_v27 }
 0x93f   :  { %4610 = vmatpush1.bf16.msra.mxu0 %v9314_v28  ;;  %4651 = vmatpush1.bf16.msra.mxu1 %v9319_v42 }
 0x940   :  { %4704 = vmatprep.subr.bf16.mxu0 %v9136_v55  ;;  %4745 = vmatprep.subr.bf16.mxu1 %v9141_v25 }
 0x9ed   :  { %v9422_v43 = vpop.f32.mrb[92].mxu0  ;;  %v9424_v46 = vpop.f32.mrb[92].mxu1 }
 0x9ee   :  { %10272 = vst [vmem:[#allocation26_spill] sm:$0xff] %v9422_v43  ;;  %10273 = vst [vmem:[#allocation27_spill] sm:$0xff] %v9424_v46  ;;  %v9426_v7 = vpop.f32.mrb[93].mxu0  ;;  %v9428_v61 = vpop.f32.mrb[93].mxu1  ;;  %v10282_v43 = vld [vmem:[#allocation8_spill] sm:$0xff] }
 0x9ef   :  { %10274 = vst [vmem:[#allocation28_spill] sm:$0xff] %v9426_v7  ;;  %10275 = vst [vmem:[#allocation29_spill] sm:$0xff] %v9428_v61  ;;  %v9430_v2 = vpop.f32.mrb[94].mxu0  ;;  %v9432_v11 = vpop.f32.mrb[94].mxu1  ;;  %v9445_v46 = vrot.slane %v3930_v41, %v10282_v43  ;;  %v10283_v7 = vld [vmem:[#allocation9_spill] sm:$0xff] }
 0x9f0   :  { %10276 = vst [vmem:[#allocation30_spill] sm:$0xff] %v9430_v2  ;;  %10277 = vst [vmem:[#allocation31_spill] sm:$0xff] %v9432_v11  ;;  %v9440_v40 = vpop.f32.mrb[95].mxu0  ;;  %v9442_v38 = vpop.f32.mrb[95].mxu1  ;;  %v9448_v49 = vrot.slane %v3930_v41, %v10283_v7  ;;  %v4147_v2 = vadd.f32 %v9332_v52, %v9435_v54 }
 0x9f1   :  { %10280 = vst [vmem:[#allocation32_spill] sm:$0xff] %v9440_v40  ;;  %10281 = vst [vmem:[#allocation33_spill] sm:$0xff] %v9442_v38  ;;  %v4149_v32 = vadd.f32 %v9336_v37, %v9445_v46 }
 0x9f2   :  { %v4222_v40 = vadd.f32 %v9338_v58, %v9448_v49 }
 0x9f5   :  { %v4520_v11 = vpop.f32.mrb[96].mxu0  ;;  %v4561_v38 = vpop.f32.mrb[96].mxu1 }
 0x9f6   :  { %v4568_v61 = vadd.f32 %v4520_v11, %v4147_v2  ;;  %v4570_v43 = vadd.f32 %v4561_v38, %v4220_v34  ;;  %v4522_v26 = vpop.f32.mrb[97].mxu0  ;;  %v4563_v12 = vpop.f32.mrb[97].mxu1 }
 0x9f7   :  { %v4569_v41 = vadd.f32 %v4522_v26, %v4149_v32  ;;  %v4571_v7 = vadd.f32 %v4563_v12, %v4222_v40  ;;  %v4524_v19 = vpop.f32.mrb[98].mxu0  ;;  %v4565_v31 = vpop.f32.mrb[98].mxu1 }
 0x9f8   :  { %v4572_v52 = vmul.f32 0.5, %v4568_v61  ;;  %v4525_v16 = vpop.f32.mrb[99].mxu0  ;;  %v4566_v1 = vpop.f32.mrb[99].mxu1 }
 0x9f9   :  { %v4576_v53 = vmul.f32 0.5, %v4569_v41  ;;  %v4581_v37 = vmul.f32 0.5, %v4571_v7  ;;  %v4226_v7 = vadd.f32 %v9346_v0, %v9448_v49 }
 0x9fa   :  { %7643 = vtanh.f32 %v4572_v52 }
 0x9fb   :  { %7645 = vtanh.f32 %v4576_v53 }
 0x9fc   :  { %7647 = vtanh.f32 %v4570_v43 }
 0x9fd   :  { %7649 = vtanh.f32 %v4581_v37 }
 0xa04   :  { %v7644_v10 = vpop.eup %7643 }
 0xa05   :  { %v7646_v58 = vpop.eup %7645  ;;  %v4574_v9 = vmul.f32 0.5, %v7644_v10  ;;  %v4153_v10 = vadd.f32 %v9344_v51, %v9445_v46 }
 0xa06   :  { %v4578_v22 = vmul.f32 0.5, %v7646_v58  ;;  %v7648_v34 = vpop.eup %7647 }
 0xa07   :  { %v4575_v38 = vadd.f32 0.5, %v4574_v9  ;;  %v7650_v1 = vpop.eup %7649  ;;  %v4224_v9 = vadd.f32 %v9342_v63, %v9438_v50 }
 0xa08   :  { %v4579_v2 = vadd.f32 0.5, %v4578_v22  ;;  %v4583_v16 = vmul.f32 0.5, %v7650_v1  ;;  %v4151_v22 = vadd.f32 %v9340_v60, %v9435_v54 }
 0xa09   :  { %v4586_v26 = vmul.f32 %v7648_v34, %v4575_v38 }
 0xa0a   :  { %v4585_v12 = vmul.f32 0.0, %v4579_v2  ;;  %v4584_v31 = vadd.f32 0.5, %v4583_v16 }
 0xa0c   :  { %v9458_v19 = vadd.f32 %v4586_v26, %v4585_v12 }
 0xa0e   :  { %7651 = vtanh.f32 %v9458_v19 }
 0xa18   :  { %v7652_v40 = vpop.eup %7651 }
 0xa19   :  { %v4589_v32 = vmul.f32 %v7652_v40, %v4584_v31 }
 0xa1b   :  { %v4594_v43 = vpack.c.bf16 %v4589_v32, %v4589_v32 }
 0xa1d   :  { %4628 = vmatmul.mubr.bf16.vlgmr.msra.gmra.mrb[100].mxu0 %v4594_v43  ;;  %4669 = vmatmul.mubr.bf16.vlgmr.msra.gmra.mrb[100].mxu1 %v4594_v43 }
 0xa1e   :  { %4705 = vmatpush1.bf16.msra.mxu0 %v9147_v62  ;;  %4746 = vmatpush1.bf16.msra.mxu1 %v9152_v45 }
 0xa1f   :  { %4706 = vmatprep.subr.bf16.mxu0 %v9160_v6  ;;  %4747 = vmatprep.subr.bf16.mxu1 %v9165_v24 }
 0xa20   :  { %4736 = vmatprep.mubr.bf16.mxu0 %v10235_v48  ;;  %4777 = vmatprep.mubr.bf16.mxu1 %v10235_v48 }
 0xa22   :  { %4707 = vmatpush1.bf16.msra.mxu0 %v9170_v57  ;;  %4748 = vmatpush1.bf16.msra.mxu1 %v9175_v17 }
 0xa23   :  { %4708 = vmatprep.subr.bf16.mxu0 %v9184_v59  ;;  %4749 = vmatprep.subr.bf16.mxu1 %v9189_v44 }
 0xa26   :  { %4709 = vmatpush1.bf16.msra.mxu0 %v9194_v47  ;;  %4750 = vmatpush1.bf16.msra.mxu1 %v9199_v5 }
 0xa27   :  { %4710 = vmatprep.subr.bf16.mxu0 %v9206_v29  ;;  %4751 = vmatprep.subr.bf16.mxu1 %v9211_v33 }
 0xa2a   :  { %4711 = vmatpush1.bf16.msra.mxu0 %v9216_v30  ;;  %4752 = vmatpush1.bf16.msra.mxu1 %v9221_v14 }
 0xa2b   :  { %4712 = vmatprep.subr.bf16.mxu0 %v9232_v15  ;;  %4753 = vmatprep.subr.bf16.mxu1 %v9237_v39 }
 0xa2e   :  { %4713 = vmatpush1.bf16.msra.mxu0 %v9242_v13  ;;  %4754 = vmatpush1.bf16.msra.mxu1 %v9247_v3 }
 0xa2f   :  { %4714 = vmatprep.subr.bf16.mxu0 %v9256_v18  ;;  %4755 = vmatprep.subr.bf16.mxu1 %v9261_v20 }
 0xa32   :  { %4715 = vmatpush1.bf16.msra.mxu0 %v9266_v23  ;;  %4756 = vmatpush1.bf16.msra.mxu1 %v9271_v36 }
 0xa33   :  { %4716 = vmatprep.subr.bf16.mxu0 %v9280_v35  ;;  %4757 = vmatprep.subr.bf16.mxu1 %v9285_v56 }
 0xa36   :  { %4717 = vmatpush1.bf16.msra.mxu0 %v9290_v8  ;;  %4758 = vmatpush1.bf16.msra.mxu1 %v9295_v4 }
 0xa37   :  { %4718 = vmatprep.subr.bf16.mxu0 %v9304_v21  ;;  %4759 = vmatprep.subr.bf16.mxu1 %v9309_v27 }
 0xa3a   :  { %4719 = vmatpush1.bf16.msra.mxu0 %v9314_v28  ;;  %4760 = vmatpush1.bf16.msra.mxu1 %v9319_v42 }
 0xa3b   :  { %4813 = vmatprep.subr.bf16.mxu0 %v9136_v55  ;;  %4854 = vmatprep.subr.bf16.mxu1 %v9141_v25 }
 0xaf0   :  { %v4629_v61 = vpop.f32.mrb[100].mxu0  ;;  %v4670_v11 = vpop.f32.mrb[100].mxu1 }
 0xaf1   :  { %v4677_v41 = vadd.f32 %v4629_v61, %v4151_v22  ;;  %v4679_v52 = vadd.f32 %v4670_v11, %v4224_v9  ;;  %v4631_v53 = vpop.f32.mrb[101].mxu0  ;;  %v4672_v37 = vpop.f32.mrb[101].mxu1 }
 0xaf2   :  { %v4678_v58 = vadd.f32 %v4631_v53, %v4153_v10  ;;  %v4680_v38 = vadd.f32 %v4672_v37, %v4226_v7  ;;  %v4633_v34 = vpop.f32.mrb[102].mxu0  ;;  %v4674_v2 = vpop.f32.mrb[102].mxu1 }
 0xaf3   :  { %v4681_v60 = vmul.f32 0.5, %v4677_v41  ;;  %v4634_v26 = vpop.f32.mrb[103].mxu0  ;;  %v4675_v12 = vpop.f32.mrb[103].mxu1  ;;  %v10286_v34 = vld [vmem:[#allocation12_spill] sm:$0xff] }
 0xaf4   :  { %v4685_v63 = vmul.f32 0.5, %v4678_v58  ;;  %v4690_v51 = vmul.f32 0.5, %v4680_v38  ;;  %v10285_v58 = vld [vmem:[#allocation11_spill] sm:$0xff]  ;;  %v4159_v2 = vadd.f32 %v10286_v34, %v9445_v46 }
 0xaf5   :  { %7653 = vtanh.f32 %v4681_v60  ;;  %v4230_v38 = vadd.f32 %v10285_v58, %v9438_v50  ;;  %v10287_v60 = vld [vmem:[#allocation13_spill] sm:$0xff] }
 0xaf6   :  { %7655 = vtanh.f32 %v4685_v63  ;;  %v4232_v26 = vadd.f32 %v10287_v60, %v9448_v49 }
 0xaf7   :  { %7657 = vtanh.f32 %v4679_v52 }
 0xaf8   :  { %7659 = vtanh.f32 %v4690_v51 }
 0xaff   :  { %v7654_v1 = vpop.eup %7653 }
 0xb00   :  { %v7656_v0 = vpop.eup %7655  ;;  %v4683_v16 = vmul.f32 0.5, %v7654_v1 }
 0xb01   :  { %v4687_v31 = vmul.f32 0.5, %v7656_v0  ;;  %v7658_v32 = vpop.eup %7657 }
 0xb02   :  { %v4684_v40 = vadd.f32 0.5, %v4683_v16  ;;  %v7660_v7 = vpop.eup %7659 }
 0xb03   :  { %v4688_v43 = vadd.f32 0.5, %v4687_v31  ;;  %v4692_v61 = vmul.f32 0.5, %v7660_v7 }
 0xb04   :  { %v4695_v22 = vmul.f32 %v7658_v32, %v4684_v40 }
 0xb05   :  { %v4694_v9 = vmul.f32 %v4688_v43, %v9458_v19  ;;  %v4693_v11 = vadd.f32 0.5, %v4692_v61  ;;  %v10284_v19 = vld [vmem:[#allocation10_spill] sm:$0xff] }
 0xb06   :  { %v4157_v37 = vadd.f32 %v10284_v19, %v9435_v54 }
 0xb07   :  { %v9504_v10 = vadd.f32 %v4695_v22, %v4694_v9 }
 0xb09   :  { %7661 = vtanh.f32 %v9504_v10 }
 0xb13   :  { %v7662_v41 = vpop.eup %7661 }
 0xb14   :  { %v4698_v52 = vmul.f32 %v7662_v41, %v4693_v11 }
 0xb16   :  { %v4703_v53 = vpack.c.bf16 %v4698_v52, %v4698_v52 }
 0xb18   :  { %4737 = vmatmul.mubr.bf16.vlgmr.msra.gmra.mrb[104].mxu0 %v4703_v53  ;;  %4778 = vmatmul.mubr.bf16.vlgmr.msra.gmra.mrb[104].mxu1 %v4703_v53 }
 0xb19   :  { %4814 = vmatpush1.bf16.msra.mxu0 %v9147_v62  ;;  %4855 = vmatpush1.bf16.msra.mxu1 %v9152_v45 }
 0xb1a   :  { %4815 = vmatprep.subr.bf16.mxu0 %v9160_v6  ;;  %4856 = vmatprep.subr.bf16.mxu1 %v9165_v24 }
 0xb1b   :  { %4845 = vmatprep.mubr.bf16.mxu0 %v10235_v48  ;;  %4886 = vmatprep.mubr.bf16.mxu1 %v10235_v48 }
 0xb1d   :  { %4816 = vmatpush1.bf16.msra.mxu0 %v9170_v57  ;;  %4857 = vmatpush1.bf16.msra.mxu1 %v9175_v17 }
 0xb1e   :  { %4817 = vmatprep.subr.bf16.mxu0 %v9184_v59  ;;  %4858 = vmatprep.subr.bf16.mxu1 %v9189_v44 }
 0xb21   :  { %4818 = vmatpush1.bf16.msra.mxu0 %v9194_v47  ;;  %4859 = vmatpush1.bf16.msra.mxu1 %v9199_v5 }
 0xb22   :  { %4819 = vmatprep.subr.bf16.mxu0 %v9206_v29  ;;  %4860 = vmatprep.subr.bf16.mxu1 %v9211_v33 }
 0xb25   :  { %4820 = vmatpush1.bf16.msra.mxu0 %v9216_v30  ;;  %4861 = vmatpush1.bf16.msra.mxu1 %v9221_v14 }
 0xb26   :  { %4821 = vmatprep.subr.bf16.mxu0 %v9232_v15  ;;  %4862 = vmatprep.subr.bf16.mxu1 %v9237_v39 }
 0xb29   :  { %4822 = vmatpush1.bf16.msra.mxu0 %v9242_v13  ;;  %4863 = vmatpush1.bf16.msra.mxu1 %v9247_v3 }
 0xb2a   :  { %4823 = vmatprep.subr.bf16.mxu0 %v9256_v18  ;;  %4864 = vmatprep.subr.bf16.mxu1 %v9261_v20 }
 0xb2d   :  { %4824 = vmatpush1.bf16.msra.mxu0 %v9266_v23  ;;  %4865 = vmatpush1.bf16.msra.mxu1 %v9271_v36 }
 0xb2e   :  { %4825 = vmatprep.subr.bf16.mxu0 %v9280_v35  ;;  %4866 = vmatprep.subr.bf16.mxu1 %v9285_v56 }
 0xb31   :  { %4826 = vmatpush1.bf16.msra.mxu0 %v9290_v8  ;;  %4867 = vmatpush1.bf16.msra.mxu1 %v9295_v4 }
 0xb32   :  { %4827 = vmatprep.subr.bf16.mxu0 %v9304_v21  ;;  %4868 = vmatprep.subr.bf16.mxu1 %v9309_v27 }
 0xb35   :  { %4828 = vmatpush1.bf16.msra.mxu0 %v9314_v28  ;;  %4869 = vmatpush1.bf16.msra.mxu1 %v9319_v42 }
 0xb36   :  { %4922 = vmatprep.subr.bf16.mxu0 %v9136_v55  ;;  %4963 = vmatprep.subr.bf16.mxu1 %v9141_v25 }
 0xbeb   :  { %v4738_v12 = vpop.f32.mrb[104].mxu0  ;;  %v4779_v63 = vpop.f32.mrb[104].mxu1 }
 0xbec   :  { %v4786_v51 = vadd.f32 %v4738_v12, %v4157_v37  ;;  %v4788_v1 = vadd.f32 %v4779_v63, %v4230_v38  ;;  %v4740_v0 = vpop.f32.mrb[105].mxu0  ;;  %v4781_v16 = vpop.f32.mrb[105].mxu1 }
 0xbed   :  { %v4787_v31 = vadd.f32 %v4740_v0, %v4159_v2  ;;  %v4789_v40 = vadd.f32 %v4781_v16, %v4232_v26  ;;  %v4742_v32 = vpop.f32.mrb[106].mxu0  ;;  %v4783_v43 = vpop.f32.mrb[106].mxu1 }
 0xbee   :  { %v4790_v22 = vmul.f32 0.5, %v4786_v51  ;;  %v4743_v9 = vpop.f32.mrb[107].mxu0  ;;  %v4784_v7 = vpop.f32.mrb[107].mxu1  ;;  %v10290_v32 = vld [vmem:[#allocation16_spill] sm:$0xff] }
 0xbef   :  { %v4794_v61 = vmul.f32 0.5, %v4787_v31  ;;  %v4799_v11 = vmul.f32 0.5, %v4789_v40  ;;  %v10289_v31 = vld [vmem:[#allocation15_spill] sm:$0xff]  ;;  %v4163_v43 = vadd.f32 %v10290_v32, %v9445_v46 }
 0xbf0   :  { %7663 = vtanh.f32 %v4790_v22  ;;  %v4234_v40 = vadd.f32 %v10289_v31, %v9438_v50  ;;  %v10291_v22 = vld [vmem:[#allocation17_spill] sm:$0xff] }
 0xbf1   :  { %7665 = vtanh.f32 %v4794_v61  ;;  %v4236_v9 = vadd.f32 %v10291_v22, %v9448_v49 }
 0xbf2   :  { %7667 = vtanh.f32 %v4788_v1 }
 0xbf3   :  { %7669 = vtanh.f32 %v4799_v11 }
 0xbfa   :  { %v7664_v41 = vpop.eup %7663 }
 0xbfb   :  { %v7666_v52 = vpop.eup %7665  ;;  %v4792_v53 = vmul.f32 0.5, %v7664_v41 }
 0xbfc   :  { %v4796_v19 = vmul.f32 0.5, %v7666_v52  ;;  %v7668_v58 = vpop.eup %7667 }
 0xbfd   :  { %v4793_v37 = vadd.f32 0.5, %v4792_v53  ;;  %v7670_v26 = vpop.eup %7669 }
 0xbfe   :  { %v4797_v38 = vadd.f32 0.5, %v4796_v19  ;;  %v4801_v12 = vmul.f32 0.5, %v7670_v26 }
 0xbff   :  { %v4804_v34 = vmul.f32 %v7668_v58, %v4793_v37 }
 0xc00   :  { %v4803_v2 = vmul.f32 %v4797_v38, %v9504_v10  ;;  %v4802_v63 = vadd.f32 0.5, %v4801_v12  ;;  %v10288_v10 = vld [vmem:[#allocation14_spill] sm:$0xff] }
 0xc01   :  { %v4161_v16 = vadd.f32 %v10288_v10, %v9435_v54 }
 0xc02   :  { %v9550_v60 = vadd.f32 %v4804_v34, %v4803_v2 }
 0xc04   :  { %7671 = vtanh.f32 %v9550_v60 }
 0xc0e   :  { %v7672_v51 = vpop.eup %7671 }
 0xc0f   :  { %v4807_v1 = vmul.f32 %v7672_v51, %v4802_v63 }
 0xc11   :  { %v4812_v0 = vpack.c.bf16 %v4807_v1, %v4807_v1 }
 0xc13   :  { %4846 = vmatmul.mubr.bf16.vlgmr.msra.gmra.mrb[108].mxu0 %v4812_v0  ;;  %4887 = vmatmul.mubr.bf16.vlgmr.msra.gmra.mrb[108].mxu1 %v4812_v0 }
 0xc14   :  { %4923 = vmatpush1.bf16.msra.mxu0 %v9147_v62  ;;  %4964 = vmatpush1.bf16.msra.mxu1 %v9152_v45 }
 0xc15   :  { %4924 = vmatprep.subr.bf16.mxu0 %v9160_v6  ;;  %4965 = vmatprep.subr.bf16.mxu1 %v9165_v24 }
 0xc16   :  { %4954 = vmatprep.mubr.bf16.mxu0 %v10235_v48  ;;  %4995 = vmatprep.mubr.bf16.mxu1 %v10235_v48 }
 0xc18   :  { %4925 = vmatpush1.bf16.msra.mxu0 %v9170_v57  ;;  %4966 = vmatpush1.bf16.msra.mxu1 %v9175_v17 }
 0xc19   :  { %4926 = vmatprep.subr.bf16.mxu0 %v9184_v59  ;;  %4967 = vmatprep.subr.bf16.mxu1 %v9189_v44 }
 0xc1c   :  { %4927 = vmatpush1.bf16.msra.mxu0 %v9194_v47  ;;  %4968 = vmatpush1.bf16.msra.mxu1 %v9199_v5 }
 0xc1d   :  { %4928 = vmatprep.subr.bf16.mxu0 %v9206_v29  ;;  %4969 = vmatprep.subr.bf16.mxu1 %v9211_v33 }
 0xc20   :  { %4929 = vmatpush1.bf16.msra.mxu0 %v9216_v30  ;;  %4970 = vmatpush1.bf16.msra.mxu1 %v9221_v14 }
 0xc21   :  { %4930 = vmatprep.subr.bf16.mxu0 %v9232_v15  ;;  %4971 = vmatprep.subr.bf16.mxu1 %v9237_v39 }
 0xc24   :  { %4931 = vmatpush1.bf16.msra.mxu0 %v9242_v13  ;;  %4972 = vmatpush1.bf16.msra.mxu1 %v9247_v3 }
 0xc25   :  { %4932 = vmatprep.subr.bf16.mxu0 %v9256_v18  ;;  %4973 = vmatprep.subr.bf16.mxu1 %v9261_v20 }
 0xc28   :  { %4933 = vmatpush1.bf16.msra.mxu0 %v9266_v23  ;;  %4974 = vmatpush1.bf16.msra.mxu1 %v9271_v36 }
 0xc29   :  { %4934 = vmatprep.subr.bf16.mxu0 %v9280_v35  ;;  %4975 = vmatprep.subr.bf16.mxu1 %v9285_v56 }
 0xc2c   :  { %4935 = vmatpush1.bf16.msra.mxu0 %v9290_v8  ;;  %4976 = vmatpush1.bf16.msra.mxu1 %v9295_v4 }
 0xc2d   :  { %4936 = vmatprep.subr.bf16.mxu0 %v9304_v21  ;;  %4977 = vmatprep.subr.bf16.mxu1 %v9309_v27 }
 0xc30   :  { %4937 = vmatpush1.bf16.msra.mxu0 %v9314_v28  ;;  %4978 = vmatpush1.bf16.msra.mxu1 %v9319_v42 }
 0xc31   :  { %5031 = vmatprep.subr.bf16.mxu0 %v9136_v55  ;;  %5072 = vmatprep.subr.bf16.mxu1 %v9141_v25 }
 0xce6   :  { %v4847_v7 = vpop.f32.mrb[108].mxu0  ;;  %v4888_v61 = vpop.f32.mrb[108].mxu1 }
 0xce7   :  { %v4895_v11 = vadd.f32 %v4847_v7, %v4161_v16  ;;  %v4897_v41 = vadd.f32 %v4888_v61, %v4234_v40  ;;  %v4849_v52 = vpop.f32.mrb[109].mxu0  ;;  %v4890_v55 = vpop.f32.mrb[109].mxu1 }
 0xce8   :  { %v4896_v53 = vadd.f32 %v4849_v52, %v4163_v43  ;;  %v4898_v19 = vadd.f32 %v4890_v55, %v4236_v9  ;;  %v4851_v37 = vpop.f32.mrb[110].mxu0  ;;  %v4892_v58 = vpop.f32.mrb[110].mxu1 }
 0xce9   :  { %v4899_v38 = vmul.f32 0.5, %v4895_v11  ;;  %v4852_v34 = vpop.f32.mrb[111].mxu0  ;;  %v4893_v2 = vpop.f32.mrb[111].mxu1 }
 0xcea   :  { %v4903_v26 = vmul.f32 0.5, %v4896_v53  ;;  %v4908_v12 = vmul.f32 0.5, %v4898_v19 }
 0xceb   :  { %7673 = vtanh.f32 %v4899_v38 }
 0xcec   :  { %7675 = vtanh.f32 %v4903_v26 }
 0xced   :  { %7677 = vtanh.f32 %v4897_v41 }
 0xcee   :  { %7679 = vtanh.f32 %v4908_v12 }
 0xcf5   :  { %v7674_v63 = vpop.eup %7673 }
 0xcf6   :  { %v7676_v51 = vpop.eup %7675  ;;  %v4901_v1 = vmul.f32 0.5, %v7674_v63 }
 0xcf7   :  { %v4905_v0 = vmul.f32 0.5, %v7676_v51  ;;  %v7678_v16 = vpop.eup %7677 }
 0xcf8   :  { %v4902_v10 = vadd.f32 0.5, %v4901_v1  ;;  %v7680_v22 = vpop.eup %7679 }
 0xcf9   :  { %v4906_v31 = vadd.f32 0.5, %v4905_v0  ;;  %v4910_v9 = vmul.f32 0.5, %v7680_v22 }
 0xcfa   :  { %v4913_v40 = vmul.f32 %v7678_v16, %v4902_v10 }
 0xcfb   :  { %v4912_v32 = vmul.f32 %v4906_v31, %v9550_v60  ;;  %v4911_v7 = vadd.f32 0.5, %v4910_v9 }
 0xcfd   :  { %v9596_v43 = vadd.f32 %v4913_v40, %v4912_v32 }
 0xcff   :  { %7681 = vtanh.f32 %v9596_v43 }
 0xd09   :  { %v7682_v61 = vpop.eup %7681 }
 0xd0a   :  { %v4916_v11 = vmul.f32 %v7682_v61, %v4911_v7 }
 0xd0c   :  { %v4921_v41 = vpack.c.bf16 %v4916_v11, %v4916_v11  ;;  %v9653_v11 = vld [vmem:[%s10190_s7] ss:$16 sps:$4 sm:$0xff]  }
 0xd0e   :  { %4955 = vmatmul.mubr.bf16.vlgmr.msra.gmra.mrb[112].mxu0 %v4921_v41  ;;  %4996 = vmatmul.mubr.bf16.vlgmr.msra.gmra.mrb[112].mxu1 %v4921_v41  ;;  %v9665_v41 = vld [vmem:[%s10190_s7 + $0x24] ss:$16 sps:$4 sm:$0xff]  }
 0xd0f   :  { %5032 = vmatpush1.bf16.msra.mxu0 %v9147_v62  ;;  %5073 = vmatpush1.bf16.msra.mxu1 %v9152_v45  ;;  %v9634_v62 = vld [vmem:[%s10190_s7 + $0x4] ss:$16 sps:$4 sm:$0xff]   ;;  %v10292_v45 = vld [vmem:[#allocation18_spill] sm:$0xff] }
 0xd10   :  { %5033 = vmatprep.subr.bf16.mxu0 %v9160_v6  ;;  %5074 = vmatprep.subr.bf16.mxu1 %v9165_v24  ;;  %v4167_v6 = vadd.f32 %v10292_v45, %v9435_v54  ;;  %v10293_v24 = vld [vmem:[#allocation19_spill] sm:$0xff]  ;;  %v9671_v45 = vld [vmem:[%s10190_s7 + $0x2c] ss:$16 sps:$4 sm:$0xff]  }
 0xd11   :  { %5063 = vmatprep.mubr.bf16.mxu0 %v10235_v48  ;;  %5104 = vmatprep.mubr.bf16.mxu1 %v10235_v48 }
 0xd13   :  { %5034 = vmatpush1.bf16.msra.mxu0 %v9170_v57  ;;  %5075 = vmatpush1.bf16.msra.mxu1 %v9175_v17  ;;  %v4240_v57 = vadd.f32 %v10293_v24, %v9438_v50  ;;  %v10294_v17 = vld [vmem:[#allocation20_spill] sm:$0xff] }
 0xd14   :  { %5035 = vmatprep.subr.bf16.mxu0 %v9184_v59  ;;  %5076 = vmatprep.subr.bf16.mxu1 %v9189_v44  ;;  %v4169_v59 = vadd.f32 %v10294_v17, %v9445_v46  ;;  %v10295_v44 = vld [vmem:[#allocation21_spill] sm:$0xff]  ;;  %v9685_v24 = vld [vmem:[%s10190_s7 + $0x28] ss:$16 sps:$4 sm:$0xff]   ;;  %v9697_v17 = vld [vmem:[%s10190_s7 + $0x4c] ss:$16 sps:$4 sm:$0xff]  }
 0xd17   :  { %5036 = vmatpush1.bf16.msra.mxu0 %v9194_v47  ;;  %5077 = vmatpush1.bf16.msra.mxu1 %v9199_v5  ;;  %v4242_v47 = vadd.f32 %v10295_v44, %v9448_v49  ;;  %v9709_v44 = vld [vmem:[%s10190_s7 + $0x48] ss:$16 sps:$4 sm:$0xff]  }
 0xd18   :  { %5037 = vmatprep.subr.bf16.mxu0 %v9206_v29  ;;  %5078 = vmatprep.subr.bf16.mxu1 %v9211_v33 }
 0xd1b   :  { %5038 = vmatpush1.bf16.msra.mxu0 %v9216_v30  ;;  %5079 = vmatpush1.bf16.msra.mxu1 %v9221_v14 }
 0xd1c   :  { %5039 = vmatprep.subr.bf16.mxu0 %v9232_v15  ;;  %5080 = vmatprep.subr.bf16.mxu1 %v9237_v39 }
 0xd1f   :  { %5040 = vmatpush1.bf16.msra.mxu0 %v9242_v13  ;;  %5081 = vmatpush1.bf16.msra.mxu1 %v9247_v3 }
 0xd20   :  { %5041 = vmatprep.subr.bf16.mxu0 %v9256_v18  ;;  %5082 = vmatprep.subr.bf16.mxu1 %v9261_v20 }
 0xd23   :  { %5042 = vmatpush1.bf16.msra.mxu0 %v9266_v23  ;;  %5083 = vmatpush1.bf16.msra.mxu1 %v9271_v36 }
 0xd24   :  { %5043 = vmatprep.subr.bf16.mxu0 %v9280_v35  ;;  %5084 = vmatprep.subr.bf16.mxu1 %v9285_v56 }
 0xd27   :  { %5044 = vmatpush1.bf16.msra.mxu0 %v9290_v8  ;;  %5085 = vmatpush1.bf16.msra.mxu1 %v9295_v4 }
 0xd28   :  { %5045 = vmatprep.subr.bf16.mxu0 %v9304_v21  ;;  %5086 = vmatprep.subr.bf16.mxu1 %v9309_v27 }
 0xd2b   :  { %5046 = vmatpush1.bf16.msra.mxu0 %v9314_v28  ;;  %5087 = vmatpush1.bf16.msra.mxu1 %v9319_v42 }
 0xd2c   :  { %5140 = vmatprep.subr.bf16.mxu0 %v9634_v62  ;;  %5181 = vmatprep.subr.bf16.mxu1 %v9141_v25 }
 0xde1   :  { %v4956_v5 = vpop.f32.mrb[112].mxu0  ;;  %v4997_v29 = vpop.f32.mrb[112].mxu1 }
 0xde2   :  { %v5004_v33 = vadd.f32 %v4956_v5, %v4167_v6  ;;  %v5006_v30 = vadd.f32 %v4997_v29, %v4240_v57  ;;  %v4958_v14 = vpop.f32.mrb[113].mxu0  ;;  %v4999_v60 = vpop.f32.mrb[113].mxu1  ;;  %v9679_v6 = vld [vmem:[%s10190_s7 + $0x20] ss:$16 sps:$4 sm:$0xff]   ;;  %v9691_v57 = vld [vmem:[%s10190_s7 + $0x44] ss:$16 sps:$4 sm:$0xff]  }
 0xde3   :  { %v5005_v52 = vadd.f32 %v4958_v14, %v4169_v59  ;;  %v5007_v25 = vadd.f32 %v4999_v60, %v4242_v47  ;;  %v4960_v55 = vpop.f32.mrb[114].mxu0  ;;  %v5001_v53 = vpop.f32.mrb[114].mxu1  ;;  %v9703_v59 = vld [vmem:[%s10190_s7 + $0x40] ss:$16 sps:$4 sm:$0xff]   ;;  %v9715_v47 = vld [vmem:[%s10190_s7 + $0x64] ss:$16 sps:$4 sm:$0xff]  }
 0xde4   :  { %v5008_v19 = vmul.f32 0.5, %v5004_v33  ;;  %v4961_v37 = vpop.f32.mrb[115].mxu0  ;;  %v5002_v58 = vpop.f32.mrb[115].mxu1  ;;  %v9721_v5 = vld [vmem:[%s10190_s7 + $0x6c] ss:$16 sps:$4 sm:$0xff]  }
 0xde5   :  { %v5012_v38 = vmul.f32 0.5, %v5005_v52  ;;  %v5017_v34 = vmul.f32 0.5, %v5007_v25  ;;  %v9727_v29 = vld [vmem:[%s10190_s7 + $0x60] ss:$16 sps:$4 sm:$0xff]   ;;  %v9733_v33 = vld [vmem:[%s10190_s7 + $0x68] ss:$16 sps:$4 sm:$0xff]  }
 0xde6   :  { %7683 = vtanh.f32 %v5008_v19 }
 0xde7   :  { %7685 = vtanh.f32 %v5012_v38 }
 0xde8   :  { %7687 = vtanh.f32 %v5006_v30 }
 0xde9   :  { %7689 = vtanh.f32 %v5017_v34 }
 0xdf0   :  { %v7684_v2 = vpop.eup %7683 }
 0xdf1   :  { %v7686_v26 = vpop.eup %7685  ;;  %v5010_v12 = vmul.f32 0.5, %v7684_v2 }
 0xdf2   :  { %v5014_v63 = vmul.f32 0.5, %v7686_v26  ;;  %v7688_v1 = vpop.eup %7687 }
 0xdf3   :  { %v5011_v51 = vadd.f32 0.5, %v5010_v12  ;;  %v7690_v40 = vpop.eup %7689 }
 0xdf4   :  { %v5015_v0 = vadd.f32 0.5, %v5014_v63  ;;  %v5019_v32 = vmul.f32 0.5, %v7690_v40 }
 0xdf5   :  { %v5022_v10 = vmul.f32 %v7688_v1, %v5011_v51 }
 0xdf6   :  { %v5021_v16 = vmul.f32 %v5015_v0, %v9596_v43  ;;  %v5020_v22 = vadd.f32 0.5, %v5019_v32  ;;  %v9659_v43 = vld [vmem:[%s10190_s7 + $0x8] ss:$16 sps:$4 sm:$0xff]  }
 0xdf8   :  { %v9647_v31 = vadd.f32 %v5022_v10, %v5021_v16 }
 0xdfa   :  { %7691 = vtanh.f32 %v9647_v31 }
 0xe04   :  { %v7692_v9 = vpop.eup %7691 }
 0xe05   :  { %v5025_v7 = vmul.f32 %v7692_v9, %v5020_v22  ;;  %v7741_v22 = vld [vmem:[%s10190_s7 + $0x80] ss:$16 sps:$4 sm:$0xff]   ;;  %v7742_v9 = vld [vmem:[%s10190_s7 + $0x88] ss:$16 sps:$4 sm:$0xff]  }
 0xe07   :  { %v5030_v61 = vpack.c.bf16 %v5025_v7, %v5025_v7  ;;  %v7743_v7 = vld [vmem:[%s10190_s7 + $0xa4] ss:$16 sps:$4 sm:$0xff]  }
 0xe09   :  { %5064 = vmatmul.mubr.bf16.vlgmr.msra.gmra.mrb[116].mxu0 %v5030_v61  ;;  %5105 = vmatmul.mubr.bf16.vlgmr.msra.gmra.mrb[116].mxu1 %v5030_v61  ;;  %v7744_v61 = vld [vmem:[%s10190_s7 + $0xac] ss:$16 sps:$4 sm:$0xff]  }
 0xe0a   :  { %5141 = vmatpush1.bf16.msra.mxu0 %v9653_v11  ;;  %5182 = vmatpush1.bf16.msra.mxu1 %v9659_v43 }
 0xe0b   :  { %5142 = vmatprep.subr.bf16.mxu0 %v9665_v41  ;;  %5183 = vmatprep.subr.bf16.mxu1 %v9671_v45 }
 0xe0c   :  { %5172 = vmatprep.mubr.bf16.mxu0 %v10235_v48  ;;  %5213 = vmatprep.mubr.bf16.mxu1 %v10235_v48 }
 0xe0e   :  { %5143 = vmatpush1.bf16.msra.mxu0 %v9679_v6  ;;  %5184 = vmatpush1.bf16.msra.mxu1 %v9685_v24 }
 0xe0f   :  { %5144 = vmatprep.subr.bf16.mxu0 %v9691_v57  ;;  %5185 = vmatprep.subr.bf16.mxu1 %v9697_v17 }
 0xe12   :  { %5145 = vmatpush1.bf16.msra.mxu0 %v9703_v59  ;;  %5186 = vmatpush1.bf16.msra.mxu1 %v9709_v44 }
 0xe13   :  { %5146 = vmatprep.subr.bf16.mxu0 %v9715_v47  ;;  %5187 = vmatprep.subr.bf16.mxu1 %v9721_v5 }
 0xe16   :  { %5147 = vmatpush1.bf16.msra.mxu0 %v9727_v29  ;;  %5188 = vmatpush1.bf16.msra.mxu1 %v9733_v33 }
 0xe17   :  { %5148 = vmatprep.subr.bf16.mxu0 %v9232_v15  ;;  %5189 = vmatprep.subr.bf16.mxu1 %v9237_v39  ;;  %v7738_v15 = vld [vmem:[%s10190_s7 + $0xc] ss:$16 sps:$4 sm:$0xff]  }
 0xe18   :  { %v10296_v39 = vld [vmem:[#allocation22_spill] sm:$0xff] }
 0xe1a   :  { %5149 = vmatpush1.bf16.msra.mxu0 %v9242_v13  ;;  %5190 = vmatpush1.bf16.msra.mxu1 %v9247_v3  ;;  %v4171_v13 = vadd.f32 %v10296_v39, %v9435_v54  ;;  %v10297_v3 = vld [vmem:[#allocation23_spill] sm:$0xff] }
 0xe1b   :  { %5150 = vmatprep.subr.bf16.mxu0 %v9256_v18  ;;  %5191 = vmatprep.subr.bf16.mxu1 %v9261_v20  ;;  %v4244_v18 = vadd.f32 %v10297_v3, %v9438_v50  ;;  %v10298_v20 = vld [vmem:[#allocation24_spill] sm:$0xff] }
 0xe1e   :  { %5151 = vmatpush1.bf16.msra.mxu0 %v9266_v23  ;;  %5192 = vmatpush1.bf16.msra.mxu1 %v9271_v36  ;;  %v4173_v23 = vadd.f32 %v10298_v20, %v9445_v46  ;;  %v10299_v36 = vld [vmem:[#allocation25_spill] sm:$0xff] }
 0xe1f   :  { %5152 = vmatprep.subr.bf16.mxu0 %v9280_v35  ;;  %5193 = vmatprep.subr.bf16.mxu1 %v9285_v56  ;;  %v4246_v35 = vadd.f32 %v10299_v36, %v9448_v49 }
 0xe22   :  { %5153 = vmatpush1.bf16.msra.mxu0 %v9290_v8  ;;  %5194 = vmatpush1.bf16.msra.mxu1 %v9295_v4 }
 0xe23   :  { %5154 = vmatprep.subr.bf16.mxu0 %v9304_v21  ;;  %5195 = vmatprep.subr.bf16.mxu1 %v9309_v27 }
 0xe26   :  { %5155 = vmatpush1.bf16.msra.mxu0 %v9314_v28  ;;  %5196 = vmatpush1.bf16.msra.mxu1 %v9319_v42 }
 0xe27   :  { %5249 = vmatprep.subr.bf16.mxu0 %v9634_v62  ;;  %5290 = vmatprep.subr.bf16.mxu1 %v7738_v15  ;;  %v10301_v15 = vld [vmem:[#allocation27_spill] sm:$0xff] }
 0xe28   :  { %v4250_v39 = vadd.f32 %v10301_v15, %v9438_v50  ;;  %v7468_v15 = vld [vmem:[%s10192_s9 + $0xcc] ss:$16 sps:$4 sm:$0xff]  }
 0xedc   :  { %v5065_v56 = vpop.f32.mrb[116].mxu0  ;;  %v5106_v8 = vpop.f32.mrb[116].mxu1 }
 0xedd   :  { %v5113_v4 = vadd.f32 %v5065_v56, %v4171_v13  ;;  %v5115_v21 = vadd.f32 %v5106_v8, %v4244_v18  ;;  %v5067_v27 = vpop.f32.mrb[117].mxu0  ;;  %v5108_v28 = vpop.f32.mrb[117].mxu1  ;;  %v10302_v13 = vld [vmem:[#allocation28_spill] sm:$0xff]  ;;  %v10303_v18 = vld [vmem:[#allocation29_spill] sm:$0xff] }
 0xede   :  { %v5114_v42 = vadd.f32 %v5067_v27, %v4173_v23  ;;  %v5116_v62 = vadd.f32 %v5108_v28, %v4246_v35  ;;  %v5069_v30 = vpop.f32.mrb[118].mxu0  ;;  %v5110_v14 = vpop.f32.mrb[118].mxu1  ;;  %v4179_v3 = vadd.f32 %v10302_v13, %v9445_v46  ;;  %v4252_v20 = vadd.f32 %v10303_v18, %v9448_v49  ;;  %v7466_v13 = vld [vmem:[%s10192_s9 + $0xc8] ss:$16 sps:$4 sm:$0xff]   ;;  %v7474_v18 = vld [vmem:[%s10192_s9 + $0xec] ss:$16 sps:$4 sm:$0xff]  }
 0xedf   :  { %v5117_v60 = vmul.f32 0.5, %v5113_v4  ;;  %v5070_v52 = vpop.f32.mrb[119].mxu0  ;;  %v5111_v25 = vpop.f32.mrb[119].mxu1 }
 0xee0   :  { %v5121_v55 = vmul.f32 0.5, %v5114_v42  ;;  %v5126_v53 = vmul.f32 0.5, %v5116_v62 }
 0xee1   :  { %7693 = vtanh.f32 %v5117_v60 }
 0xee2   :  { %7695 = vtanh.f32 %v5121_v55 }
 0xee3   :  { %7697 = vtanh.f32 %v5115_v21 }
 0xee4   :  { %7699 = vtanh.f32 %v5126_v53 }
 0xeeb   :  { %v7694_v19 = vpop.eup %7693 }
 0xeec   :  { %v7696_v37 = vpop.eup %7695  ;;  %v5119_v58 = vmul.f32 0.5, %v7694_v19 }
 0xeed   :  { %v5123_v38 = vmul.f32 0.5, %v7696_v37  ;;  %v7698_v2 = vpop.eup %7697 }
 0xeee   :  { %v5120_v34 = vadd.f32 0.5, %v5119_v58  ;;  %v7700_v1 = vpop.eup %7699 }
 0xeef   :  { %v5124_v26 = vadd.f32 0.5, %v5123_v38  ;;  %v5128_v0 = vmul.f32 0.5, %v7700_v1 }
 0xef0   :  { %v5131_v12 = vmul.f32 %v7698_v2, %v5120_v34 }
 0xef1   :  { %v5130_v63 = vmul.f32 %v5124_v26, %v9647_v31  ;;  %v5129_v10 = vadd.f32 0.5, %v5128_v0  ;;  %v7740_v31 = vld [vmem:[%s10190_s7 + $0x8c] ss:$16 sps:$4 sm:$0xff]  }
 0xef3   :  { %v9765_v51 = vadd.f32 %v5131_v12, %v5130_v63 }
 0xef5   :  { %7701 = vtanh.f32 %v9765_v51 }
 0xeff   :  { %v7702_v16 = vpop.eup %7701 }
 0xf00   :  { %v5134_v40 = vmul.f32 %v7702_v16, %v5129_v10  ;;  %v7427_v16 = vld [vmem:[%s10192_s9] ss:$16 sps:$4 sm:$0xff]  }
 0xf02   :  { %v5139_v32 = vpack.c.bf16 %v5134_v40, %v5134_v40  ;;  %v7430_v40 = vld [vmem:[%s10192_s9 + $0x8] ss:$16 sps:$4 sm:$0xff]  }
 0xf04   :  { %5173 = vmatmul.mubr.bf16.vlgmr.msra.gmra.mrb[120].mxu0 %v5139_v32  ;;  %5214 = vmatmul.mubr.bf16.vlgmr.msra.gmra.mrb[120].mxu1 %v5139_v32 }
 0xf05   :  { %5250 = vmatpush1.bf16.msra.mxu0 %v9653_v11  ;;  %5291 = vmatpush1.bf16.msra.mxu1 %v9659_v43  ;;  %v7745_v11 = vld [vmem:[%s10190_s7 + $0xa0] ss:$16 sps:$4 sm:$0xff]   ;;  %v7746_v43 = vld [vmem:[%s10190_s7 + $0xa8] ss:$16 sps:$4 sm:$0xff]  }
 0xf06   :  { %5251 = vmatprep.subr.bf16.mxu0 %v9665_v41  ;;  %5292 = vmatprep.subr.bf16.mxu1 %v9671_v45  ;;  %v7747_v41 = vld [vmem:[%s10190_s7 + $0xc4] ss:$16 sps:$4 sm:$0xff]   ;;  %v7748_v45 = vld [vmem:[%s10190_s7 + $0xcc] ss:$16 sps:$4 sm:$0xff]  }
 0xf07   :  { %5281 = vmatprep.mubr.bf16.mxu0 %v10235_v48  ;;  %5322 = vmatprep.mubr.bf16.mxu1 %v10235_v48  ;;  %v7739_v48 = vld [vmem:[%s10190_s7 + $0x84] ss:$16 sps:$4 sm:$0xff]  }
 0xf09   :  { %5252 = vmatpush1.bf16.msra.mxu0 %v9679_v6  ;;  %5293 = vmatpush1.bf16.msra.mxu1 %v9685_v24  ;;  %v7749_v6 = vld [vmem:[%s10190_s7 + $0xc0] ss:$16 sps:$4 sm:$0xff]   ;;  %v7750_v24 = vld [vmem:[%s10190_s7 + $0xc8] ss:$16 sps:$4 sm:$0xff]  }
 0xf0a   :  { %5253 = vmatprep.subr.bf16.mxu0 %v9691_v57  ;;  %5294 = vmatprep.subr.bf16.mxu1 %v9697_v17  ;;  %v7751_v57 = vld [vmem:[%s10190_s7 + $0xe4] ss:$16 sps:$4 sm:$0xff]   ;;  %v7752_v17 = vld [vmem:[%s10190_s7 + $0xec] ss:$16 sps:$4 sm:$0xff]  }
 0xf0d   :  { %5254 = vmatpush1.bf16.msra.mxu0 %v9703_v59  ;;  %5295 = vmatpush1.bf16.msra.mxu1 %v9709_v44  ;;  %v7753_v59 = vld [vmem:[%s10190_s7 + $0xe0] ss:$16 sps:$4 sm:$0xff]   ;;  %v7754_v44 = vld [vmem:[%s10190_s7 + $0xe8] ss:$16 sps:$4 sm:$0xff]  }
 0xf0e   :  { %5255 = vmatprep.subr.bf16.mxu0 %v9715_v47  ;;  %5296 = vmatprep.subr.bf16.mxu1 %v9721_v5  ;;  %v7429_v47 = vld [vmem:[%s10192_s9 + $0x4] ss:$16 sps:$4 sm:$0xff]   ;;  %v7432_v5 = vld [vmem:[%s10192_s9 + $0xc] ss:$16 sps:$4 sm:$0xff]  }
 0xf11   :  { %5256 = vmatpush1.bf16.msra.mxu0 %v9727_v29  ;;  %5297 = vmatpush1.bf16.msra.mxu1 %v9733_v33  ;;  %v10300_v29 = vld [vmem:[#allocation26_spill] sm:$0xff] }
 0xf12   :  { %5257 = vmatprep.subr.bf16.mxu0 %v7739_v48  ;;  %5298 = vmatprep.subr.bf16.mxu1 %v7740_v31  ;;  %v4177_v33 = vadd.f32 %v10300_v29, %v9435_v54  ;;  %v7438_v48 = vld [vmem:[%s10192_s9 + $0x2c] ss:$16 sps:$4 sm:$0xff]   ;;  %v7433_v31 = vld [vmem:[%s10192_s9 + $0x20] ss:$16 sps:$4 sm:$0xff]   ;;  %v7460_v29 = vld [vmem:[%s10192_s9 + $0xa8] ss:$16 sps:$4 sm:$0xff]  }
 0xf15   :  { %5258 = vmatpush1.bf16.msra.mxu0 %v7741_v22  ;;  %5299 = vmatpush1.bf16.msra.mxu1 %v7742_v9  ;;  %v7436_v22 = vld [vmem:[%s10192_s9 + $0x28] ss:$16 sps:$4 sm:$0xff]   ;;  %v7441_v9 = vld [vmem:[%s10192_s9 + $0x44] ss:$16 sps:$4 sm:$0xff]  }
 0xf16   :  { %5259 = vmatprep.subr.bf16.mxu0 %v7743_v7  ;;  %5300 = vmatprep.subr.bf16.mxu1 %v7744_v61  ;;  %v7444_v7 = vld [vmem:[%s10192_s9 + $0x4c] ss:$16 sps:$4 sm:$0xff]   ;;  %v7439_v61 = vld [vmem:[%s10192_s9 + $0x40] ss:$16 sps:$4 sm:$0xff]  }
 0xf19   :  { %5260 = vmatpush1.bf16.msra.mxu0 %v7745_v11  ;;  %5301 = vmatpush1.bf16.msra.mxu1 %v7746_v43  ;;  %v7442_v11 = vld [vmem:[%s10192_s9 + $0x48] ss:$16 sps:$4 sm:$0xff]   ;;  %v7447_v43 = vld [vmem:[%s10192_s9 + $0x64] ss:$16 sps:$4 sm:$0xff]  }
 0xf1a   :  { %5261 = vmatprep.subr.bf16.mxu0 %v7747_v41  ;;  %5302 = vmatprep.subr.bf16.mxu1 %v7748_v45  ;;  %v7450_v41 = vld [vmem:[%s10192_s9 + $0x6c] ss:$16 sps:$4 sm:$0xff]   ;;  %v7445_v45 = vld [vmem:[%s10192_s9 + $0x60] ss:$16 sps:$4 sm:$0xff]  }
 0xf1d   :  { %5262 = vmatpush1.bf16.msra.mxu0 %v7749_v6  ;;  %5303 = vmatpush1.bf16.msra.mxu1 %v7750_v24  ;;  %v7448_v6 = vld [vmem:[%s10192_s9 + $0x68] ss:$16 sps:$4 sm:$0xff]   ;;  %v7453_v24 = vld [vmem:[%s10192_s9 + $0x84] ss:$16 sps:$4 sm:$0xff]  }
 0xf1e   :  { %5263 = vmatprep.subr.bf16.mxu0 %v7751_v57  ;;  %5304 = vmatprep.subr.bf16.mxu1 %v7752_v17  ;;  %v7456_v57 = vld [vmem:[%s10192_s9 + $0x8c] ss:$16 sps:$4 sm:$0xff]   ;;  %v7451_v17 = vld [vmem:[%s10192_s9 + $0x80] ss:$16 sps:$4 sm:$0xff]  }
 0xf21   :  { %5264 = vmatpush1.bf16.msra.mxu0 %v7753_v59  ;;  %5305 = vmatpush1.bf16.msra.mxu1 %v7754_v44  ;;  %v7454_v59 = vld [vmem:[%s10192_s9 + $0x88] ss:$16 sps:$4 sm:$0xff]   ;;  %v7459_v44 = vld [vmem:[%s10192_s9 + $0xa4] ss:$16 sps:$4 sm:$0xff]  }
 0xf22   :  { %5762 = vmatprep.subr.bf16.mxu0 %v7429_v47  ;;  %5803 = vmatprep.subr.bf16.mxu1 %v7432_v5  ;;  %v7462_v47 = vld [vmem:[%s10192_s9 + $0xac] ss:$16 sps:$4 sm:$0xff]   ;;  %v7457_v5 = vld [vmem:[%s10192_s9 + $0xa0] ss:$16 sps:$4 sm:$0xff]  }
 0xfd7   :  { %v5174_v23 = vpop.f32.mrb[120].mxu0  ;;  %v5215_v36 = vpop.f32.mrb[120].mxu1 }
 0xfd8   :  { %v5222_v35 = vadd.f32 %v5174_v23, %v4177_v33  ;;  %v5224_v56 = vadd.f32 %v5215_v36, %v4250_v39  ;;  %v5176_v8 = vpop.f32.mrb[121].mxu0  ;;  %v5217_v4 = vpop.f32.mrb[121].mxu1  ;;  %v7465_v33 = vld [vmem:[%s10192_s9 + $0xc4] ss:$16 sps:$4 sm:$0xff]   ;;  %v7463_v39 = vld [vmem:[%s10192_s9 + $0xc0] ss:$16 sps:$4 sm:$0xff]  }
 0xfd9   :  { %v5223_v21 = vadd.f32 %v5176_v8, %v4179_v3  ;;  %v5225_v27 = vadd.f32 %v5217_v4, %v4252_v20  ;;  %v5178_v28 = vpop.f32.mrb[122].mxu0  ;;  %v5219_v42 = vpop.f32.mrb[122].mxu1  ;;  %v7471_v3 = vld [vmem:[%s10192_s9 + $0xe4] ss:$16 sps:$4 sm:$0xff]   ;;  %v7469_v20 = vld [vmem:[%s10192_s9 + $0xe0] ss:$16 sps:$4 sm:$0xff]  }
 0xfda   :  { %v5226_v62 = vmul.f32 0.5, %v5222_v35  ;;  %v5179_v30 = vpop.f32.mrb[123].mxu0  ;;  %v5220_v14 = vpop.f32.mrb[123].mxu1  ;;  %v7472_v23 = vld [vmem:[%s10192_s9 + $0xe8] ss:$16 sps:$4 sm:$0xff]  }
 0xfdb   :  { %v5230_v60 = vmul.f32 0.5, %v5223_v21  ;;  %v5235_v52 = vmul.f32 0.5, %v5225_v27  ;;  %v7477_v36 = vld [vmem:[%s10192_s9 + $0x104] ss:$16 sps:$4 sm:$0xff]   ;;  %v7480_v35 = vld [vmem:[%s10192_s9 + $0x10c] ss:$16 sps:$4 sm:$0xff]  }
 0xfdc   :  { %7703 = vtanh.f32 %v5226_v62  ;;  %v7478_v8 = vld [vmem:[%s10192_s9 + $0x108] ss:$16 sps:$4 sm:$0xff]   ;;  %v7483_v4 = vld [vmem:[%s10192_s9 + $0x124] ss:$16 sps:$4 sm:$0xff]   ;;  %v7486_v21 = vld [vmem:[%s10192_s9 + $0x12c] ss:$16 sps:$4 sm:$0xff]  }
 0xfdd   :  { %7705 = vtanh.f32 %v5230_v60  ;;  %v7481_v27 = vld [vmem:[%s10192_s9 + $0x120] ss:$16 sps:$4 sm:$0xff]   ;;  %v7484_v28 = vld [vmem:[%s10192_s9 + $0x128] ss:$16 sps:$4 sm:$0xff]   ;;  %v7489_v42 = vld [vmem:[%s10192_s9 + $0x144] ss:$16 sps:$4 sm:$0xff]  }
 0xfde   :  { %7707 = vtanh.f32 %v5224_v56  ;;  %v7475_v56 = vld [vmem:[%s10192_s9 + $0x100] ss:$16 sps:$4 sm:$0xff]   ;;  %v7492_v62 = vld [vmem:[%s10192_s9 + $0x14c] ss:$16 sps:$4 sm:$0xff]   ;;  %v7490_v14 = vld [vmem:[%s10192_s9 + $0x148] ss:$16 sps:$4 sm:$0xff]  }
 0xfdf   :  { %7709 = vtanh.f32 %v5235_v52  ;;  %v7487_v30 = vld [vmem:[%s10192_s9 + $0x140] ss:$16 sps:$4 sm:$0xff]   ;;  %v7495_v60 = vld [vmem:[%s10192_s9 + $0x164] ss:$16 sps:$4 sm:$0xff]   ;;  %v7498_v52 = vld [vmem:[%s10192_s9 + $0x16c] ss:$16 sps:$4 sm:$0xff]  }
 0xfe6   :  { %v7704_v25 = vpop.eup %7703 }
 0xfe7   :  { %v7706_v55 = vpop.eup %7705  ;;  %v5228_v53 = vmul.f32 0.5, %v7704_v25  ;;  %v7493_v25 = vld [vmem:[%s10192_s9 + $0x160] ss:$16 sps:$4 sm:$0xff]  }
 0xfe8   :  { %v5232_v19 = vmul.f32 0.5, %v7706_v55  ;;  %v7708_v58 = vpop.eup %7707  ;;  %v7496_v55 = vld [vmem:[%s10192_s9 + $0x168] ss:$16 sps:$4 sm:$0xff]  }
 0xfe9   :  { %v5229_v37 = vadd.f32 0.5, %v5228_v53  ;;  %v7710_v12 = vpop.eup %7709  ;;  %v7501_v53 = vld [vmem:[%s10192_s9 + $0x184] ss:$16 sps:$4 sm:$0xff]  }
 0xfea   :  { %v5233_v38 = vadd.f32 0.5, %v5232_v19  ;;  %v5237_v63 = vmul.f32 0.5, %v7710_v12  ;;  %v7504_v19 = vld [vmem:[%s10192_s9 + $0x18c] ss:$16 sps:$4 sm:$0xff]   ;;  %v7508_v12 = vld [vmem:[%s10192_s9 + $0x1a8] ss:$16 sps:$4 sm:$0xff]  }
 0xfeb   :  { %v5240_v34 = vmul.f32 %v7708_v58, %v5229_v37  ;;  %v7499_v37 = vld [vmem:[%s10192_s9 + $0x180] ss:$16 sps:$4 sm:$0xff]   ;;  %v7502_v58 = vld [vmem:[%s10192_s9 + $0x188] ss:$16 sps:$4 sm:$0xff]  }
 0xfec   :  { %v5239_v2 = vmul.f32 %v5233_v38, %v9765_v51  ;;  %v5238_v1 = vadd.f32 0.5, %v5237_v63  ;;  %v7435_v51 = vld [vmem:[%s10192_s9 + $0x24] ss:$16 sps:$4 sm:$0xff]  }
 0xfed   :  { %v7507_v38 = vld [vmem:[%s10192_s9 + $0x1a4] ss:$16 sps:$4 sm:$0xff]  }
 0xfee   :  { %v9847_v26 = vadd.f32 %v5240_v34, %v5239_v2  ;;  %v7510_v34 = vld [vmem:[%s10192_s9 + $0x1ac] ss:$16 sps:$4 sm:$0xff]   ;;  %v7505_v2 = vld [vmem:[%s10192_s9 + $0x1a0] ss:$16 sps:$4 sm:$0xff]   ;;  %v7513_v63 = vld [vmem:[%s10192_s9 + $0x1c4] ss:$16 sps:$4 sm:$0xff]  }
 0xff0   :  { %7711 = vtanh.f32 %v9847_v26 }
 0xffa   :  { %v7712_v0 = vpop.eup %7711 }
 0xffb   :  { %v5243_v10 = vmul.f32 %v7712_v0, %v5238_v1  ;;  %v7516_v1 = vld [vmem:[%s10192_s9 + $0x1cc] ss:$16 sps:$4 sm:$0xff]   ;;  %v7511_v0 = vld [vmem:[%s10192_s9 + $0x1c0] ss:$16 sps:$4 sm:$0xff]  }
 0xffd   :  { %v5248_v32 = vpack.c.bf16 %v5243_v10, %v5243_v10  ;;  %v7514_v10 = vld [vmem:[%s10192_s9 + $0x1c8] ss:$16 sps:$4 sm:$0xff]  }
 0xfff   :  { %5282 = vmatmul.mubr.bf16.vlgmr.msra.gmra.mrb[124].mxu0 %v5248_v32  ;;  %5323 = vmatmul.mubr.bf16.vlgmr.msra.gmra.mrb[124].mxu1 %v5248_v32  ;;  %v7517_v32 = vld [vmem:[%s10192_s9 + $0x1e0] ss:$16 sps:$4 sm:$0xff]  }
0x1000   :  { %5763 = vmatpush1.bf16.msra.mxu0 %v7427_v16  ;;  %5804 = vmatpush1.bf16.msra.mxu1 %v7430_v40  ;;  %v7519_v16 = vld [vmem:[%s10192_s9 + $0x1e4] ss:$16 sps:$4 sm:$0xff]   ;;  %v7522_v40 = vld [vmem:[%s10192_s9 + $0x1ec] ss:$16 sps:$4 sm:$0xff]  }
0x1001   :  { %5764 = vmatprep.subr.bf16.mxu0 %v7435_v51  ;;  %5805 = vmatprep.subr.bf16.mxu1 %v7438_v48  ;;  %v7520_v51 = vld [vmem:[%s10192_s9 + $0x1e8] ss:$16 sps:$4 sm:$0xff]   ;;  %v7523_v48 = vld [vmem:[%s10193_s11 + $0x40] sm:$0xff]  }
0x1004   :  { %5765 = vmatpush1.bf16.msra.mxu0 %v7433_v31  ;;  %5806 = vmatpush1.bf16.msra.mxu1 %v7436_v22  ;;  %v7524_v31 = vld [vmem:[%s10193_s11 + $0xc0] sm:$0xff]   ;;  %v10304_v22 = vld [vmem:[#allocation30_spill] sm:$0xff] }
0x1005   :  { %5766 = vmatprep.subr.bf16.mxu0 %v7441_v9  ;;  %5807 = vmatprep.subr.bf16.mxu1 %v7444_v7  ;;  %v4181_v9 = vadd.f32 %v10304_v22, %v9435_v54  ;;  %v10305_v7 = vld [vmem:[#allocation31_spill] sm:$0xff] }
0x1006   :  { %v7548_v22 = vld [vmem:[%s10193_s11 + $0xf0] sm:$0xff]  }
0x1008   :  { %5767 = vmatpush1.bf16.msra.mxu0 %v7439_v61  ;;  %5808 = vmatpush1.bf16.msra.mxu1 %v7442_v11  ;;  %v4254_v61 = vadd.f32 %v10305_v7, %v9438_v50  ;;  %v10306_v11 = vld [vmem:[#allocation32_spill] sm:$0xff]  ;;  %v7550_v7 = vld [vmem:[%s10193_s11 + $0xb0] sm:$0xff]  }
0x1009   :  { %5768 = vmatprep.subr.bf16.mxu0 %v7447_v43  ;;  %5809 = vmatprep.subr.bf16.mxu1 %v7450_v41  ;;  %v4183_v43 = vadd.f32 %v10306_v11, %v9445_v46  ;;  %v10307_v41 = vld [vmem:[#allocation33_spill] sm:$0xff]  ;;  %v7552_v11 = vld [vmem:[%s10193_s11 + $0xf8] sm:$0xff]  }
0x100c   :  { %5769 = vmatpush1.bf16.msra.mxu0 %v7445_v45  ;;  %5810 = vmatpush1.bf16.msra.mxu1 %v7448_v6  ;;  %v4256_v45 = vadd.f32 %v10307_v41, %v9448_v49  ;;  %v7554_v41 = vld [vmem:[%s10193_s11 + $0xb8] sm:$0xff]  }
0x100d   :  { %5770 = vmatprep.subr.bf16.mxu0 %v7453_v24  ;;  %5811 = vmatprep.subr.bf16.mxu1 %v7456_v57 }
0x1010   :  { %5771 = vmatpush1.bf16.msra.mxu0 %v7451_v17  ;;  %5812 = vmatpush1.bf16.msra.mxu1 %v7454_v59 }
0x1011   :  { %5772 = vmatprep.subr.bf16.mxu0 %v7459_v44  ;;  %5813 = vmatprep.subr.bf16.mxu1 %v7462_v47 }
0x1014   :  { %5773 = vmatpush1.bf16.msra.mxu0 %v7457_v5  ;;  %5814 = vmatpush1.bf16.msra.mxu1 %v7460_v29 }
0x1015   :  { %5774 = vmatprep.subr.bf16.mxu0 %v7465_v33  ;;  %5815 = vmatprep.subr.bf16.mxu1 %v7468_v15 }
0x1018   :  { %5775 = vmatpush1.bf16.msra.mxu0 %v7463_v39  ;;  %5816 = vmatpush1.bf16.msra.mxu1 %v7466_v13 }
0x1019   :  { %5776 = vmatprep.subr.bf16.mxu0 %v7471_v3  ;;  %5817 = vmatprep.subr.bf16.mxu1 %v7474_v18 }
0x101c   :  { %5777 = vmatpush1.bf16.msra.mxu0 %v7469_v20  ;;  %5818 = vmatpush1.bf16.msra.mxu1 %v7472_v23 }
0x101d   :  { %5778 = vmatprep.subr.bf16.mxu0 %v7477_v36  ;;  %5819 = vmatprep.subr.bf16.mxu1 %v7480_v35 }
0x1020   :  { %5779 = vmatpush1.bf16.msra.mxu0 %v7475_v56  ;;  %5820 = vmatpush1.bf16.msra.mxu1 %v7478_v8 }
0x1021   :  { %5780 = vmatprep.subr.bf16.mxu0 %v7483_v4  ;;  %5821 = vmatprep.subr.bf16.mxu1 %v7486_v21 }
0x1024   :  { %5781 = vmatpush1.bf16.msra.mxu0 %v7481_v27  ;;  %5822 = vmatpush1.bf16.msra.mxu1 %v7484_v28 }
0x1025   :  { %5782 = vmatprep.subr.bf16.mxu0 %v7489_v42  ;;  %5823 = vmatprep.subr.bf16.mxu1 %v7492_v62 }
0x1028   :  { %5783 = vmatpush1.bf16.msra.mxu0 %v7487_v30  ;;  %5824 = vmatpush1.bf16.msra.mxu1 %v7490_v14  ;;  %v7525_v30 = vld [vmem:[%s10193_s11] sm:$0xff]  }
0x1029   :  { %5784 = vmatprep.subr.bf16.mxu0 %v7495_v60  ;;  %5825 = vmatprep.subr.bf16.mxu1 %v7498_v52  ;;  %v7526_v14 = vld [vmem:[%s10193_s11 + $0x80] sm:$0xff]  }
0x102a   :  { %v10308_v60 = vld [vmem:[#allocation5_spill] sm:$0xff] }
0x102b   :  { %v5354_v52 = vpack.c.bf16 %v10308_v60, %v10308_v60  ;;  %v7559_v60 = vld [vmem:[%s10194_s13 + $0x20] sm:$0xff]  }
0x102c   :  { %5785 = vmatpush1.bf16.msra.mxu0 %v7493_v25  ;;  %5826 = vmatpush1.bf16.msra.mxu1 %v7496_v55  ;;  %v7528_v25 = vld [vmem:[%s10193_s11 + $0xc8] sm:$0xff]  }
0x102d   :  { %5786 = vmatprep.subr.bf16.mxu0 %v7501_v53  ;;  %5827 = vmatprep.subr.bf16.mxu1 %v7504_v19  ;;  %v7529_v55 = vld [vmem:[%s10193_s11 + $0x8] sm:$0xff]   ;;  %v7531_v19 = vld [vmem:[%s10193_s11 + $0x50] sm:$0xff]  }
0x102e   :  { %v7530_v53 = vld [vmem:[%s10193_s11 + $0x88] sm:$0xff]  }
0x1030   :  { %5787 = vmatpush1.bf16.msra.mxu0 %v7499_v37  ;;  %5828 = vmatpush1.bf16.msra.mxu1 %v7502_v58  ;;  %v7532_v37 = vld [vmem:[%s10193_s11 + $0xd0] sm:$0xff]  }
0x1031   :  { %5788 = vmatprep.subr.bf16.mxu0 %v7507_v38  ;;  %5829 = vmatprep.subr.bf16.mxu1 %v7510_v34  ;;  %v7533_v58 = vld [vmem:[%s10193_s11 + $0x10] sm:$0xff]   ;;  %v7535_v34 = vld [vmem:[%s10193_s11 + $0x58] sm:$0xff]  }
0x1032   :  { %v7534_v38 = vld [vmem:[%s10193_s11 + $0x90] sm:$0xff]  }
0x1034   :  { %5789 = vmatpush1.bf16.msra.mxu0 %v7505_v2  ;;  %5830 = vmatpush1.bf16.msra.mxu1 %v7508_v12  ;;  %v7536_v2 = vld [vmem:[%s10193_s11 + $0xd8] sm:$0xff]  }
0x1035   :  { %5790 = vmatprep.subr.bf16.mxu0 %v7513_v63  ;;  %5831 = vmatprep.subr.bf16.mxu1 %v7516_v1  ;;  %v7537_v12 = vld [vmem:[%s10193_s11 + $0x18] sm:$0xff]   ;;  %v7539_v1 = vld [vmem:[%s10193_s11 + $0x60] sm:$0xff]  }
0x1036   :  { %v7538_v63 = vld [vmem:[%s10193_s11 + $0x98] sm:$0xff]  }
0x1038   :  { %5791 = vmatpush1.bf16.msra.mxu0 %v7511_v0  ;;  %5832 = vmatpush1.bf16.msra.mxu1 %v7514_v10  ;;  %v7540_v0 = vld [vmem:[%s10193_s11 + $0xe0] sm:$0xff]  }
0x1039   :  { %5792 = vmatprep.subr.bf16.mxu0 %v7519_v16  ;;  %5833 = vmatprep.subr.bf16.mxu1 %v7522_v40  ;;  %v7541_v10 = vld [vmem:[%s10193_s11 + $0x20] sm:$0xff]   ;;  %v7543_v40 = vld [vmem:[%s10193_s11 + $0x68] sm:$0xff]  }
0x103a   :  { %v7542_v16 = vld [vmem:[%s10193_s11 + $0xa0] sm:$0xff]  }
0x103c   :  { %5793 = vmatpush1.bf16.msra.mxu0 %v7517_v32  ;;  %5834 = vmatpush1.bf16.msra.mxu1 %v7520_v51  ;;  %v7544_v32 = vld [vmem:[%s10193_s11 + $0xe8] sm:$0xff]  }
0x103d   :  { %7035 = vmatprep.subr.bf16.mxu0 %v7523_v48  ;;  %7057 = vmatprep.subr.bf16.mxu1 %v7524_v31  ;;  %v7545_v51 = vld [vmem:[%s10193_s11 + $0x28] sm:$0xff]   ;;  %v7547_v31 = vld [vmem:[%s10193_s11 + $0x70] sm:$0xff]  }
0x103e   :  { %v7546_v48 = vld [vmem:[%s10193_s11 + $0xa8] sm:$0xff]  }
0x10d2   :  { %v5283_v6 = vpop.f32.mrb[124].mxu0  ;;  %v5324_v24 = vpop.f32.mrb[124].mxu1 }
0x10d3   :  { %v5331_v57 = vadd.f32 %v5283_v6, %v4181_v9  ;;  %v5333_v17 = vadd.f32 %v5324_v24, %v4254_v61  ;;  %v5285_v59 = vpop.f32.mrb[125].mxu0  ;;  %v5326_v44 = vpop.f32.mrb[125].mxu1  ;;  %v7549_v9 = vld [vmem:[%s10193_s11 + $0x30] sm:$0xff]   ;;  %v7551_v61 = vld [vmem:[%s10193_s11 + $0x78] sm:$0xff]   ;;  %v5420_v6 = vld [vmem:[%s10195_s10] sm:$0xf] }
0x10d4   :  { %v5332_v47 = vadd.f32 %v5285_v59, %v4183_v43  ;;  %v5334_v5 = vadd.f32 %v5326_v44, %v4256_v45  ;;  %v5287_v29 = vpop.f32.mrb[126].mxu0  ;;  %v5328_v33 = vpop.f32.mrb[126].mxu1  ;;  %v7553_v43 = vld [vmem:[%s10193_s11 + $0x38] sm:$0xff]   ;;  %v7756_v45 = vmov 0.0   ;;  %v10309_v24 = vld [vmem:[#allocation6_spill] sm:$0xff] }
0x10d5   :  { %v5335_v54 = vmul.f32 0.5, %v5331_v57  ;;  %v5288_v15 = vpop.f32.mrb[127].mxu0  ;;  %v5329_v39 = vpop.f32.mrb[127].mxu1  ;;  %v5425_v57 = vrot.slane %v5420_v6, %v10309_v24  ;;  %v10311_v44 = vld [vmem:[#allocation8_spill] sm:$0xff] }
0x10d6   :  { %v5339_v50 = vmul.f32 0.5, %v5332_v47  ;;  %v5344_v46 = vmul.f32 0.5, %v5334_v5  ;;  %v5429_v47 = vrot.slane %v5420_v6, %v10311_v44  ;;  %v10312_v5 = vld [vmem:[#allocation9_spill] sm:$0xff] }
0x10d7   :  { %7713 = vtanh.f32 %v5335_v54  ;;  %v5437_v29 = vrot.slane %v5420_v6, %v10312_v5 }
0x10d8   :  { %7715 = vtanh.f32 %v5339_v50 }
0x10d9   :  { %7717 = vtanh.f32 %v5333_v17  ;;  %v10310_v17 = vld [vmem:[#allocation7_spill] sm:$0xff] }
0x10da   :  { %7719 = vtanh.f32 %v5344_v46  ;;  %v5433_v59 = vrot.slane %v5420_v6, %v10310_v17 }
0x10e1   :  { %v7714_v13 = vpop.eup %7713 }
0x10e2   :  { %v7716_v49 = vpop.eup %7715  ;;  %v5337_v3 = vmul.f32 0.5, %v7714_v13 }
0x10e3   :  { %v5341_v18 = vmul.f32 0.5, %v7716_v49  ;;  %v7718_v23 = vpop.eup %7717 }
0x10e4   :  { %v5338_v20 = vadd.f32 0.5, %v5337_v3  ;;  %v7720_v4 = vpop.eup %7719 }
0x10e5   :  { %v5342_v36 = vadd.f32 0.5, %v5341_v18  ;;  %v5346_v21 = vmul.f32 0.5, %v7720_v4 }
0x10e6   :  { %v5349_v35 = vmul.f32 %v7718_v23, %v5338_v20 }
0x10e7   :  { %v5348_v56 = vmul.f32 %v5342_v36, %v9847_v26  ;;  %v5347_v27 = vadd.f32 0.5, %v5346_v21  ;;  %v7527_v26 = vld [vmem:[%s10193_s11 + $0x48] sm:$0xff]  }
0x10e9   :  { %v5350_v8 = vadd.f32 %v5349_v35, %v5348_v56 }
0x10eb   :  { %7721 = vtanh.f32 %v5350_v8 }
0x10f5   :  { %v7722_v28 = vpop.eup %7721 }
0x10f6   :  { %v5352_v42 = vmul.f32 %v7722_v28, %v5347_v27  ;;  %v7555_v27 = vld [vmem:[%s10194_s13] sm:$0xff]  }
0x10f8   :  { %v5355_v62 = vpack.c.bf16 %v5352_v42, %v5352_v42 }
0x10fa   :  { %5794 = vmatprep.mubr.bf16.mxu0 %v5355_v62  ;;  %5835 = vmatprep.mubr.bf16.mxu1 %v5355_v62  ;;  %v7556_v62 = vld [vmem:[%s10194_s13 + $0x8] sm:$0xff]  }
0x10fb   :  { %5795 = vmatmul.mubr.bf16.vlgmr.msra.gmra.mrb[128].mxu0 %v5354_v52  ;;  %5836 = vmatmul.mubr.bf16.vlgmr.msra.gmra.mrb[128].mxu1 %v5354_v52  ;;  %v7560_v52 = vld [vmem:[%s10194_s13 + $0x28] sm:$0xff]  }
0x10fc   :  { %7036 = vmatpush3.bf16.msra.mxu0 %v7525_v30  ;;  %7058 = vmatpush3.bf16.msra.mxu1 %v7526_v14  ;;  %v7557_v30 = vld [vmem:[%s10194_s13 + $0x10] sm:$0xff]   ;;  %v7558_v14 = vld [vmem:[%s10194_s13 + $0x18] sm:$0xff]  }
0x10fd   :  { %7037 = vmatprep.subr.bf16.mxu0 %v7527_v26  ;;  %7059 = vmatprep.subr.bf16.mxu1 %v7528_v25  ;;  %v7561_v26 = vld [vmem:[%s10194_s13 + $0x30] sm:$0xff]   ;;  %v7562_v25 = vld [vmem:[%s10194_s13 + $0x38] sm:$0xff]  }
0x1100   :  { %7038 = vmatpush3.bf16.msra.mxu0 %v7529_v55  ;;  %7060 = vmatpush3.bf16.msra.mxu1 %v7530_v53 }
0x1101   :  { %7039 = vmatprep.subr.bf16.mxu0 %v7531_v19  ;;  %7061 = vmatprep.subr.bf16.mxu1 %v7532_v37  ;;  %v6833_v19 = vld [vmem:[%s10196_s12] ss:$0 sm:$0xff] }
0x1104   :  { %7040 = vmatpush3.bf16.msra.mxu0 %v7533_v58  ;;  %7062 = vmatpush3.bf16.msra.mxu1 %v7534_v38 }
0x1105   :  { %7041 = vmatprep.subr.bf16.mxu0 %v7535_v34  ;;  %7063 = vmatprep.subr.bf16.mxu1 %v7536_v2 }
0x1108   :  { %7042 = vmatpush3.bf16.msra.mxu0 %v7537_v12  ;;  %7064 = vmatpush3.bf16.msra.mxu1 %v7538_v63 }
0x1109   :  { %7043 = vmatprep.subr.bf16.mxu0 %v7539_v1  ;;  %7065 = vmatprep.subr.bf16.mxu1 %v7540_v0 }
0x110c   :  { %7044 = vmatpush3.bf16.msra.mxu0 %v7541_v10  ;;  %7066 = vmatpush3.bf16.msra.mxu1 %v7542_v16 }
0x110d   :  { %7045 = vmatprep.subr.bf16.mxu0 %v7543_v40  ;;  %7067 = vmatprep.subr.bf16.mxu1 %v7544_v32  ;;  %v6866_v32 = vld [vmem:[%s10197_s14] ss:$0 sm:$0xff] }
0x1110   :  { %7046 = vmatpush3.bf16.msra.mxu0 %v7545_v51  ;;  %7068 = vmatpush3.bf16.msra.mxu1 %v7546_v48 }
0x1111   :  { %7047 = vmatprep.subr.bf16.mxu0 %v7547_v31  ;;  %7069 = vmatprep.subr.bf16.mxu1 %v7548_v22 }
0x1114   :  { %7048 = vmatpush3.bf16.msra.mxu0 %v7549_v9  ;;  %7070 = vmatpush3.bf16.msra.mxu1 %v7550_v7 }
0x1115   :  { %7049 = vmatprep.subr.bf16.mxu0 %v7551_v61  ;;  %7071 = vmatprep.subr.bf16.mxu1 %v7552_v11 }
0x1118   :  { %7050 = vmatpush3.bf16.msra.mxu0 %v7553_v43  ;;  %7072 = vmatpush3.bf16.msra.mxu1 %v7554_v41 }
0x1119   :  { %7088 = vmatprep.subr.bf16.mxu0 %v7756_v45 }
0x11ce   :  { %v5796_v33 = vpop.f32.mrb[128].mxu0  ;;  %v5837_v54 = vpop.f32.mrb[128].mxu1 }
0x11cf   :  { %v5797_v15 = vadd.f32 %v5796_v33, %v5425_v57  ;;  %v5838_v39 = vadd.f32 %v5837_v54, %v5433_v59  ;;  %v5798_v50 = vpop.f32.mrb[129].mxu0  ;;  %v5839_v46 = vpop.f32.mrb[129].mxu1 }
0x11d0   :  { %v5799_v13 = vadd.f32 %v5798_v50, %v5429_v47  ;;  %v5840_v49 = vadd.f32 %v5839_v46, %v5437_v29  ;;  %v5800_v3 = vpop.f32.mrb[130].mxu0  ;;  %v5841_v18 = vpop.f32.mrb[130].mxu1 }
0x11d1   :  { %v5844_v20 = vmax.f32 %v5797_v15, 0.0  ;;  %v5846_v23 = vmax.f32 %v5838_v39, 0.0  ;;  %v5801_v36 = vpop.f32.mrb[131].mxu0  ;;  %v5842_v35 = vpop.f32.mrb[131].mxu1 }
0x11d2   :  { %v5845_v56 = vmax.f32 %v5799_v13, 0.0  ;;  %v5847_v8 = vmax.f32 %v5840_v49, 0.0 }
0x11d3   :  { %v5848_v28 = vpack.c.bf16 %v5844_v20, %v5844_v20  ;;  %v5850_v42 = vpack.c.bf16 %v5846_v23, %v5846_v23 }
0x11d4   :  { %v5849_v4 = vpack.c.bf16 %v5845_v56, %v5845_v56  ;;  %v5851_v21 = vpack.c.bf16 %v5847_v8, %v5847_v8 }
0x11d6   :  { %6147 = vmatprep.mubr.bf16.mxu0 %v5849_v4  ;;  %6187 = vmatprep.mubr.bf16.mxu1 %v5851_v21 }
0x11d7   :  { %6148 = vmatmul.mubr.bf16.vlgmr.msra.gmra.mrb[132].mxu0 %v5848_v28  ;;  %6188 = vmatmul.mubr.bf16.vlgmr.msra.gmra.mrb[132].mxu1 %v5850_v42 }
0x11d8   :  { %7089 = vmatpush3.bf16.msra.mxu0 %v7555_v27  ;;  %7104 = vmatprep.mubr.msk.bf16.mxu0 %vm7757_vm0, %v7756_v45 }
0x11d9   :  { %7090 = vmatprep.subr.bf16.mxu0 %v7756_v45 }
0x11dc   :  { %7091 = vmatpush3.bf16.msra.mxu0 %v7556_v62 }
0x11dd   :  { %7092 = vmatprep.subr.bf16.mxu0 %v7756_v45 }
0x11e0   :  { %7093 = vmatpush3.bf16.msra.mxu0 %v7557_v30 }
0x11e1   :  { %7094 = vmatprep.subr.bf16.mxu0 %v7756_v45 }
0x11e4   :  { %7095 = vmatpush3.bf16.msra.mxu0 %v7558_v14 }
0x11e5   :  { %7096 = vmatprep.subr.bf16.mxu0 %v7756_v45 }
0x11e8   :  { %7097 = vmatpush3.bf16.msra.mxu0 %v7559_v60 }
0x11e9   :  { %7098 = vmatprep.subr.bf16.mxu0 %v7756_v45 }
0x11ec   :  { %7099 = vmatpush3.bf16.msra.mxu0 %v7560_v52 }
0x11ed   :  { %7100 = vmatprep.subr.bf16.mxu0 %v7756_v45 }
0x11f0   :  { %7101 = vmatpush3.bf16.msra.mxu0 %v7561_v26 }
0x11f1   :  { %7102 = vmatprep.subr.bf16.mxu0 %v7756_v45 }
0x11f4   :  { %7103 = vmatpush3.bf16.msra.mxu0 %v7562_v25 }
0x12aa   :  { %v7051_v55 = vpop.f32.mrb[132].mxu0  ;;  %v7073_v53 = vpop.f32.mrb[132].mxu1 }
0x12ab   :  { %v7052_v37 = vpop.f32.mrb[133].mxu0  ;;  %v7074_v58 = vpop.f32.mrb[133].mxu1 }
0x12ac   :  { %v7053_v38 = vadd.f32 %v7052_v37, %v7051_v55  ;;  %v7075_v34 = vadd.f32 %v7074_v58, %v7073_v53  ;;  %v7054_v2 = vpop.f32.mrb[134].mxu0  ;;  %v7076_v12 = vpop.f32.mrb[134].mxu1 }
0x12ad   :  { %v7055_v63 = vpop.f32.mrb[135].mxu0  ;;  %v7077_v1 = vpop.f32.mrb[135].mxu1 }
0x12ae   :  { %v6150_v0 = vadd.f32 %v7053_v38, %v6833_v19 }
0x12b0   :  { %v6190_v10 = vadd.f32 %v7075_v34, %v6150_v0 }
0x12b2   :  { %v6195_v16 = vmax.f32 %v6190_v10, 0.0 }
0x12b4   :  { %v6196_v40 = vpack.c.bf16 %v6195_v16, %v6195_v16 }
0x12b6   :  { %7105 = vmatmul.mubr.bf16.vlgmr.msra.gmra.mrb[136].mxu0 %v6196_v40 }
0x1389   :  { %v6302_v51 = vpop.f32.mrb[136].mxu0 }
0x138a   :  { %v6303_v48 = vadd.f32 %v6866_v32, %v6302_v51  ;;  %v7106_v31 = vpop.f32.mrb[137].mxu0 }
0x138b   :  { %v6305_v22 = vpop.f32.mrb[138].mxu0 }
0x138c   :  { %6308 = vst [vmem:[%s10198_s15] sm:$0xff] %v6303_v48  ;;  %v7107_v9 = vpop.f32.mrb[139].mxu0 }

</bundles_post_ra>
